<compile_context>
chip_gen: v7x
topology: tpu7x:2x2x1
jax: 0.10.0
libtpu: 0.0.40
codegen_flags: <defaults>
</compile_context>

<pallas_src>
import functools
import math

import numpy as np
import jax
import jax.numpy as jnp
from jax.experimental import pallas as pl
from jax.experimental.pallas import tpu as pltpu


# --------------------------------------------------------------------------
# Fused forward kernel (one grid step == one batch element, all VMEM-resident)
# --------------------------------------------------------------------------
def _fused_forward_kernel(c_ref, masks_ref, w_enc_ref, b_enc_ref,
                          w_aux_ref, b_aux_ref, w_dec_ref, b_dec_ref,
                          rec_ref, loss_ref, taps_ref, u_ref,
                          *, h, w, cin, c_be):
    f32 = jnp.float32
    hw = h * w
    c = c_ref[0]                                    # (cin, hw)

    # reflect-padding edge masks (0/1 f32 rows, lane-aligned with the pixels)
    m_w0 = masks_ref[0:1, :]                        # ww == 0      (dw == -1)
    m_wl = masks_ref[1:2, :]                        # ww == w - 1  (dw == +1)
    m_h0 = masks_ref[2:3, :]                        # hh == 0      (dh == -1)
    m_hl = masks_ref[3:4, :]                        # hh == h - 1  (dh == +1)

    def shift2d(x, dh, dw):
        """y[:, p] = x[:, refl(hh+dh)*w + refl(ww+dw)]  (reflect padding of 1)."""
        y = x
        if dw != 0:
            a = pltpu.roll(y, (-dw) % hw, axis=1)   # interior: read ww + dw
            b = pltpu.roll(y, dw % hw, axis=1)      # border:   read ww - dw (reflection)
            m = m_wl if dw > 0 else m_w0
            y = a + m * (b - a)
        if dh != 0:
            a = pltpu.roll(y, (-dh * w) % hw, axis=1)
            b = pltpu.roll(y, (dh * w) % hw, axis=1)
            m = m_hl if dh > 0 else m_h0
            y = a + m * (b - a)
        return y

    def build_taps(x):
        """Assemble the 9-tap stack of x (cin, hw) into taps_ref (9*cin, hw)."""
        t = 0
        for dh in (-1, 0, 1):
            for dw in (-1, 0, 1):
                taps_ref[t * cin:(t + 1) * cin, :] = shift2d(x, dh, dw)
                t += 1

    # --- Encoder1 (BE) + SmallEncoder1 (SE) on c: one (80,27)@(27,HW) matmul.
    #     (conv0 1x1 layers are folded into the 3x3 weights in the wrapper.)
    build_taps(c)
    enc = jnp.maximum(
        jnp.dot(w_enc_ref[...], taps_ref[...], preferred_element_type=f32)
        + b_enc_ref[...], 0.0)                      # (80, hw) = [BE(64) ; SE(16)]
    be_feat = enc[:c_be, :]                         # Encoder1 features of c

    # --- SE.conv11_aux (1x1 16->64) + ReLU, widened with an identity block so
    #     z == [feat_SE_aux ; feat_SE] (se_feat >= 0 so ReLU is a no-op there).
    z = jnp.maximum(
        jnp.dot(w_aux_ref[...], enc, preferred_element_type=f32) + b_aux_ref[...],
        0.0)                                        # (80, hw)

    # --- BD.conv11 (64->3) and SD.conv11 (16->3): one (54,80)@(80,HW) matmul,
    #     then per-tap shift-accumulate of the 3-row slices (post-matmul taps).
    u_ref[...] = jnp.dot(w_dec_ref[...], z, preferred_element_type=f32)  # (54, hw)
    sd_off = 9 * cin
    bd_acc = jnp.zeros((cin, hw), f32)
    sd_acc = jnp.zeros((cin, hw), f32)
    t = 0
    for dh in (-1, 0, 1):
        for dw in (-1, 0, 1):
            bd_acc = bd_acc + shift2d(u_ref[t * cin:(t + 1) * cin, :], dh, dw)
            sd_acc = sd_acc + shift2d(
                u_ref[sd_off + t * cin:sd_off + (t + 1) * cin, :], dh, dw)
            t += 1
    bd_out = bd_acc + b_dec_ref[:cin, :]            # Decoder1(feat_SE_aux)
    rec = sd_acc + b_dec_ref[cin:, :]               # SmallDecoder1(feat_SE)
    rec_ref[0] = rec.astype(rec_ref.dtype)          # lane-dense (cin, hw) NCHW block

    # --- BE on rec: reuse the fused encoder weights (SE rows computed, unused).
    build_taps(rec)
    be_rec = jnp.maximum(
        jnp.dot(w_enc_ref[...], taps_ref[...], preferred_element_type=f32)
        + b_enc_ref[...], 0.0)[:c_be, :]

    # --- per-batch-element MSE partial sums (finalized in the wrapper).
    d_pixl = rec - c
    d_perc = be_rec - be_feat
    d_kd = rec - bd_out
    s_pixl = jnp.sum(d_pixl * d_pixl)
    s_perc = jnp.sum(d_perc * d_perc)
    s_kd = jnp.sum(d_kd * d_kd)
    lane = jax.lax.broadcasted_iota(jnp.int32, (1, 128), 1)
    loss_ref[0] = (jnp.where(lane == 0, s_pixl, 0.0)
                   + jnp.where(lane == 1, s_perc, 0.0)
                   + jnp.where(lane == 2, s_kd, 0.0))


# --------------------------------------------------------------------------
# Wrapper-side weight preparation (tiny, runs once under jit)
# --------------------------------------------------------------------------
def _fold_1x1_into_3x3(conv0, conv3):
    """Compose a (linear, no-activation) 1x1 conv followed by a 3x3 conv."""
    w0, b0 = conv0                       # (1, cin, mid), (1, mid)
    w3, b3 = conv3                       # (9, mid, cout), (1, cout)
    w = jnp.einsum('cm,tmo->tco', w0[0], w3)                 # (9, cin, cout)
    b = jnp.einsum('m,tmo->o', b0[0], w3)[None, :] + b3      # (1, cout)
    return w, b


def _packT_in(wt):
    """(9, cin, cout) -> (cout, 9*cin): rows = out-ch, cols = (tap, in-ch)."""
    t, ci, co = wt.shape
    return jnp.transpose(wt, (2, 0, 1)).reshape(co, t * ci)


def _packT_out(wt):
    """(9, cin, cout) -> (9*cout, cin): rows grouped by tap (post-matmul form)."""
    t, ci, co = wt.shape
    return jnp.transpose(wt, (0, 2, 1)).reshape(t * co, ci)


# --------------------------------------------------------------------------
# Parameters (deterministic synthetic init; shapes follow stage-1 / 16x arch)
# --------------------------------------------------------------------------
def _init_conv(key, k, cin, cout):
    kw, kb = jax.random.split(key)
    fan_in = k * k * cin
    w = jax.random.normal(kw, (k * k, cin, cout), jnp.float32) / math.sqrt(fan_in)
    b = 0.01 * jax.random.normal(kb, (1, cout), jnp.float32)
    return w, b


def init_params(key):
    ks = jax.random.split(key, 7)
    return {
        "be_conv0":      _init_conv(ks[0], 1, 3, 3),     # Encoder1.conv0
        "be_conv11":     _init_conv(ks[1], 3, 3, 64),    # Encoder1.conv11
        "se_conv0":      _init_conv(ks[2], 1, 3, 3),     # SmallEncoder1.conv0
        "se_conv11":     _init_conv(ks[3], 3, 3, 16),    # SmallEncoder1.conv11
        "se_conv11_aux": _init_conv(ks[4], 1, 16, 64),   # SmallEncoder1.conv11_aux
        "bd_conv11":     _init_conv(ks[5], 3, 64, 3),    # Decoder1.conv11
        "sd_conv11":     _init_conv(ks[6], 3, 16, 3),    # SmallDecoder1.conv11
    }


# --------------------------------------------------------------------------
# Forward pass of TrainSD_With_WCTSE_KD2SD (single fused pallas_call)
# --------------------------------------------------------------------------
def forward(params, c_nchw, iter=0, updim_relu=True):
    del iter  # unused in the reference forward as well
    # TODO(synk): stage-1 SmallDecoder1_16x_aux has no up-dim aux layers, so
    # `updim_relu` has no effect here.
    # TODO(synk): losses are computed for the forward pass only; a training-
    # grade version needs a custom VJP honoring the PyTorch .data stop-grads.
    n, cin, h, w = c_nchw.shape
    hw = h * w
    # NCHW flattened directly -- no transpose, no im2col on the wrapper side.
    c_flat = c_nchw.reshape(n, cin, hw).astype(jnp.float32)

    c_be = params["be_conv11"][0].shape[-1]          # 64
    c_se = params["se_conv11"][0].shape[-1]          # 16
    c_enc = c_be + c_se

    # Fold the linear 1x1 conv0 layers into the following 3x3 convs.
    w_be, b_be = _fold_1x1_into_3x3(params["be_conv0"], params["be_conv11"])  # (9,3,64)
    w_se, b_se = _fold_1x1_into_3x3(params["se_conv0"], params["se_conv11"])  # (9,3,16)

    # Both encoder 3x3 convs as one (80, 27) weight (rows 0..63 BE, 64..79 SE).
    w_encT = jnp.concatenate([_packT_in(w_be), _packT_in(w_se)], axis=0)      # (80, 27)
    b_enc = jnp.concatenate([b_be, b_se], axis=1).reshape(c_enc, 1)           # (80, 1)

    # SE.conv11_aux widened with an identity block: z = [feat_SE_aux ; feat_SE].
    w_aux, b_aux = params["se_conv11_aux"]           # (1,16,64), (1,64)
    w_aux_ext = jnp.zeros((c_enc, c_enc), jnp.float32)
    w_aux_ext = w_aux_ext.at[:c_be, c_be:].set(w_aux[0].T)
    w_aux_ext = w_aux_ext.at[c_be:, c_be:].set(jnp.eye(c_se, dtype=jnp.float32))
    b_aux_ext = jnp.concatenate(
        [b_aux.reshape(c_be, 1), jnp.zeros((c_se, 1), jnp.float32)], axis=0)  # (80, 1)

    # BD(64->3) + SD(16->3) as one (54, 80) post-matmul weight:
    # rows 0..26 = BD taps (3 rows each), rows 27..53 = SD taps.
    w_bd, b_bd = params["bd_conv11"]
    w_sd, b_sd = params["sd_conv11"]
    w_decT = jnp.concatenate([
        jnp.concatenate([_packT_out(w_bd),
                         jnp.zeros((9 * cin, c_se), jnp.float32)], axis=1),
        jnp.concatenate([jnp.zeros((9 * cin, c_be), jnp.float32),
                         _packT_out(w_sd)], axis=1),
    ], axis=0)                                                                # (54, 80)
    b_dec = jnp.concatenate([b_bd, b_sd], axis=1).reshape(2 * cin, 1)         # (6, 1)

    # Reflect-padding edge masks, one 0/1 row per border (lane-aligned to pixels).
    idx = np.arange(hw)
    ww_np, hh_np = idx % w, idx // w
    masks = jnp.asarray(np.stack([ww_np == 0, ww_np == w - 1,
                                  hh_np == 0, hh_np == h - 1]).astype(np.float32))

    kernel = functools.partial(_fused_forward_kernel, h=h, w=w, cin=cin, c_be=c_be)
    rec_flat, loss_parts = pl.pallas_call(
        kernel,
        out_shape=(jax.ShapeDtypeStruct((n, cin, hw), jnp.float32),
                   jax.ShapeDtypeStruct((n, 1, 128), jnp.float32)),
        grid=(n,),
        in_specs=[
            pl.BlockSpec((1, cin, hw),    lambda i: (i, 0, 0)),   # image
            pl.BlockSpec(masks.shape,     lambda i: (0, 0)),      # edge masks
            pl.BlockSpec(w_encT.shape,    lambda i: (0, 0)),
            pl.BlockSpec(b_enc.shape,     lambda i: (0, 0)),
            pl.BlockSpec(w_aux_ext.shape, lambda i: (0, 0)),
            pl.BlockSpec(b_aux_ext.shape, lambda i: (0, 0)),
            pl.BlockSpec(w_decT.shape,    lambda i: (0, 0)),
            pl.BlockSpec(b_dec.shape,     lambda i: (0, 0)),
        ],
        out_specs=(
            pl.BlockSpec((1, cin, hw), lambda i: (i, 0, 0)),      # rec (NCHW-flat)
            pl.BlockSpec((1, 1, 128),  lambda i: (i, 0, 0)),      # loss partials
        ),
        scratch_shapes=[
            pltpu.VMEM((9 * cin, hw), jnp.float32),       # tap stack (27, HW)
            pltpu.VMEM((2 * 9 * cin, hw), jnp.float32),   # decoder per-tap products
        ],
        compiler_params=pltpu.CompilerParams(dimension_semantics=("parallel",)),
    )(c_flat, masks, w_encT, b_enc, w_aux_ext, b_aux_ext, w_decT, b_dec)

    sums = jnp.sum(loss_parts, axis=(0, 1))          # (128,)
    rec_pixl_loss = sums[0] / (n * hw * cin)
    rec_perc_loss = sums[1] / (n * hw * c_be)
    kd_feat_loss = sums[2] / (n * hw * cin)

    rec_nchw = rec_flat.reshape(n, cin, h, w)        # already NCHW, no transpose
    return rec_pixl_loss, rec_perc_loss, kd_feat_loss, rec_nchw


# --------------------------------------------------------------------------
# Plain-JAX reference (loose numerical cross-check only)
# --------------------------------------------------------------------------
def _ref_conv(x, w, b, ksize, reflect, relu):
    if reflect:
        x = jnp.pad(x, ((0, 0), (1, 1), (1, 1), (0, 0)), mode="reflect")
    n, hp, wp, cin = x.shape
    h, wo = hp - ksize + 1, wp - ksize + 1
    cols = []
    for kh in range(ksize):
        for kw in range(ksize):
            cols.append(x[:, kh:kh + h, kw:kw + wo, :])
    patch = jnp.stack(cols, axis=3)
    out = jnp.einsum('nhwtc,tco->nhwo', patch, w, precision='highest') + b[0]
    return jnp.maximum(out, 0.0) if relu else out


def _ref_forward(params, c_nchw):
    c = jnp.transpose(c_nchw, (0, 2, 3, 1))
    be0 = _ref_conv(c, *params["be_conv0"], 1, False, False)
    be_feat = _ref_conv(be0, *params["be_conv11"], 3, True, True)
    se0 = _ref_conv(c, *params["se_conv0"], 1, False, False)
    se_feat = _ref_conv(se0, *params["se_conv11"], 3, True, True)
    se_aux = _ref_conv(se_feat, *params["se_conv11_aux"], 1, False, True)
    bd = _ref_conv(se_aux, *params["bd_conv11"], 3, True, False)
    rec = _ref_conv(se_feat, *params["sd_conv11"], 3, True, False)
    pixl = jnp.mean((rec - c) ** 2)
    r0 = _ref_conv(rec, *params["be_conv0"], 1, False, False)
    be_rec = _ref_conv(r0, *params["be_conv11"], 3, True, True)
    perc = jnp.mean((be_rec - be_feat) ** 2)
    kd = jnp.mean((rec - bd) ** 2)
    return pixl, perc, kd, jnp.transpose(rec, (0, 3, 1, 2))


# --------------------------------------------------------------------------
if __name__ == "__main__":
    key = jax.random.PRNGKey(0)
    k_params, k_input = jax.random.split(key)
    params = init_params(k_params)

    # small content batch: N=2, C=3 (RGB), H=W=16, NCHW like PyTorch
    c = jax.random.normal(k_input, (2, 3, 16, 16), jnp.float32)

    fwd = jax.jit(forward, static_argnames=("iter", "updim_relu"))
    rec_pixl_loss, rec_perc_loss, kd_feat_loss, rec = fwd(params, c)
    jax.block_until_ready((rec_pixl_loss, rec_perc_loss, kd_feat_loss, rec))

    assert rec.shape == c.shape
    assert rec_pixl_loss.shape == () and rec_perc_loss.shape == () and kd_feat_loss.shape == ()

    # loose cross-check vs plain-JAX reference (tolerant of MXU precision)
    ref_pixl, ref_perc, ref_kd, ref_rec = _ref_forward(params, c)
    assert jnp.allclose(rec, ref_rec, atol=5e-2, rtol=5e-2), \
        float(jnp.max(jnp.abs(rec - ref_rec)))
    for got, want in ((rec_pixl_loss, ref_pixl),
                      (rec_perc_loss, ref_perc),
                      (kd_feat_loss, ref_kd)):
        assert jnp.allclose(got, want, rtol=2e-1, atol=1e-3), (float(got), float(want))

    print("KERNEL_OK")
</pallas_src>

<mosaic_0001>
module attributes {stable_mosaic.version = 11 : i64} {
  func.func @_fused_forward_kernel(%arg0: i32, %arg1: memref<1x3x256xf32, #tpu.memory_space<vmem>>, %arg2: memref<4x256xf32, #tpu.memory_space<vmem>>, %arg3: memref<80x27xf32, #tpu.memory_space<vmem>>, %arg4: memref<80x1xf32, #tpu.memory_space<vmem>>, %arg5: memref<80x80xf32, #tpu.memory_space<vmem>>, %arg6: memref<80x1xf32, #tpu.memory_space<vmem>>, %arg7: memref<54x80xf32, #tpu.memory_space<vmem>>, %arg8: memref<6x1xf32, #tpu.memory_space<vmem>>, %arg9: memref<1x3x256xf32, #tpu.memory_space<vmem>>, %arg10: memref<1x1x128xf32, #tpu.memory_space<vmem>>, %arg11: memref<27x256xf32, #tpu.memory_space<vmem>>, %arg12: memref<54x256xf32, #tpu.memory_space<vmem>>) attributes {dimension_semantics = [#tpu.dimension_semantics<parallel>], iteration_bounds = array<i64: 2>, scalar_prefetch = 0 : i64, scratch_operands = 2 : i64, tpu.core_type = #tpu.core_type<tc>, window_params = [{transform_indices = @transform_0, window_bounds = array<i64: 1, 3, 256>}, {pipeline_mode = #tpu.pipeline_mode<synchronous>, transform_indices = @transform_1, window_bounds = array<i64: 4, 256>}, {pipeline_mode = #tpu.pipeline_mode<synchronous>, transform_indices = @transform_2, window_bounds = array<i64: 80, 27>}, {pipeline_mode = #tpu.pipeline_mode<synchronous>, transform_indices = @transform_3, window_bounds = array<i64: 80, 1>}, {pipeline_mode = #tpu.pipeline_mode<synchronous>, transform_indices = @transform_4, window_bounds = array<i64: 80, 80>}, {pipeline_mode = #tpu.pipeline_mode<synchronous>, transform_indices = @transform_5, window_bounds = array<i64: 80, 1>}, {pipeline_mode = #tpu.pipeline_mode<synchronous>, transform_indices = @transform_6, window_bounds = array<i64: 54, 80>}, {pipeline_mode = #tpu.pipeline_mode<synchronous>, transform_indices = @transform_7, window_bounds = array<i64: 6, 1>}, {transform_indices = @transform_8, window_bounds = array<i64: 1, 3, 256>}, {transform_indices = @transform_9, window_bounds = array<i64: 1, 1, 128>}]} {
    %c0 = arith.constant 0 : index
    %c0_0 = arith.constant 0 : index
    %c0_1 = arith.constant 0 : index
    %0 = vector.load %arg1[%c0, %c0_0, %c0_1] : memref<1x3x256xf32, #tpu.memory_space<vmem>>, vector<1x3x256xf32>
    %1 = vector.shape_cast %0 : vector<1x3x256xf32> to vector<3x256xf32>
    %c0_2 = arith.constant 0 : index
    %c0_3 = arith.constant 0 : index
    %2 = vector.load %arg2[%c0_2, %c0_3] : memref<4x256xf32, #tpu.memory_space<vmem>>, vector<1x256xf32>
    %c1 = arith.constant 1 : index
    %c0_4 = arith.constant 0 : index
    %3 = vector.load %arg2[%c1, %c0_4] : memref<4x256xf32, #tpu.memory_space<vmem>>, vector<1x256xf32>
    %c2 = arith.constant 2 : index
    %c0_5 = arith.constant 0 : index
    %4 = vector.load %arg2[%c2, %c0_5] : memref<4x256xf32, #tpu.memory_space<vmem>>, vector<1x256xf32>
    %c3 = arith.constant 3 : index
    %c0_6 = arith.constant 0 : index
    %5 = vector.load %arg2[%c3, %c0_6] : memref<4x256xf32, #tpu.memory_space<vmem>>, vector<1x256xf32>
    %c1_i32 = arith.constant 1 : i32
    %6 = tpu.dynamic_rotate %1 by %c1_i32 dim 1 : vector<3x256xf32>, i32 -> vector<3x256xf32>
    %c255_i32 = arith.constant 255 : i32
    %7 = tpu.dynamic_rotate %1 by %c255_i32 dim 1 : vector<3x256xf32>, i32 -> vector<3x256xf32>
    %8 = arith.subf %7, %6 : vector<3x256xf32>
    %9 = vector.broadcast %2 : vector<1x256xf32> to vector<3x256xf32>
    %10 = arith.mulf %9, %8 : vector<3x256xf32>
    %11 = arith.addf %6, %10 : vector<3x256xf32>
    %c16_i32 = arith.constant 16 : i32
    %12 = tpu.dynamic_rotate %11 by %c16_i32 dim 1 : vector<3x256xf32>, i32 -> vector<3x256xf32>
    %c240_i32 = arith.constant 240 : i32
    %13 = tpu.dynamic_rotate %11 by %c240_i32 dim 1 : vector<3x256xf32>, i32 -> vector<3x256xf32>
    %14 = arith.subf %13, %12 : vector<3x256xf32>
    %15 = vector.broadcast %4 : vector<1x256xf32> to vector<3x256xf32>
    %16 = arith.mulf %15, %14 : vector<3x256xf32>
    %17 = arith.addf %12, %16 : vector<3x256xf32>
    %c0_7 = arith.constant 0 : index
    %c0_8 = arith.constant 0 : index
    %18 = vector.load %arg11[%c0_7, %c0_8] : memref<27x256xf32, #tpu.memory_space<vmem>>, vector<3x256xf32>
    tpu.vector_store %arg11[%c0_7, %c0_8], %17 {strides = array<i32>} : memref<27x256xf32, #tpu.memory_space<vmem>>, vector<3x256xf32>,
    %c16_i32_9 = arith.constant 16 : i32
    %19 = tpu.dynamic_rotate %1 by %c16_i32_9 dim 1 : vector<3x256xf32>, i32 -> vector<3x256xf32>
    %c240_i32_10 = arith.constant 240 : i32
    %20 = tpu.dynamic_rotate %1 by %c240_i32_10 dim 1 : vector<3x256xf32>, i32 -> vector<3x256xf32>
    %21 = arith.subf %20, %19 : vector<3x256xf32>
    %22 = vector.broadcast %4 : vector<1x256xf32> to vector<3x256xf32>
    %23 = arith.mulf %22, %21 : vector<3x256xf32>
    %24 = arith.addf %19, %23 : vector<3x256xf32>
    %c3_11 = arith.constant 3 : index
    %c0_12 = arith.constant 0 : index
    %25 = vector.load %arg11[%c3_11, %c0_12] : memref<27x256xf32, #tpu.memory_space<vmem>>, vector<3x256xf32>
    tpu.vector_store %arg11[%c3_11, %c0_12], %24 {strides = array<i32>} : memref<27x256xf32, #tpu.memory_space<vmem>>, vector<3x256xf32>,
    %c255_i32_13 = arith.constant 255 : i32
    %26 = tpu.dynamic_rotate %1 by %c255_i32_13 dim 1 : vector<3x256xf32>, i32 -> vector<3x256xf32>
    %c1_i32_14 = arith.constant 1 : i32
    %27 = tpu.dynamic_rotate %1 by %c1_i32_14 dim 1 : vector<3x256xf32>, i32 -> vector<3x256xf32>
    %28 = arith.subf %27, %26 : vector<3x256xf32>
    %29 = vector.broadcast %3 : vector<1x256xf32> to vector<3x256xf32>
    %30 = arith.mulf %29, %28 : vector<3x256xf32>
    %31 = arith.addf %26, %30 : vector<3x256xf32>
    %c16_i32_15 = arith.constant 16 : i32
    %32 = tpu.dynamic_rotate %31 by %c16_i32_15 dim 1 : vector<3x256xf32>, i32 -> vector<3x256xf32>
    %c240_i32_16 = arith.constant 240 : i32
    %33 = tpu.dynamic_rotate %31 by %c240_i32_16 dim 1 : vector<3x256xf32>, i32 -> vector<3x256xf32>
    %34 = arith.subf %33, %32 : vector<3x256xf32>
    %35 = vector.broadcast %4 : vector<1x256xf32> to vector<3x256xf32>
    %36 = arith.mulf %35, %34 : vector<3x256xf32>
    %37 = arith.addf %32, %36 : vector<3x256xf32>
    %c6 = arith.constant 6 : index
    %c0_17 = arith.constant 0 : index
    %38 = vector.load %arg11[%c6, %c0_17] : memref<27x256xf32, #tpu.memory_space<vmem>>, vector<3x256xf32>
    tpu.vector_store %arg11[%c6, %c0_17], %37 {strides = array<i32>} : memref<27x256xf32, #tpu.memory_space<vmem>>, vector<3x256xf32>,
    %c1_i32_18 = arith.constant 1 : i32
    %39 = tpu.dynamic_rotate %1 by %c1_i32_18 dim 1 : vector<3x256xf32>, i32 -> vector<3x256xf32>
    %c255_i32_19 = arith.constant 255 : i32
    %40 = tpu.dynamic_rotate %1 by %c255_i32_19 dim 1 : vector<3x256xf32>, i32 -> vector<3x256xf32>
    %41 = arith.subf %40, %39 : vector<3x256xf32>
    %42 = vector.broadcast %2 : vector<1x256xf32> to vector<3x256xf32>
    %43 = arith.mulf %42, %41 : vector<3x256xf32>
    %44 = arith.addf %39, %43 : vector<3x256xf32>
    %c9 = arith.constant 9 : index
    %c0_20 = arith.constant 0 : index
    %45 = vector.load %arg11[%c9, %c0_20] : memref<27x256xf32, #tpu.memory_space<vmem>>, vector<3x256xf32>
    tpu.vector_store %arg11[%c9, %c0_20], %44 {strides = array<i32>} : memref<27x256xf32, #tpu.memory_space<vmem>>, vector<3x256xf32>,
    %c12 = arith.constant 12 : index
    %c0_21 = arith.constant 0 : index
    %46 = vector.load %arg11[%c12, %c0_21] : memref<27x256xf32, #tpu.memory_space<vmem>>, vector<3x256xf32>
    tpu.vector_store %arg11[%c12, %c0_21], %1 {strides = array<i32>} : memref<27x256xf32, #tpu.memory_space<vmem>>, vector<3x256xf32>,
    %c255_i32_22 = arith.constant 255 : i32
    %47 = tpu.dynamic_rotate %1 by %c255_i32_22 dim 1 : vector<3x256xf32>, i32 -> vector<3x256xf32>
    %c1_i32_23 = arith.constant 1 : i32
    %48 = tpu.dynamic_rotate %1 by %c1_i32_23 dim 1 : vector<3x256xf32>, i32 -> vector<3x256xf32>
    %49 = arith.subf %48, %47 : vector<3x256xf32>
    %50 = vector.broadcast %3 : vector<1x256xf32> to vector<3x256xf32>
    %51 = arith.mulf %50, %49 : vector<3x256xf32>
    %52 = arith.addf %47, %51 : vector<3x256xf32>
    %c15 = arith.constant 15 : index
    %c0_24 = arith.constant 0 : index
    %53 = vector.load %arg11[%c15, %c0_24] : memref<27x256xf32, #tpu.memory_space<vmem>>, vector<3x256xf32>
    tpu.vector_store %arg11[%c15, %c0_24], %52 {strides = array<i32>} : memref<27x256xf32, #tpu.memory_space<vmem>>, vector<3x256xf32>,
    %c1_i32_25 = arith.constant 1 : i32
    %54 = tpu.dynamic_rotate %1 by %c1_i32_25 dim 1 : vector<3x256xf32>, i32 -> vector<3x256xf32>
    %c255_i32_26 = arith.constant 255 : i32
    %55 = tpu.dynamic_rotate %1 by %c255_i32_26 dim 1 : vector<3x256xf32>, i32 -> vector<3x256xf32>
    %56 = arith.subf %55, %54 : vector<3x256xf32>
    %57 = vector.broadcast %2 : vector<1x256xf32> to vector<3x256xf32>
    %58 = arith.mulf %57, %56 : vector<3x256xf32>
    %59 = arith.addf %54, %58 : vector<3x256xf32>
    %c240_i32_27 = arith.constant 240 : i32
    %60 = tpu.dynamic_rotate %59 by %c240_i32_27 dim 1 : vector<3x256xf32>, i32 -> vector<3x256xf32>
    %c16_i32_28 = arith.constant 16 : i32
    %61 = tpu.dynamic_rotate %59 by %c16_i32_28 dim 1 : vector<3x256xf32>, i32 -> vector<3x256xf32>
    %62 = arith.subf %61, %60 : vector<3x256xf32>
    %63 = vector.broadcast %5 : vector<1x256xf32> to vector<3x256xf32>
    %64 = arith.mulf %63, %62 : vector<3x256xf32>
    %65 = arith.addf %60, %64 : vector<3x256xf32>
    %c18 = arith.constant 18 : index
    %c0_29 = arith.constant 0 : index
    %66 = vector.load %arg11[%c18, %c0_29] : memref<27x256xf32, #tpu.memory_space<vmem>>, vector<3x256xf32>
    tpu.vector_store %arg11[%c18, %c0_29], %65 {strides = array<i32>} : memref<27x256xf32, #tpu.memory_space<vmem>>, vector<3x256xf32>,
    %c240_i32_30 = arith.constant 240 : i32
    %67 = tpu.dynamic_rotate %1 by %c240_i32_30 dim 1 : vector<3x256xf32>, i32 -> vector<3x256xf32>
    %c16_i32_31 = arith.constant 16 : i32
    %68 = tpu.dynamic_rotate %1 by %c16_i32_31 dim 1 : vector<3x256xf32>, i32 -> vector<3x256xf32>
    %69 = arith.subf %68, %67 : vector<3x256xf32>
    %70 = vector.broadcast %5 : vector<1x256xf32> to vector<3x256xf32>
    %71 = arith.mulf %70, %69 : vector<3x256xf32>
    %72 = arith.addf %67, %71 : vector<3x256xf32>
    %c21 = arith.constant 21 : index
    %c0_32 = arith.constant 0 : index
    %73 = vector.load %arg11[%c21, %c0_32] : memref<27x256xf32, #tpu.memory_space<vmem>>, vector<3x256xf32>
    tpu.vector_store %arg11[%c21, %c0_32], %72 {strides = array<i32>} : memref<27x256xf32, #tpu.memory_space<vmem>>, vector<3x256xf32>,
    %c255_i32_33 = arith.constant 255 : i32
    %74 = tpu.dynamic_rotate %1 by %c255_i32_33 dim 1 : vector<3x256xf32>, i32 -> vector<3x256xf32>
    %c1_i32_34 = arith.constant 1 : i32
    %75 = tpu.dynamic_rotate %1 by %c1_i32_34 dim 1 : vector<3x256xf32>, i32 -> vector<3x256xf32>
    %76 = arith.subf %75, %74 : vector<3x256xf32>
    %77 = vector.broadcast %3 : vector<1x256xf32> to vector<3x256xf32>
    %78 = arith.mulf %77, %76 : vector<3x256xf32>
    %79 = arith.addf %74, %78 : vector<3x256xf32>
    %c240_i32_35 = arith.constant 240 : i32
    %80 = tpu.dynamic_rotate %79 by %c240_i32_35 dim 1 : vector<3x256xf32>, i32 -> vector<3x256xf32>
    %c16_i32_36 = arith.constant 16 : i32
    %81 = tpu.dynamic_rotate %79 by %c16_i32_36 dim 1 : vector<3x256xf32>, i32 -> vector<3x256xf32>
    %82 = arith.subf %81, %80 : vector<3x256xf32>
    %83 = vector.broadcast %5 : vector<1x256xf32> to vector<3x256xf32>
    %84 = arith.mulf %83, %82 : vector<3x256xf32>
    %85 = arith.addf %80, %84 : vector<3x256xf32>
    %c24 = arith.constant 24 : index
    %c0_37 = arith.constant 0 : index
    %86 = vector.load %arg11[%c24, %c0_37] : memref<27x256xf32, #tpu.memory_space<vmem>>, vector<3x256xf32>
    tpu.vector_store %arg11[%c24, %c0_37], %85 {strides = array<i32>} : memref<27x256xf32, #tpu.memory_space<vmem>>, vector<3x256xf32>,
    %c0_38 = arith.constant 0 : index
    %c0_39 = arith.constant 0 : index
    %87 = vector.load %arg3[%c0_38, %c0_39] : memref<80x27xf32, #tpu.memory_space<vmem>>, vector<80x27xf32>
    %c0_40 = arith.constant 0 : index
    %c0_41 = arith.constant 0 : index
    %88 = vector.load %arg11[%c0_40, %c0_41] : memref<27x256xf32, #tpu.memory_space<vmem>>, vector<27x256xf32>
    %cst = arith.constant dense<0.000000e+00> : vector<80x256xf32>
    %89 = tpu.matmul %87, %88, %cst {dimension_numbers = #tpu.dot_dimension_numbers<[1], [0], [0], [1], [0, 0, 1, 1], [], []>} : vector<80x27xf32>, vector<27x256xf32>, vector<80x256xf32> -> vector<80x256xf32>
    %c0_42 = arith.constant 0 : index
    %c0_43 = arith.constant 0 : index
    %90 = vector.load %arg4[%c0_42, %c0_43] : memref<80x1xf32, #tpu.memory_space<vmem>>, vector<80x1xf32>
    %91 = vector.broadcast %90 : vector<80x1xf32> to vector<80x256xf32>
    %92 = arith.addf %89, %91 : vector<80x256xf32>
    %cst_44 = arith.constant 0.000000e+00 : f32
    %93 = vector.broadcast %cst_44 : f32 to vector<80x256xf32>
    %94 = arith.maximumf %92, %93 : vector<80x256xf32>
    %95 = vector.extract_strided_slice %94 {offsets = [0, 0], sizes = [64, 256], strides = [1, 1]} : vector<80x256xf32> to vector<64x256xf32>
    %c0_45 = arith.constant 0 : index
    %c0_46 = arith.constant 0 : index
    %96 = vector.load %arg5[%c0_45, %c0_46] : memref<80x80xf32, #tpu.memory_space<vmem>>, vector<80x80xf32>
    %cst_47 = arith.constant dense<0.000000e+00> : vector<80x256xf32>
    %97 = tpu.matmul %96, %94, %cst_47 {dimension_numbers = #tpu.dot_dimension_numbers<[1], [0], [0], [1], [0, 0, 1, 1], [], []>} : vector<80x80xf32>, vector<80x256xf32>, vector<80x256xf32> -> vector<80x256xf32>
    %c0_48 = arith.constant 0 : index
    %c0_49 = arith.constant 0 : index
    %98 = vector.load %arg6[%c0_48, %c0_49] : memref<80x1xf32, #tpu.memory_space<vmem>>, vector<80x1xf32>
    %99 = vector.broadcast %98 : vector<80x1xf32> to vector<80x256xf32>
    %100 = arith.addf %97, %99 : vector<80x256xf32>
    %cst_50 = arith.constant 0.000000e+00 : f32
    %101 = vector.broadcast %cst_50 : f32 to vector<80x256xf32>
    %102 = arith.maximumf %100, %101 : vector<80x256xf32>
    %c0_51 = arith.constant 0 : index
    %c0_52 = arith.constant 0 : index
    %103 = vector.load %arg7[%c0_51, %c0_52] : memref<54x80xf32, #tpu.memory_space<vmem>>, vector<54x80xf32>
    %cst_53 = arith.constant dense<0.000000e+00> : vector<54x256xf32>
    %104 = tpu.matmul %103, %102, %cst_53 {dimension_numbers = #tpu.dot_dimension_numbers<[1], [0], [0], [1], [0, 0, 1, 1], [], []>} : vector<54x80xf32>, vector<80x256xf32>, vector<54x256xf32> -> vector<54x256xf32>
    %c0_54 = arith.constant 0 : index
    %c0_55 = arith.constant 0 : index
    %105 = vector.load %arg12[%c0_54, %c0_55] : memref<54x256xf32, #tpu.memory_space<vmem>>, vector<54x256xf32>
    tpu.vector_store %arg12[%c0_54, %c0_55], %104 {strides = array<i32>} : memref<54x256xf32, #tpu.memory_space<vmem>>, vector<54x256xf32>,
    %cst_56 = arith.constant 0.000000e+00 : f32
    %106 = vector.broadcast %cst_56 : f32 to vector<3x256xf32>
    %cst_57 = arith.constant 0.000000e+00 : f32
    %107 = vector.broadcast %cst_57 : f32 to vector<3x256xf32>
    %c0_58 = arith.constant 0 : index
    %c0_59 = arith.constant 0 : index
    %108 = vector.load %arg12[%c0_58, %c0_59] : memref<54x256xf32, #tpu.memory_space<vmem>>, vector<3x256xf32>
    %c1_i32_60 = arith.constant 1 : i32
    %109 = tpu.dynamic_rotate %108 by %c1_i32_60 dim 1 : vector<3x256xf32>, i32 -> vector<3x256xf32>
    %c255_i32_61 = arith.constant 255 : i32
    %110 = tpu.dynamic_rotate %108 by %c255_i32_61 dim 1 : vector<3x256xf32>, i32 -> vector<3x256xf32>
    %111 = arith.subf %110, %109 : vector<3x256xf32>
    %112 = vector.broadcast %2 : vector<1x256xf32> to vector<3x256xf32>
    %113 = arith.mulf %112, %111 : vector<3x256xf32>
    %114 = arith.addf %109, %113 : vector<3x256xf32>
    %c16_i32_62 = arith.constant 16 : i32
    %115 = tpu.dynamic_rotate %114 by %c16_i32_62 dim 1 : vector<3x256xf32>, i32 -> vector<3x256xf32>
    %c240_i32_63 = arith.constant 240 : i32
    %116 = tpu.dynamic_rotate %114 by %c240_i32_63 dim 1 : vector<3x256xf32>, i32 -> vector<3x256xf32>
    %117 = arith.subf %116, %115 : vector<3x256xf32>
    %118 = vector.broadcast %4 : vector<1x256xf32> to vector<3x256xf32>
    %119 = arith.mulf %118, %117 : vector<3x256xf32>
    %120 = arith.addf %115, %119 : vector<3x256xf32>
    %121 = arith.addf %106, %120 : vector<3x256xf32>
    %c27 = arith.constant 27 : index
    %c0_64 = arith.constant 0 : index
    %122 = vector.load %arg12[%c27, %c0_64] : memref<54x256xf32, #tpu.memory_space<vmem>>, vector<3x256xf32>
    %c1_i32_65 = arith.constant 1 : i32
    %123 = tpu.dynamic_rotate %122 by %c1_i32_65 dim 1 : vector<3x256xf32>, i32 -> vector<3x256xf32>
    %c255_i32_66 = arith.constant 255 : i32
    %124 = tpu.dynamic_rotate %122 by %c255_i32_66 dim 1 : vector<3x256xf32>, i32 -> vector<3x256xf32>
    %125 = arith.subf %124, %123 : vector<3x256xf32>
    %126 = vector.broadcast %2 : vector<1x256xf32> to vector<3x256xf32>
    %127 = arith.mulf %126, %125 : vector<3x256xf32>
    %128 = arith.addf %123, %127 : vector<3x256xf32>
    %c16_i32_67 = arith.constant 16 : i32
    %129 = tpu.dynamic_rotate %128 by %c16_i32_67 dim 1 : vector<3x256xf32>, i32 -> vector<3x256xf32>
    %c240_i32_68 = arith.constant 240 : i32
    %130 = tpu.dynamic_rotate %128 by %c240_i32_68 dim 1 : vector<3x256xf32>, i32 -> vector<3x256xf32>
    %131 = arith.subf %130, %129 : vector<3x256xf32>
    %132 = vector.broadcast %4 : vector<1x256xf32> to vector<3x256xf32>
    %133 = arith.mulf %132, %131 : vector<3x256xf32>
    %134 = arith.addf %129, %133 : vector<3x256xf32>
    %135 = arith.addf %107, %134 : vector<3x256xf32>
    %c3_69 = arith.constant 3 : index
    %c0_70 = arith.constant 0 : index
    %136 = vector.load %arg12[%c3_69, %c0_70] : memref<54x256xf32, #tpu.memory_space<vmem>>, vector<3x256xf32>
    %c16_i32_71 = arith.constant 16 : i32
    %137 = tpu.dynamic_rotate %136 by %c16_i32_71 dim 1 : vector<3x256xf32>, i32 -> vector<3x256xf32>
    %c240_i32_72 = arith.constant 240 : i32
    %138 = tpu.dynamic_rotate %136 by %c240_i32_72 dim 1 : vector<3x256xf32>, i32 -> vector<3x256xf32>
    %139 = arith.subf %138, %137 : vector<3x256xf32>
    %140 = vector.broadcast %4 : vector<1x256xf32> to vector<3x256xf32>
    %141 = arith.mulf %140, %139 : vector<3x256xf32>
    %142 = arith.addf %137, %141 : vector<3x256xf32>
    %143 = arith.addf %121, %142 : vector<3x256xf32>
    %c30 = arith.constant 30 : index
    %c0_73 = arith.constant 0 : index
    %144 = vector.load %arg12[%c30, %c0_73] : memref<54x256xf32, #tpu.memory_space<vmem>>, vector<3x256xf32>
    %c16_i32_74 = arith.constant 16 : i32
    %145 = tpu.dynamic_rotate %144 by %c16_i32_74 dim 1 : vector<3x256xf32>, i32 -> vector<3x256xf32>
    %c240_i32_75 = arith.constant 240 : i32
    %146 = tpu.dynamic_rotate %144 by %c240_i32_75 dim 1 : vector<3x256xf32>, i32 -> vector<3x256xf32>
    %147 = arith.subf %146, %145 : vector<3x256xf32>
    %148 = vector.broadcast %4 : vector<1x256xf32> to vector<3x256xf32>
    %149 = arith.mulf %148, %147 : vector<3x256xf32>
    %150 = arith.addf %145, %149 : vector<3x256xf32>
    %151 = arith.addf %135, %150 : vector<3x256xf32>
    %c6_76 = arith.constant 6 : index
    %c0_77 = arith.constant 0 : index
    %152 = vector.load %arg12[%c6_76, %c0_77] : memref<54x256xf32, #tpu.memory_space<vmem>>, vector<3x256xf32>
    %c255_i32_78 = arith.constant 255 : i32
    %153 = tpu.dynamic_rotate %152 by %c255_i32_78 dim 1 : vector<3x256xf32>, i32 -> vector<3x256xf32>
    %c1_i32_79 = arith.constant 1 : i32
    %154 = tpu.dynamic_rotate %152 by %c1_i32_79 dim 1 : vector<3x256xf32>, i32 -> vector<3x256xf32>
    %155 = arith.subf %154, %153 : vector<3x256xf32>
    %156 = vector.broadcast %3 : vector<1x256xf32> to vector<3x256xf32>
    %157 = arith.mulf %156, %155 : vector<3x256xf32>
    %158 = arith.addf %153, %157 : vector<3x256xf32>
    %c16_i32_80 = arith.constant 16 : i32
    %159 = tpu.dynamic_rotate %158 by %c16_i32_80 dim 1 : vector<3x256xf32>, i32 -> vector<3x256xf32>
    %c240_i32_81 = arith.constant 240 : i32
    %160 = tpu.dynamic_rotate %158 by %c240_i32_81 dim 1 : vector<3x256xf32>, i32 -> vector<3x256xf32>
    %161 = arith.subf %160, %159 : vector<3x256xf32>
    %162 = vector.broadcast %4 : vector<1x256xf32> to vector<3x256xf32>
    %163 = arith.mulf %162, %161 : vector<3x256xf32>
    %164 = arith.addf %159, %163 : vector<3x256xf32>
    %165 = arith.addf %143, %164 : vector<3x256xf32>
    %c33 = arith.constant 33 : index
    %c0_82 = arith.constant 0 : index
    %166 = vector.load %arg12[%c33, %c0_82] : memref<54x256xf32, #tpu.memory_space<vmem>>, vector<3x256xf32>
    %c255_i32_83 = arith.constant 255 : i32
    %167 = tpu.dynamic_rotate %166 by %c255_i32_83 dim 1 : vector<3x256xf32>, i32 -> vector<3x256xf32>
    %c1_i32_84 = arith.constant 1 : i32
    %168 = tpu.dynamic_rotate %166 by %c1_i32_84 dim 1 : vector<3x256xf32>, i32 -> vector<3x256xf32>
    %169 = arith.subf %168, %167 : vector<3x256xf32>
    %170 = vector.broadcast %3 : vector<1x256xf32> to vector<3x256xf32>
    %171 = arith.mulf %170, %169 : vector<3x256xf32>
    %172 = arith.addf %167, %171 : vector<3x256xf32>
    %c16_i32_85 = arith.constant 16 : i32
    %173 = tpu.dynamic_rotate %172 by %c16_i32_85 dim 1 : vector<3x256xf32>, i32 -> vector<3x256xf32>
    %c240_i32_86 = arith.constant 240 : i32
    %174 = tpu.dynamic_rotate %172 by %c240_i32_86 dim 1 : vector<3x256xf32>, i32 -> vector<3x256xf32>
    %175 = arith.subf %174, %173 : vector<3x256xf32>
    %176 = vector.broadcast %4 : vector<1x256xf32> to vector<3x256xf32>
    %177 = arith.mulf %176, %175 : vector<3x256xf32>
    %178 = arith.addf %173, %177 : vector<3x256xf32>
    %179 = arith.addf %151, %178 : vector<3x256xf32>
    %c9_87 = arith.constant 9 : index
    %c0_88 = arith.constant 0 : index
    %180 = vector.load %arg12[%c9_87, %c0_88] : memref<54x256xf32, #tpu.memory_space<vmem>>, vector<3x256xf32>
    %c1_i32_89 = arith.constant 1 : i32
    %181 = tpu.dynamic_rotate %180 by %c1_i32_89 dim 1 : vector<3x256xf32>, i32 -> vector<3x256xf32>
    %c255_i32_90 = arith.constant 255 : i32
    %182 = tpu.dynamic_rotate %180 by %c255_i32_90 dim 1 : vector<3x256xf32>, i32 -> vector<3x256xf32>
    %183 = arith.subf %182, %181 : vector<3x256xf32>
    %184 = vector.broadcast %2 : vector<1x256xf32> to vector<3x256xf32>
    %185 = arith.mulf %184, %183 : vector<3x256xf32>
    %186 = arith.addf %181, %185 : vector<3x256xf32>
    %187 = arith.addf %165, %186 : vector<3x256xf32>
    %c36 = arith.constant 36 : index
    %c0_91 = arith.constant 0 : index
    %188 = vector.load %arg12[%c36, %c0_91] : memref<54x256xf32, #tpu.memory_space<vmem>>, vector<3x256xf32>
    %c1_i32_92 = arith.constant 1 : i32
    %189 = tpu.dynamic_rotate %188 by %c1_i32_92 dim 1 : vector<3x256xf32>, i32 -> vector<3x256xf32>
    %c255_i32_93 = arith.constant 255 : i32
    %190 = tpu.dynamic_rotate %188 by %c255_i32_93 dim 1 : vector<3x256xf32>, i32 -> vector<3x256xf32>
    %191 = arith.subf %190, %189 : vector<3x256xf32>
    %192 = vector.broadcast %2 : vector<1x256xf32> to vector<3x256xf32>
    %193 = arith.mulf %192, %191 : vector<3x256xf32>
    %194 = arith.addf %189, %193 : vector<3x256xf32>
    %195 = arith.addf %179, %194 : vector<3x256xf32>
    %c12_94 = arith.constant 12 : index
    %c0_95 = arith.constant 0 : index
    %196 = vector.load %arg12[%c12_94, %c0_95] : memref<54x256xf32, #tpu.memory_space<vmem>>, vector<3x256xf32>
    %197 = arith.addf %187, %196 : vector<3x256xf32>
    %c39 = arith.constant 39 : index
    %c0_96 = arith.constant 0 : index
    %198 = vector.load %arg12[%c39, %c0_96] : memref<54x256xf32, #tpu.memory_space<vmem>>, vector<3x256xf32>
    %199 = arith.addf %195, %198 : vector<3x256xf32>
    %c15_97 = arith.constant 15 : index
    %c0_98 = arith.constant 0 : index
    %200 = vector.load %arg12[%c15_97, %c0_98] : memref<54x256xf32, #tpu.memory_space<vmem>>, vector<3x256xf32>
    %c255_i32_99 = arith.constant 255 : i32
    %201 = tpu.dynamic_rotate %200 by %c255_i32_99 dim 1 : vector<3x256xf32>, i32 -> vector<3x256xf32>
    %c1_i32_100 = arith.constant 1 : i32
    %202 = tpu.dynamic_rotate %200 by %c1_i32_100 dim 1 : vector<3x256xf32>, i32 -> vector<3x256xf32>
    %203 = arith.subf %202, %201 : vector<3x256xf32>
    %204 = vector.broadcast %3 : vector<1x256xf32> to vector<3x256xf32>
    %205 = arith.mulf %204, %203 : vector<3x256xf32>
    %206 = arith.addf %201, %205 : vector<3x256xf32>
    %207 = arith.addf %197, %206 : vector<3x256xf32>
    %c42 = arith.constant 42 : index
    %c0_101 = arith.constant 0 : index
    %208 = vector.load %arg12[%c42, %c0_101] : memref<54x256xf32, #tpu.memory_space<vmem>>, vector<3x256xf32>
    %c255_i32_102 = arith.constant 255 : i32
    %209 = tpu.dynamic_rotate %208 by %c255_i32_102 dim 1 : vector<3x256xf32>, i32 -> vector<3x256xf32>
    %c1_i32_103 = arith.constant 1 : i32
    %210 = tpu.dynamic_rotate %208 by %c1_i32_103 dim 1 : vector<3x256xf32>, i32 -> vector<3x256xf32>
    %211 = arith.subf %210, %209 : vector<3x256xf32>
    %212 = vector.broadcast %3 : vector<1x256xf32> to vector<3x256xf32>
    %213 = arith.mulf %212, %211 : vector<3x256xf32>
    %214 = arith.addf %209, %213 : vector<3x256xf32>
    %215 = arith.addf %199, %214 : vector<3x256xf32>
    %c18_104 = arith.constant 18 : index
    %c0_105 = arith.constant 0 : index
    %216 = vector.load %arg12[%c18_104, %c0_105] : memref<54x256xf32, #tpu.memory_space<vmem>>, vector<3x256xf32>
    %c1_i32_106 = arith.constant 1 : i32
    %217 = tpu.dynamic_rotate %216 by %c1_i32_106 dim 1 : vector<3x256xf32>, i32 -> vector<3x256xf32>
    %c255_i32_107 = arith.constant 255 : i32
    %218 = tpu.dynamic_rotate %216 by %c255_i32_107 dim 1 : vector<3x256xf32>, i32 -> vector<3x256xf32>
    %219 = arith.subf %218, %217 : vector<3x256xf32>
    %220 = vector.broadcast %2 : vector<1x256xf32> to vector<3x256xf32>
    %221 = arith.mulf %220, %219 : vector<3x256xf32>
    %222 = arith.addf %217, %221 : vector<3x256xf32>
    %c240_i32_108 = arith.constant 240 : i32
    %223 = tpu.dynamic_rotate %222 by %c240_i32_108 dim 1 : vector<3x256xf32>, i32 -> vector<3x256xf32>
    %c16_i32_109 = arith.constant 16 : i32
    %224 = tpu.dynamic_rotate %222 by %c16_i32_109 dim 1 : vector<3x256xf32>, i32 -> vector<3x256xf32>
    %225 = arith.subf %224, %223 : vector<3x256xf32>
    %226 = vector.broadcast %5 : vector<1x256xf32> to vector<3x256xf32>
    %227 = arith.mulf %226, %225 : vector<3x256xf32>
    %228 = arith.addf %223, %227 : vector<3x256xf32>
    %229 = arith.addf %207, %228 : vector<3x256xf32>
    %c45 = arith.constant 45 : index
    %c0_110 = arith.constant 0 : index
    %230 = vector.load %arg12[%c45, %c0_110] : memref<54x256xf32, #tpu.memory_space<vmem>>, vector<3x256xf32>
    %c1_i32_111 = arith.constant 1 : i32
    %231 = tpu.dynamic_rotate %230 by %c1_i32_111 dim 1 : vector<3x256xf32>, i32 -> vector<3x256xf32>
    %c255_i32_112 = arith.constant 255 : i32
    %232 = tpu.dynamic_rotate %230 by %c255_i32_112 dim 1 : vector<3x256xf32>, i32 -> vector<3x256xf32>
    %233 = arith.subf %232, %231 : vector<3x256xf32>
    %234 = vector.broadcast %2 : vector<1x256xf32> to vector<3x256xf32>
    %235 = arith.mulf %234, %233 : vector<3x256xf32>
    %236 = arith.addf %231, %235 : vector<3x256xf32>
    %c240_i32_113 = arith.constant 240 : i32
    %237 = tpu.dynamic_rotate %236 by %c240_i32_113 dim 1 : vector<3x256xf32>, i32 -> vector<3x256xf32>
    %c16_i32_114 = arith.constant 16 : i32
    %238 = tpu.dynamic_rotate %236 by %c16_i32_114 dim 1 : vector<3x256xf32>, i32 -> vector<3x256xf32>
    %239 = arith.subf %238, %237 : vector<3x256xf32>
    %240 = vector.broadcast %5 : vector<1x256xf32> to vector<3x256xf32>
    %241 = arith.mulf %240, %239 : vector<3x256xf32>
    %242 = arith.addf %237, %241 : vector<3x256xf32>
    %243 = arith.addf %215, %242 : vector<3x256xf32>
    %c21_115 = arith.constant 21 : index
    %c0_116 = arith.constant 0 : index
    %244 = vector.load %arg12[%c21_115, %c0_116] : memref<54x256xf32, #tpu.memory_space<vmem>>, vector<3x256xf32>
    %c240_i32_117 = arith.constant 240 : i32
    %245 = tpu.dynamic_rotate %244 by %c240_i32_117 dim 1 : vector<3x256xf32>, i32 -> vector<3x256xf32>
    %c16_i32_118 = arith.constant 16 : i32
    %246 = tpu.dynamic_rotate %244 by %c16_i32_118 dim 1 : vector<3x256xf32>, i32 -> vector<3x256xf32>
    %247 = arith.subf %246, %245 : vector<3x256xf32>
    %248 = vector.broadcast %5 : vector<1x256xf32> to vector<3x256xf32>
    %249 = arith.mulf %248, %247 : vector<3x256xf32>
    %250 = arith.addf %245, %249 : vector<3x256xf32>
    %251 = arith.addf %229, %250 : vector<3x256xf32>
    %c48 = arith.constant 48 : index
    %c0_119 = arith.constant 0 : index
    %252 = vector.load %arg12[%c48, %c0_119] : memref<54x256xf32, #tpu.memory_space<vmem>>, vector<3x256xf32>
    %c240_i32_120 = arith.constant 240 : i32
    %253 = tpu.dynamic_rotate %252 by %c240_i32_120 dim 1 : vector<3x256xf32>, i32 -> vector<3x256xf32>
    %c16_i32_121 = arith.constant 16 : i32
    %254 = tpu.dynamic_rotate %252 by %c16_i32_121 dim 1 : vector<3x256xf32>, i32 -> vector<3x256xf32>
    %255 = arith.subf %254, %253 : vector<3x256xf32>
    %256 = vector.broadcast %5 : vector<1x256xf32> to vector<3x256xf32>
    %257 = arith.mulf %256, %255 : vector<3x256xf32>
    %258 = arith.addf %253, %257 : vector<3x256xf32>
    %259 = arith.addf %243, %258 : vector<3x256xf32>
    %c24_122 = arith.constant 24 : index
    %c0_123 = arith.constant 0 : index
    %260 = vector.load %arg12[%c24_122, %c0_123] : memref<54x256xf32, #tpu.memory_space<vmem>>, vector<3x256xf32>
    %c255_i32_124 = arith.constant 255 : i32
    %261 = tpu.dynamic_rotate %260 by %c255_i32_124 dim 1 : vector<3x256xf32>, i32 -> vector<3x256xf32>
    %c1_i32_125 = arith.constant 1 : i32
    %262 = tpu.dynamic_rotate %260 by %c1_i32_125 dim 1 : vector<3x256xf32>, i32 -> vector<3x256xf32>
    %263 = arith.subf %262, %261 : vector<3x256xf32>
    %264 = vector.broadcast %3 : vector<1x256xf32> to vector<3x256xf32>
    %265 = arith.mulf %264, %263 : vector<3x256xf32>
    %266 = arith.addf %261, %265 : vector<3x256xf32>
    %c240_i32_126 = arith.constant 240 : i32
    %267 = tpu.dynamic_rotate %266 by %c240_i32_126 dim 1 : vector<3x256xf32>, i32 -> vector<3x256xf32>
    %c16_i32_127 = arith.constant 16 : i32
    %268 = tpu.dynamic_rotate %266 by %c16_i32_127 dim 1 : vector<3x256xf32>, i32 -> vector<3x256xf32>
    %269 = arith.subf %268, %267 : vector<3x256xf32>
    %270 = vector.broadcast %5 : vector<1x256xf32> to vector<3x256xf32>
    %271 = arith.mulf %270, %269 : vector<3x256xf32>
    %272 = arith.addf %267, %271 : vector<3x256xf32>
    %273 = arith.addf %251, %272 : vector<3x256xf32>
    %c51 = arith.constant 51 : index
    %c0_128 = arith.constant 0 : index
    %274 = vector.load %arg12[%c51, %c0_128] : memref<54x256xf32, #tpu.memory_space<vmem>>, vector<3x256xf32>
    %c255_i32_129 = arith.constant 255 : i32
    %275 = tpu.dynamic_rotate %274 by %c255_i32_129 dim 1 : vector<3x256xf32>, i32 -> vector<3x256xf32>
    %c1_i32_130 = arith.constant 1 : i32
    %276 = tpu.dynamic_rotate %274 by %c1_i32_130 dim 1 : vector<3x256xf32>, i32 -> vector<3x256xf32>
    %277 = arith.subf %276, %275 : vector<3x256xf32>
    %278 = vector.broadcast %3 : vector<1x256xf32> to vector<3x256xf32>
    %279 = arith.mulf %278, %277 : vector<3x256xf32>
    %280 = arith.addf %275, %279 : vector<3x256xf32>
    %c240_i32_131 = arith.constant 240 : i32
    %281 = tpu.dynamic_rotate %280 by %c240_i32_131 dim 1 : vector<3x256xf32>, i32 -> vector<3x256xf32>
    %c16_i32_132 = arith.constant 16 : i32
    %282 = tpu.dynamic_rotate %280 by %c16_i32_132 dim 1 : vector<3x256xf32>, i32 -> vector<3x256xf32>
    %283 = arith.subf %282, %281 : vector<3x256xf32>
    %284 = vector.broadcast %5 : vector<1x256xf32> to vector<3x256xf32>
    %285 = arith.mulf %284, %283 : vector<3x256xf32>
    %286 = arith.addf %281, %285 : vector<3x256xf32>
    %287 = arith.addf %259, %286 : vector<3x256xf32>
    %c0_133 = arith.constant 0 : index
    %c0_134 = arith.constant 0 : index
    %288 = vector.load %arg8[%c0_133, %c0_134] : memref<6x1xf32, #tpu.memory_space<vmem>>, vector<3x1xf32>
    %289 = vector.broadcast %288 : vector<3x1xf32> to vector<3x256xf32>
    %290 = arith.addf %273, %289 : vector<3x256xf32>
    %c3_135 = arith.constant 3 : index
    %c0_136 = arith.constant 0 : index
    %291 = vector.load %arg8[%c3_135, %c0_136] : memref<6x1xf32, #tpu.memory_space<vmem>>, vector<3x1xf32>
    %292 = vector.broadcast %291 : vector<3x1xf32> to vector<3x256xf32>
    %293 = arith.addf %287, %292 : vector<3x256xf32>
    %c0_137 = arith.constant 0 : index
    %c0_138 = arith.constant 0 : index
    %c0_139 = arith.constant 0 : index
    %294 = vector.load %arg9[%c0_137, %c0_138, %c0_139] : memref<1x3x256xf32, #tpu.memory_space<vmem>>, vector<1x3x256xf32>
    %295 = vector.shape_cast %294 : vector<1x3x256xf32> to vector<3x256xf32>
    %296 = vector.shape_cast %293 : vector<3x256xf32> to vector<1x3x256xf32>
    tpu.vector_store %arg9[%c0_137, %c0_138, %c0_139], %296 {strides = array<i32>} : memref<1x3x256xf32, #tpu.memory_space<vmem>>, vector<1x3x256xf32>,
    %c1_i32_140 = arith.constant 1 : i32
    %297 = tpu.dynamic_rotate %293 by %c1_i32_140 dim 1 : vector<3x256xf32>, i32 -> vector<3x256xf32>
    %c255_i32_141 = arith.constant 255 : i32
    %298 = tpu.dynamic_rotate %293 by %c255_i32_141 dim 1 : vector<3x256xf32>, i32 -> vector<3x256xf32>
    %299 = arith.subf %298, %297 : vector<3x256xf32>
    %300 = vector.broadcast %2 : vector<1x256xf32> to vector<3x256xf32>
    %301 = arith.mulf %300, %299 : vector<3x256xf32>
    %302 = arith.addf %297, %301 : vector<3x256xf32>
    %c16_i32_142 = arith.constant 16 : i32
    %303 = tpu.dynamic_rotate %302 by %c16_i32_142 dim 1 : vector<3x256xf32>, i32 -> vector<3x256xf32>
    %c240_i32_143 = arith.constant 240 : i32
    %304 = tpu.dynamic_rotate %302 by %c240_i32_143 dim 1 : vector<3x256xf32>, i32 -> vector<3x256xf32>
    %305 = arith.subf %304, %303 : vector<3x256xf32>
    %306 = vector.broadcast %4 : vector<1x256xf32> to vector<3x256xf32>
    %307 = arith.mulf %306, %305 : vector<3x256xf32>
    %308 = arith.addf %303, %307 : vector<3x256xf32>
    %c0_144 = arith.constant 0 : index
    %c0_145 = arith.constant 0 : index
    %309 = vector.load %arg11[%c0_144, %c0_145] : memref<27x256xf32, #tpu.memory_space<vmem>>, vector<3x256xf32>
    tpu.vector_store %arg11[%c0_144, %c0_145], %308 {strides = array<i32>} : memref<27x256xf32, #tpu.memory_space<vmem>>, vector<3x256xf32>,
    %c16_i32_146 = arith.constant 16 : i32
    %310 = tpu.dynamic_rotate %293 by %c16_i32_146 dim 1 : vector<3x256xf32>, i32 -> vector<3x256xf32>
    %c240_i32_147 = arith.constant 240 : i32
    %311 = tpu.dynamic_rotate %293 by %c240_i32_147 dim 1 : vector<3x256xf32>, i32 -> vector<3x256xf32>
    %312 = arith.subf %311, %310 : vector<3x256xf32>
    %313 = vector.broadcast %4 : vector<1x256xf32> to vector<3x256xf32>
    %314 = arith.mulf %313, %312 : vector<3x256xf32>
    %315 = arith.addf %310, %314 : vector<3x256xf32>
    %c3_148 = arith.constant 3 : index
    %c0_149 = arith.constant 0 : index
    %316 = vector.load %arg11[%c3_148, %c0_149] : memref<27x256xf32, #tpu.memory_space<vmem>>, vector<3x256xf32>
    tpu.vector_store %arg11[%c3_148, %c0_149], %315 {strides = array<i32>} : memref<27x256xf32, #tpu.memory_space<vmem>>, vector<3x256xf32>,
    %c255_i32_150 = arith.constant 255 : i32
    %317 = tpu.dynamic_rotate %293 by %c255_i32_150 dim 1 : vector<3x256xf32>, i32 -> vector<3x256xf32>
    %c1_i32_151 = arith.constant 1 : i32
    %318 = tpu.dynamic_rotate %293 by %c1_i32_151 dim 1 : vector<3x256xf32>, i32 -> vector<3x256xf32>
    %319 = arith.subf %318, %317 : vector<3x256xf32>
    %320 = vector.broadcast %3 : vector<1x256xf32> to vector<3x256xf32>
    %321 = arith.mulf %320, %319 : vector<3x256xf32>
    %322 = arith.addf %317, %321 : vector<3x256xf32>
    %c16_i32_152 = arith.constant 16 : i32
    %323 = tpu.dynamic_rotate %322 by %c16_i32_152 dim 1 : vector<3x256xf32>, i32 -> vector<3x256xf32>
    %c240_i32_153 = arith.constant 240 : i32
    %324 = tpu.dynamic_rotate %322 by %c240_i32_153 dim 1 : vector<3x256xf32>, i32 -> vector<3x256xf32>
    %325 = arith.subf %324, %323 : vector<3x256xf32>
    %326 = vector.broadcast %4 : vector<1x256xf32> to vector<3x256xf32>
    %327 = arith.mulf %326, %325 : vector<3x256xf32>
    %328 = arith.addf %323, %327 : vector<3x256xf32>
    %c6_154 = arith.constant 6 : index
    %c0_155 = arith.constant 0 : index
    %329 = vector.load %arg11[%c6_154, %c0_155] : memref<27x256xf32, #tpu.memory_space<vmem>>, vector<3x256xf32>
    tpu.vector_store %arg11[%c6_154, %c0_155], %328 {strides = array<i32>} : memref<27x256xf32, #tpu.memory_space<vmem>>, vector<3x256xf32>,
    %c1_i32_156 = arith.constant 1 : i32
    %330 = tpu.dynamic_rotate %293 by %c1_i32_156 dim 1 : vector<3x256xf32>, i32 -> vector<3x256xf32>
    %c255_i32_157 = arith.constant 255 : i32
    %331 = tpu.dynamic_rotate %293 by %c255_i32_157 dim 1 : vector<3x256xf32>, i32 -> vector<3x256xf32>
    %332 = arith.subf %331, %330 : vector<3x256xf32>
    %333 = vector.broadcast %2 : vector<1x256xf32> to vector<3x256xf32>
    %334 = arith.mulf %333, %332 : vector<3x256xf32>
    %335 = arith.addf %330, %334 : vector<3x256xf32>
    %c9_158 = arith.constant 9 : index
    %c0_159 = arith.constant 0 : index
    %336 = vector.load %arg11[%c9_158, %c0_159] : memref<27x256xf32, #tpu.memory_space<vmem>>, vector<3x256xf32>
    tpu.vector_store %arg11[%c9_158, %c0_159], %335 {strides = array<i32>} : memref<27x256xf32, #tpu.memory_space<vmem>>, vector<3x256xf32>,
    %c12_160 = arith.constant 12 : index
    %c0_161 = arith.constant 0 : index
    %337 = vector.load %arg11[%c12_160, %c0_161] : memref<27x256xf32, #tpu.memory_space<vmem>>, vector<3x256xf32>
    tpu.vector_store %arg11[%c12_160, %c0_161], %293 {strides = array<i32>} : memref<27x256xf32, #tpu.memory_space<vmem>>, vector<3x256xf32>,
    %c255_i32_162 = arith.constant 255 : i32
    %338 = tpu.dynamic_rotate %293 by %c255_i32_162 dim 1 : vector<3x256xf32>, i32 -> vector<3x256xf32>
    %c1_i32_163 = arith.constant 1 : i32
    %339 = tpu.dynamic_rotate %293 by %c1_i32_163 dim 1 : vector<3x256xf32>, i32 -> vector<3x256xf32>
    %340 = arith.subf %339, %338 : vector<3x256xf32>
    %341 = vector.broadcast %3 : vector<1x256xf32> to vector<3x256xf32>
    %342 = arith.mulf %341, %340 : vector<3x256xf32>
    %343 = arith.addf %338, %342 : vector<3x256xf32>
    %c15_164 = arith.constant 15 : index
    %c0_165 = arith.constant 0 : index
    %344 = vector.load %arg11[%c15_164, %c0_165] : memref<27x256xf32, #tpu.memory_space<vmem>>, vector<3x256xf32>
    tpu.vector_store %arg11[%c15_164, %c0_165], %343 {strides = array<i32>} : memref<27x256xf32, #tpu.memory_space<vmem>>, vector<3x256xf32>,
    %c1_i32_166 = arith.constant 1 : i32
    %345 = tpu.dynamic_rotate %293 by %c1_i32_166 dim 1 : vector<3x256xf32>, i32 -> vector<3x256xf32>
    %c255_i32_167 = arith.constant 255 : i32
    %346 = tpu.dynamic_rotate %293 by %c255_i32_167 dim 1 : vector<3x256xf32>, i32 -> vector<3x256xf32>
    %347 = arith.subf %346, %345 : vector<3x256xf32>
    %348 = vector.broadcast %2 : vector<1x256xf32> to vector<3x256xf32>
    %349 = arith.mulf %348, %347 : vector<3x256xf32>
    %350 = arith.addf %345, %349 : vector<3x256xf32>
    %c240_i32_168 = arith.constant 240 : i32
    %351 = tpu.dynamic_rotate %350 by %c240_i32_168 dim 1 : vector<3x256xf32>, i32 -> vector<3x256xf32>
    %c16_i32_169 = arith.constant 16 : i32
    %352 = tpu.dynamic_rotate %350 by %c16_i32_169 dim 1 : vector<3x256xf32>, i32 -> vector<3x256xf32>
    %353 = arith.subf %352, %351 : vector<3x256xf32>
    %354 = vector.broadcast %5 : vector<1x256xf32> to vector<3x256xf32>
    %355 = arith.mulf %354, %353 : vector<3x256xf32>
    %356 = arith.addf %351, %355 : vector<3x256xf32>
    %c18_170 = arith.constant 18 : index
    %c0_171 = arith.constant 0 : index
    %357 = vector.load %arg11[%c18_170, %c0_171] : memref<27x256xf32, #tpu.memory_space<vmem>>, vector<3x256xf32>
    tpu.vector_store %arg11[%c18_170, %c0_171], %356 {strides = array<i32>} : memref<27x256xf32, #tpu.memory_space<vmem>>, vector<3x256xf32>,
    %c240_i32_172 = arith.constant 240 : i32
    %358 = tpu.dynamic_rotate %293 by %c240_i32_172 dim 1 : vector<3x256xf32>, i32 -> vector<3x256xf32>
    %c16_i32_173 = arith.constant 16 : i32
    %359 = tpu.dynamic_rotate %293 by %c16_i32_173 dim 1 : vector<3x256xf32>, i32 -> vector<3x256xf32>
    %360 = arith.subf %359, %358 : vector<3x256xf32>
    %361 = vector.broadcast %5 : vector<1x256xf32> to vector<3x256xf32>
    %362 = arith.mulf %361, %360 : vector<3x256xf32>
    %363 = arith.addf %358, %362 : vector<3x256xf32>
    %c21_174 = arith.constant 21 : index
    %c0_175 = arith.constant 0 : index
    %364 = vector.load %arg11[%c21_174, %c0_175] : memref<27x256xf32, #tpu.memory_space<vmem>>, vector<3x256xf32>
    tpu.vector_store %arg11[%c21_174, %c0_175], %363 {strides = array<i32>} : memref<27x256xf32, #tpu.memory_space<vmem>>, vector<3x256xf32>,
    %c255_i32_176 = arith.constant 255 : i32
    %365 = tpu.dynamic_rotate %293 by %c255_i32_176 dim 1 : vector<3x256xf32>, i32 -> vector<3x256xf32>
    %c1_i32_177 = arith.constant 1 : i32
    %366 = tpu.dynamic_rotate %293 by %c1_i32_177 dim 1 : vector<3x256xf32>, i32 -> vector<3x256xf32>
    %367 = arith.subf %366, %365 : vector<3x256xf32>
    %368 = vector.broadcast %3 : vector<1x256xf32> to vector<3x256xf32>
    %369 = arith.mulf %368, %367 : vector<3x256xf32>
    %370 = arith.addf %365, %369 : vector<3x256xf32>
    %c240_i32_178 = arith.constant 240 : i32
    %371 = tpu.dynamic_rotate %370 by %c240_i32_178 dim 1 : vector<3x256xf32>, i32 -> vector<3x256xf32>
    %c16_i32_179 = arith.constant 16 : i32
    %372 = tpu.dynamic_rotate %370 by %c16_i32_179 dim 1 : vector<3x256xf32>, i32 -> vector<3x256xf32>
    %373 = arith.subf %372, %371 : vector<3x256xf32>
    %374 = vector.broadcast %5 : vector<1x256xf32> to vector<3x256xf32>
    %375 = arith.mulf %374, %373 : vector<3x256xf32>
    %376 = arith.addf %371, %375 : vector<3x256xf32>
    %c24_180 = arith.constant 24 : index
    %c0_181 = arith.constant 0 : index
    %377 = vector.load %arg11[%c24_180, %c0_181] : memref<27x256xf32, #tpu.memory_space<vmem>>, vector<3x256xf32>
    tpu.vector_store %arg11[%c24_180, %c0_181], %376 {strides = array<i32>} : memref<27x256xf32, #tpu.memory_space<vmem>>, vector<3x256xf32>,
    %c0_182 = arith.constant 0 : index
    %c0_183 = arith.constant 0 : index
    %378 = vector.load %arg3[%c0_182, %c0_183] : memref<80x27xf32, #tpu.memory_space<vmem>>, vector<80x27xf32>
    %c0_184 = arith.constant 0 : index
    %c0_185 = arith.constant 0 : index
    %379 = vector.load %arg11[%c0_184, %c0_185] : memref<27x256xf32, #tpu.memory_space<vmem>>, vector<27x256xf32>
    %cst_186 = arith.constant dense<0.000000e+00> : vector<80x256xf32>
    %380 = tpu.matmul %378, %379, %cst_186 {dimension_numbers = #tpu.dot_dimension_numbers<[1], [0], [0], [1], [0, 0, 1, 1], [], []>} : vector<80x27xf32>, vector<27x256xf32>, vector<80x256xf32> -> vector<80x256xf32>
    %c0_187 = arith.constant 0 : index
    %c0_188 = arith.constant 0 : index
    %381 = vector.load %arg4[%c0_187, %c0_188] : memref<80x1xf32, #tpu.memory_space<vmem>>, vector<80x1xf32>
    %382 = vector.broadcast %381 : vector<80x1xf32> to vector<80x256xf32>
    %383 = arith.addf %380, %382 : vector<80x256xf32>
    %cst_189 = arith.constant 0.000000e+00 : f32
    %384 = vector.broadcast %cst_189 : f32 to vector<80x256xf32>
    %385 = arith.maximumf %383, %384 : vector<80x256xf32>
    %386 = vector.extract_strided_slice %385 {offsets = [0, 0], sizes = [64, 256], strides = [1, 1]} : vector<80x256xf32> to vector<64x256xf32>
    %387 = arith.subf %293, %1 : vector<3x256xf32>
    %388 = arith.subf %386, %95 : vector<64x256xf32>
    %389 = arith.subf %293, %290 : vector<3x256xf32>
    %390 = arith.mulf %387, %387 : vector<3x256xf32>
    %391 = vector.shape_cast %390 : vector<3x256xf32> to vector<1x3x256xf32>
    %cst_190 = arith.constant dense<0.000000e+00> : vector<1xf32>
    %392 = vector.multi_reduction <add>, %391, %cst_190 [1, 2] : vector<1x3x256xf32> to vector<1xf32>
    %393 = vector.shape_cast %392 : vector<1xf32> to vector<1x1x1xf32>
    %394 = vector.extract %393[0, 0, 0] : f32 from vector<1x1x1xf32>
    %395 = arith.mulf %388, %388 : vector<64x256xf32>
    %396 = vector.shape_cast %395 : vector<64x256xf32> to vector<1x64x256xf32>
    %cst_191 = arith.constant dense<0.000000e+00> : vector<1xf32>
    %397 = vector.multi_reduction <add>, %396, %cst_191 [1, 2] : vector<1x64x256xf32> to vector<1xf32>
    %398 = vector.shape_cast %397 : vector<1xf32> to vector<1x1x1xf32>
    %399 = vector.extract %398[0, 0, 0] : f32 from vector<1x1x1xf32>
    %400 = arith.mulf %389, %389 : vector<3x256xf32>
    %401 = vector.shape_cast %400 : vector<3x256xf32> to vector<1x3x256xf32>
    %cst_192 = arith.constant dense<0.000000e+00> : vector<1xf32>
    %402 = vector.multi_reduction <add>, %401, %cst_192 [1, 2] : vector<1x3x256xf32> to vector<1xf32>
    %403 = vector.shape_cast %402 : vector<1xf32> to vector<1x1x1xf32>
    %404 = vector.extract %403[0, 0, 0] : f32 from vector<1x1x1xf32>
    %405 = tpu.iota {dimensions = array<i32: 1>} : vector<1x128xi32>
    %c0_i32 = arith.constant 0 : i32
    %406 = vector.broadcast %c0_i32 : i32 to vector<1x128xi32>
    %407 = arith.cmpi eq, %405, %406 : vector<1x128xi32>
    %cst_193 = arith.constant 0.000000e+00 : f32
    %408 = vector.broadcast %394 : f32 to vector<1x128xf32>
    %409 = vector.broadcast %cst_193 : f32 to vector<1x128xf32>
    %410 = arith.select %407, %408, %409 : vector<1x128xi1>, vector<1x128xf32>
    %c1_i32_194 = arith.constant 1 : i32
    %411 = vector.broadcast %c1_i32_194 : i32 to vector<1x128xi32>
    %412 = arith.cmpi eq, %405, %411 : vector<1x128xi32>
    %cst_195 = arith.constant 0.000000e+00 : f32
    %413 = vector.broadcast %399 : f32 to vector<1x128xf32>
    %414 = vector.broadcast %cst_195 : f32 to vector<1x128xf32>
    %415 = arith.select %412, %413, %414 : vector<1x128xi1>, vector<1x128xf32>
    %416 = arith.addf %410, %415 : vector<1x128xf32>
    %c2_i32 = arith.constant 2 : i32
    %417 = vector.broadcast %c2_i32 : i32 to vector<1x128xi32>
    %418 = arith.cmpi eq, %405, %417 : vector<1x128xi32>
    %cst_196 = arith.constant 0.000000e+00 : f32
    %419 = vector.broadcast %404 : f32 to vector<1x128xf32>
    %420 = vector.broadcast %cst_196 : f32 to vector<1x128xf32>
    %421 = arith.select %418, %419, %420 : vector<1x128xi1>, vector<1x128xf32>
    %422 = arith.addf %416, %421 : vector<1x128xf32>
    %c0_197 = arith.constant 0 : index
    %c0_198 = arith.constant 0 : index
    %c0_199 = arith.constant 0 : index
    %423 = vector.load %arg10[%c0_197, %c0_198, %c0_199] : memref<1x1x128xf32, #tpu.memory_space<vmem>>, vector<1x1x128xf32>
    %424 = vector.shape_cast %423 : vector<1x1x128xf32> to vector<1x128xf32>
    %425 = vector.shape_cast %422 : vector<1x128xf32> to vector<1x1x128xf32>
    tpu.vector_store %arg10[%c0_197, %c0_198, %c0_199], %425 {strides = array<i32>} : memref<1x1x128xf32, #tpu.memory_space<vmem>>, vector<1x1x128xf32>,
    return
  }
  func.func @transform_0(%arg0: i32) -> (i32, i32, i32) {
    %c0_i32 = arith.constant 0 : i32
    %c0_i32_0 = arith.constant 0 : i32
    %c0_i32_1 = arith.constant 0 : i32
    return %arg0, %c0_i32, %c0_i32_0 : i32, i32, i32
  }
  func.func @transform_1(%arg0: i32) -> (i32, i32) {
    %c0_i32 = arith.constant 0 : i32
    %c0_i32_0 = arith.constant 0 : i32
    %c0_i32_1 = arith.constant 0 : i32
    return %c0_i32, %c0_i32_0 : i32, i32
  }
  func.func @transform_2(%arg0: i32) -> (i32, i32) {
    %c0_i32 = arith.constant 0 : i32
    %c0_i32_0 = arith.constant 0 : i32
    %c0_i32_1 = arith.constant 0 : i32
    return %c0_i32, %c0_i32_0 : i32, i32
  }
  func.func @transform_3(%arg0: i32) -> (i32, i32) {
    %c0_i32 = arith.constant 0 : i32
    %c0_i32_0 = arith.constant 0 : i32
    %c0_i32_1 = arith.constant 0 : i32
    return %c0_i32, %c0_i32_0 : i32, i32
  }
  func.func @transform_4(%arg0: i32) -> (i32, i32) {
    %c0_i32 = arith.constant 0 : i32
    %c0_i32_0 = arith.constant 0 : i32
    %c0_i32_1 = arith.constant 0 : i32
    return %c0_i32, %c0_i32_0 : i32, i32
  }
  func.func @transform_5(%arg0: i32) -> (i32, i32) {
    %c0_i32 = arith.constant 0 : i32
    %c0_i32_0 = arith.constant 0 : i32
    %c0_i32_1 = arith.constant 0 : i32
    return %c0_i32, %c0_i32_0 : i32, i32
  }
  func.func @transform_6(%arg0: i32) -> (i32, i32) {
    %c0_i32 = arith.constant 0 : i32
    %c0_i32_0 = arith.constant 0 : i32
    %c0_i32_1 = arith.constant 0 : i32
    return %c0_i32, %c0_i32_0 : i32, i32
  }
  func.func @transform_7(%arg0: i32) -> (i32, i32) {
    %c0_i32 = arith.constant 0 : i32
    %c0_i32_0 = arith.constant 0 : i32
    %c0_i32_1 = arith.constant 0 : i32
    return %c0_i32, %c0_i32_0 : i32, i32
  }
  func.func @transform_8(%arg0: i32) -> (i32, i32, i32) {
    %c0_i32 = arith.constant 0 : i32
    %c0_i32_0 = arith.constant 0 : i32
    %c0_i32_1 = arith.constant 0 : i32
    return %arg0, %c0_i32, %c0_i32_0 : i32, i32, i32
  }
  func.func @transform_9(%arg0: i32) -> (i32, i32, i32) {
    %c0_i32 = arith.constant 0 : i32
    %c0_i32_0 = arith.constant 0 : i32
    %c0_i32_1 = arith.constant 0 : i32
    return %arg0, %c0_i32, %c0_i32_0 : i32, i32, i32
  }
}

</mosaic_0001>

<bundles_post_ra>
// kernel: forward.1
= control target key start
LH: loop header
LB: loop body
LE: loop exit
PB: predicated region body
PF: predicated region fallthrough
CT: control target
= control target key end

     0   :  { %s2662_s30 = smov 0   ;;  %s3733_s0 = inlined_call_operand.vmem [shape: f32[2,3,256], index: 0, kind: input, shape index: {}]   ;;  %s3734_s1 = inlined_call_operand.vmem [shape: f32[4,256], index: 1, kind: input, shape index: {}]   ;;  %s3735_s2 = inlined_call_operand.vmem [shape: f32[80,27], index: 2, kind: input, shape index: {}]   ;;  %s3736_s3 = inlined_call_operand.vmem [shape: f32[80,1], index: 3, kind: input, shape index: {}]   ;;  %s3737_s4 = inlined_call_operand.vmem [shape: f32[80,80], index: 4, kind: input, shape index: {}]   ;;  %s3738_s5 = inlined_call_operand.vmem [shape: f32[80,1], index: 5, kind: input, shape index: {}]   ;;  %s3739_s6 = inlined_call_operand.vmem [shape: f32[54,80], index: 6, kind: input, shape index: {}]   ;;  %s3740_s7 = inlined_call_operand.vmem [shape: f32[6,1], index: 7, kind: input, shape index: {}]   ;;  %s3741_s8 = inlined_call_operand.vmem [shape: f32[2,3,256], index: 8, kind: output, shape index: {0}]   ;;  %s3742_s9 = inlined_call_operand.vmem [shape: f32[2,1,128], index: 9, kind: output, shape index: {1}]  }
   0x1 LB: > { %s2451_s10 = sadd.s32 4294967295, %s2603_s30   ;;  %p2455_p0 = scmp.ge.s32.totalorder %s2603_s30, 1  ;;  %s2603_s30 = sphi %s2662_s30, %s20_s30  }
   0x2   : > { %p290_p1 = scmp.lt.s32.totalorder %s2603_s30, 3 }
   0x4   : > { %p291_p2 = pnand %p2455_p0, %p290_p1 }
   0x6   : > { %294 = sbr.rel (%p291_p2) target bundleno = 2081 (0x821), region = 52 }
   0xd   : > { %p329_p3 = scmp.lt.s32.totalorder %s2451_s10, 1  ;;  %s2605_s15 = smov 127   ;;  %v357_v3 = vlaneseq  ;;  %v2460_v10 = vld [vmem:[%s3734_s1 + $0x1] ss:$4 sm:$0x3]  ;;  %vm668_vm4 = vcmask 1042432  }
   0xe   : > { %s2606_s16 = smov 1   ;;  %s2607_s17 = smov 16   ;;  %v343_v11 = vld [vmem:[%s3734_s1] ss:$4 sm:$0x3]  ;;  %vm2611_vm5 = vmmov 1  }
   0xf   : > { %s3805_s10 = smov (!%p329_p3, %s2451_s10), 1  ;;  %s2608_s18 = smov 112   ;;  %v373_v4 = vshrl.u32 %v357_v3, 7  ;;  %v2703_v5 = vand.u32 127, %v357_v3  ;;  %vm2856_vm6 = vmpackc.low %vm668_vm4, %vm2611_vm5  ;;  %vm637_vm7 = vcmask 220160   ;;  %vm890_vm8 = vcmask 654336  }
  0x10   : > { %s2506_s11 = sshll.u32 %s3805_s10, 3  ;;  %v2461_v26 = vld [vmem:[%s3734_s1 + $0x2] ss:$4 sm:$0x3]  ;;  %vm1337_vm9 = vcmask 1041408   ;;  %vm1540_vm10 = vcmask 1040384   ;;  %s341_s22 = scalar_lea.vmem %s3742_s9, %s3805_s10 }
  0x11   : > { %s333_s14 = scalar_lea.vmem %s3733_s0, %s2506_s11  ;;  %v374_v8 = vsub.s32 0, %v373_v4  ;;  %v378_v9 = vsub.s32 1, %v373_v4  ;;  %vm366_vm0 = vcmp.lt.s32.totalorder %v2703_v5, 127  ;;  %vm359_vm1 = vcmp.lt.s32.totalorder %v2703_v5, 1  ;;  %s338_s27 = scalar_lea.vmem %s3741_s8, %s2506_s11 }
  0x12   : > { %v2678_v0 = vld [vmem:[%s333_s14] sm:$0x77]  ;;  %vm390_vm2 = vcmp.lt.s32.totalorder %v2703_v5, 16  ;;  %v2462_v27 = vld [vmem:[%s3734_s1 + $0x3] ss:$4 sm:$0x3] }
  0x13   : > { %362 = vrot.lane.b32.xlu1 %v2678_v0, %s2605_s15  ;;  %v498_v1 = vcombine.low %v2678_v0, %v2678_v0  ;;  %501 = vst [vmem:[#allocation2 + $0x18] sm:$0x70] %v2678_v0  ;;  %353 = vrot.lane.b32.xlu0 %v2678_v0, %s2606_s16  ;;  %v2689_v2 = vcombine.high %v2678_v0, %v2678_v0  ;;  %vm397_vm3 = vcmp.lt.s32.totalorder %v2703_v5, 112  ;;  %vm2362_vm11 = vcmp.eq.s32.totalorder %v2703_v5, 1 }
  0x14   : > { %v2713_v14 = vrot.slane %v2460_v10, %v374_v8  ;;  %v2715_v15 = vrot.slane %v2460_v10, %v378_v9  ;;  %v2717_v16 = vrot.slane %v343_v11, %v374_v8  ;;  %v2719_v17 = vrot.slane %v343_v11, %v378_v9  ;;  %v580_v11 = vld [vmem:[%s3736_s3 + $0x18] sm:$0xff] }
  0x15   : > { %500 = vst [vmem:[#allocation2 + $0x10] sm:$0x70] %v498_v1  ;;  %v2741_v34 = vrot.slane %v2461_v26, %v374_v8  ;;  %v2743_v39 = vrot.slane %v2462_v27, %v374_v8  ;;  %v2745_v40 = vrot.slane %v2461_v26, %v378_v9  ;;  %v2753_v49 = vrot.slane %v2462_v27, %v378_v9  ;;  %v577_v8 = vld [vmem:[%s3736_s3] sm:$0xff]  ;;  %v578_v9 = vld [vmem:[%s3736_s3 + $0x8] sm:$0xff]  ;;  %v832_v26 = vld [vmem:[%s3738_s5 + $0x10] sm:$0xff] }
  0x16   : > { %v2610_v10 = vmov 0   ;;  %v835_v27 = vld [vmem:[%s3738_s5 + $0x28] sm:$0xff]  ;;  %vm2359_vm12 = vcmp.eq.s32.totalorder %v2703_v5, 0  ;;  %vm2366_vm13 = vcmp.eq.s32.totalorder %v2703_v5, 2 }
  0x17   : > { %364 = vrot.lane.b32.xlu1 %v2689_v2, %s2605_s15  ;;  %355 = vrot.lane.b32.xlu0 %v2689_v2, %s2606_s16 }
  0x18   : > { %2594 = vset.pattern.permute.xlu1 %v2610_v10  ;;  %2593 = vset.pattern.permute.xlu0 %v2610_v10 }
  0x1b   : > { %421 = vrot.lane.b32.xlu1 %v2689_v2, %s2607_s17  ;;  %419 = vrot.lane.b32.xlu0 %v2678_v0, %s2607_s17 }
  0x1f   : > { %427 = vrot.lane.b32.xlu1 %v2689_v2, %s2608_s18  ;;  %425 = vrot.lane.b32.xlu0 %v2678_v0, %s2608_s18 }
  0x85   : > { %v363_v6 = vpop.permute.xlu1 %362  ;;  %v354_v7 = vpop.permute.xlu0 %353 }
  0x89   : > { %v365_v12 = vpop.permute.xlu1 %364  ;;  %v356_v13 = vpop.permute.xlu0 %355 }
  0x8a   : > { %v367_v18 = vsel %vm366_vm0, %v363_v6, %v365_v12  ;;  %v368_v19 = vsel %vm366_vm0, %v365_v12, %v363_v6  ;;  %v360_v20 = vsel %vm359_vm1, %v354_v7, %v356_v13  ;;  %v361_v21 = vsel %vm359_vm1, %v356_v13, %v354_v7  ;;  %v579_v12 = vld [vmem:[%s3736_s3 + $0x10] sm:$0xff]  ;;  %v582_v13 = vld [vmem:[%s3736_s3 + $0x28] sm:$0xff] }
  0x8b   : > { %v369_v22 = vsub.f32 %v367_v18, %v361_v21  ;;  %v370_v23 = vsub.f32 %v368_v19, %v360_v20  ;;  %v445_v24 = vsub.f32 %v361_v21, %v367_v18  ;;  %v446_v25 = vsub.f32 %v360_v20, %v368_v19 }
  0x8c   : > { %v3759_v7 = vmov 0.0  }
  0x8d   : > { %v458_v28 = vmul.f32 %v2713_v14, %v445_v24  ;;  %v459_v29 = vmul.f32 %v2715_v15, %v446_v25  ;;  %v382_v30 = vmul.f32 %v2717_v16, %v369_v22  ;;  %v383_v31 = vmul.f32 %v2719_v17, %v370_v23  ;;  %v422_v32 = vpop.permute.xlu1 %421  ;;  %v420_v33 = vpop.permute.xlu0 %419  ;;  %739 = vmatprep.mubr.f32.mxu0 %v3759_v7  ;;  %v585_v22 = vld [vmem:[%s3736_s3 + $0x40] sm:$0xff]  ;;  %v831_v23 = vld [vmem:[%s3738_s5 + $0x8] sm:$0xff]  ;;  %v833_v25 = vld [vmem:[%s3738_s5 + $0x18] sm:$0xff] }
  0x8e   : > { %v423_v41 = vsel %vm390_vm2, %v420_v33, %v422_v32  ;;  %v424_v42 = vsel %vm390_vm2, %v422_v32, %v420_v33  ;;  %985 = vmatprep.mubr.f32.mxu1 %v3759_v7  ;;  %v830_v24 = vld [vmem:[%s3738_s5] sm:$0xff] }
  0x8f   : > { %v460_v35 = vadd.f32 %v458_v28, %v367_v18  ;;  %v461_v36 = vadd.f32 %v459_v29, %v368_v19  ;;  %v384_v37 = vadd.f32 %v382_v30, %v361_v21  ;;  %v385_v38 = vadd.f32 %v383_v31, %v360_v20  ;;  %v581_v18 = vld [vmem:[%s3736_s3 + $0x20] sm:$0xff]  ;;  %v584_v19 = vld [vmem:[%s3736_s3 + $0x38] sm:$0xff]  ;;  %v583_v20 = vld [vmem:[%s3736_s3 + $0x30] sm:$0xff] }
  0x90   : > { %v586_v21 = vld [vmem:[%s3736_s3 + $0x48] sm:$0xff]  ;;  %v834_v28 = vld [vmem:[%s3738_s5 + $0x20] sm:$0xff]  ;;  %v837_v29 = vld [vmem:[%s3738_s5 + $0x38] sm:$0xff] }
  0x91   : > { %462 = vrot.lane.b32.xlu0 %v460_v35, %s2607_s17  ;;  %v504_v43 = vrot.slane %v460_v35, 1  ;;  %464 = vrot.lane.b32.xlu1 %v461_v36, %s2607_s17  ;;  %v505_v44 = vrot.slane %v461_v36, 1  ;;  %v492_v45 = vrot.slane %v384_v37, 7  ;;  %v493_v46 = vrot.slane %v385_v38, 7  ;;  %v428_v47 = vpop.permute.xlu1 %427  ;;  %v426_v48 = vpop.permute.xlu0 %425  ;;  %v836_v30 = vld [vmem:[%s3738_s5 + $0x30] sm:$0xff]  ;;  %v839_v31 = vld [vmem:[%s3738_s5 + $0x48] sm:$0xff] }
  0x92   : > { %v429_v50 = vsel %vm397_vm3, %v426_v48, %v428_v47  ;;  %v430_v51 = vsel %vm397_vm3, %v428_v47, %v426_v48  ;;  %v838_v32 = vld [vmem:[%s3738_s5 + $0x40] sm:$0xff] }
  0x93   : > { %508 = vst [vmem:[#allocation2 + $0x20] ss:$-12 sps:$4 sm:$0x83] %v504_v43   ;;  %509 = vst [vmem:[#allocation2 + $0x28] ss:$-12 sps:$4 sm:$0x83] %v505_v44   ;;  %v431_v52 = vsub.f32 %v429_v50, %v424_v42  ;;  %v432_v53 = vsub.f32 %v430_v51, %v423_v41  ;;  %v537_v54 = vsub.f32 %v424_v42, %v429_v50 }
  0x94   : > { %496 = vst [vmem:[#allocation2 + $0x10] sm:$0xe] %v492_v45  ;;  %497 = vst [vmem:[#allocation2 + $0x18] sm:$0xe] %v493_v46  ;;  %v538_v55 = vsub.f32 %v423_v41, %v430_v51 }
  0x95   : > { %468 = vrot.lane.b32.xlu0 %v460_v35, %s2608_s18  ;;  %470 = vrot.lane.b32.xlu1 %v461_v36, %s2608_s18  ;;  %v433_v56 = vmul.f32 %v431_v52, %v2741_v34  ;;  %v434_v57 = vmul.f32 %v432_v53, %v2745_v40  ;;  %v539_v58 = vmul.f32 %v537_v54, %v2743_v39 }
  0x96   : > { %v540_v59 = vmul.f32 %v538_v55, %v2753_v49 }
  0x97   : > { %v435_v60 = vadd.f32 %v433_v56, %v424_v42  ;;  %v436_v61 = vadd.f32 %v434_v57, %v423_v41  ;;  %v541_v62 = vadd.f32 %v539_v58, %v429_v50 }
  0x98   : > { %v542_v63 = vadd.f32 %v540_v59, %v430_v51 }
  0x99   : > { %386 = vrot.lane.b32.xlu0 %v384_v37, %s2607_s17  ;;  %388 = vrot.lane.b32.xlu1 %v385_v38, %s2607_s17  ;;  %v439_v1 = vrot.slane %v435_v60, 5  ;;  %v440_v3 = vrot.slane %v436_v61, 5  ;;  %v545_v4 = vrot.slane %v541_v62, 3 }
  0x9a   : > { %v546_v6 = vrot.slane %v542_v63, 3 }
  0x9b   : > { %443 = vst [vmem:[#allocation2] sm:$0x38] %v439_v1  ;;  %444 = vst [vmem:[#allocation2 + $0x8] sm:$0x38] %v440_v3 }
  0x9c   : > { %549 = vst [vmem:[#allocation2 + $0x20] sm:$0xe0] %v545_v4  ;;  %550 = vst [vmem:[#allocation2 + $0x28] sm:$0xe0] %v546_v6 }
  0x9d   : > { %393 = vrot.lane.b32.xlu0 %v384_v37, %s2608_s18  ;;  %395 = vrot.lane.b32.xlu1 %v385_v38, %s2608_s18 }
  0xa1   : > { %589 = vperm.xlu0 %2593, %v577_v8   ;;  %594 = vperm.xlu1 %2594, %v578_v9  }
  0xa5   : > { %604 = vperm.xlu0 %2593, %v580_v11   ;;  %599 = vperm.xlu1 %2594, %v579_v12  }
  0xa9   : > { %614 = vperm.xlu0 %2593, %v582_v13   ;;  %609 = vperm.xlu1 %2594, %v581_v18  }
  0xad   : > { %624 = vperm.xlu0 %2593, %v584_v19   ;;  %619 = vperm.xlu1 %2594, %v583_v20  }
  0xb1   : > { %634 = vperm.xlu0 %2593, %v586_v21   ;;  %629 = vperm.xlu1 %2594, %v585_v22  }
  0xb5   : > { %847 = vperm.xlu0 %2593, %v831_v23   ;;  %842 = vperm.xlu1 %2594, %v830_v24  }
  0xb9   : > { %857 = vperm.xlu0 %2593, %v833_v25   ;;  %852 = vperm.xlu1 %2594, %v832_v26  }
  0xbd   : > { %867 = vperm.xlu0 %2593, %v835_v27   ;;  %862 = vperm.xlu1 %2594, %v834_v28  }
  0xc1   : > { %877 = vperm.xlu0 %2593, %v837_v29   ;;  %872 = vperm.xlu1 %2594, %v836_v30  }
  0xc5   : > { %887 = vperm.xlu0 %2593, %v839_v31   ;;  %882 = vperm.xlu1 %2594, %v838_v32  }
 0x103   : > { %v465_v33 = vpop.permute.xlu1 %464  ;;  %v463_v35 = vpop.permute.xlu0 %462 }
 0x104   : > { %v466_v38 = vsel %vm390_vm2, %v463_v35, %v465_v33  ;;  %v467_v41 = vsel %vm390_vm2, %v465_v33, %v463_v35  ;;  %v3779_v33 = vmov 0.0  }
 0x107   : > { %v471_v36 = vpop.permute.xlu1 %470  ;;  %v469_v37 = vpop.permute.xlu0 %468 }
 0x108   : > { %v472_v42 = vsel %vm397_vm3, %v469_v37, %v471_v36  ;;  %v473_v43 = vsel %vm397_vm3, %v471_v36, %v469_v37 }
 0x109   : > { %v474_v44 = vsub.f32 %v472_v42, %v467_v41  ;;  %v475_v45 = vsub.f32 %v473_v43, %v466_v38  ;;  %v551_v46 = vsub.f32 %v467_v41, %v472_v42  ;;  %v552_v47 = vsub.f32 %v466_v38, %v473_v43 }
 0x10b   : > { %v476_v48 = vmul.f32 %v474_v44, %v2741_v34  ;;  %v477_v50 = vmul.f32 %v475_v45, %v2745_v40  ;;  %v553_v51 = vmul.f32 %v551_v46, %v2743_v39  ;;  %v554_v52 = vmul.f32 %v552_v47, %v2753_v49  ;;  %v389_v53 = vpop.permute.xlu1 %388  ;;  %v387_v54 = vpop.permute.xlu0 %386  ;;  %v562_v44 = vld [vmem:[%s3735_s2 + $0x18] sm:$0xff]  ;;  %v563_v45 = vld [vmem:[%s3735_s2 + $0x20] sm:$0xff]  ;;  %v564_v46 = vld [vmem:[%s3735_s2 + $0x28] sm:$0xff] }
 0x10c   : > { %v391_v63 = vsel %vm390_vm2, %v387_v54, %v389_v53  ;;  %v392_v1 = vsel %vm390_vm2, %v389_v53, %v387_v54  ;;  %v565_v47 = vld [vmem:[%s3735_s2 + $0x30] sm:$0xff] }
 0x10d   : > { %v478_v55 = vadd.f32 %v476_v48, %v467_v41  ;;  %v479_v56 = vadd.f32 %v477_v50, %v466_v38  ;;  %v555_v57 = vadd.f32 %v553_v51, %v472_v42  ;;  %v556_v58 = vadd.f32 %v554_v52, %v473_v43  ;;  %v559_v41 = vld [vmem:[%s3735_s2] sm:$0xff]  ;;  %v560_v42 = vld [vmem:[%s3735_s2 + $0x8] sm:$0xff]  ;;  %v561_v43 = vld [vmem:[%s3735_s2 + $0x10] sm:$0xff] }
 0x10e   : > { %v566_v48 = vld [vmem:[%s3735_s2 + $0x38] sm:$0xff]  ;;  %v567_v50 = vld [vmem:[%s3735_s2 + $0x40] sm:$0xff]  ;;  %v568_v51 = vld [vmem:[%s3735_s2 + $0x48] sm:$0xff] }
 0x10f   : > { %v482_v59 = vrot.slane %v478_v55, 2  ;;  %v483_v60 = vrot.slane %v479_v56, 2  ;;  %557 = vst [vmem:[#allocation2 + $0x30] sm:$0x7] %v555_v57  ;;  %558 = vst [vmem:[#allocation2 + $0x38] sm:$0x7] %v556_v58  ;;  %v396_v61 = vpop.permute.xlu1 %395  ;;  %v394_v62 = vpop.permute.xlu0 %393 }
 0x110   : > { %v398_v3 = vsel %vm397_vm3, %v394_v62, %v396_v61  ;;  %v399_v4 = vsel %vm397_vm3, %v396_v61, %v394_v62 }
 0x111   : > { %486 = vst [vmem:[#allocation2 + $0x10] ss:$-12 sps:$4 sm:$0xc1] %v482_v59   ;;  %487 = vst [vmem:[#allocation2 + $0x18] ss:$-12 sps:$4 sm:$0xc1] %v483_v60   ;;  %v400_v6 = vsub.f32 %v398_v3, %v392_v1  ;;  %v401_v8 = vsub.f32 %v399_v4, %v391_v63  ;;  %v512_v9 = vsub.f32 %v392_v1, %v398_v3 }
 0x112   : > { %v513_v10 = vsub.f32 %v391_v63, %v399_v4 }
 0x113   : > { %v413_v11 = vmul.f32 %v2741_v34, %v400_v6  ;;  %v414_v12 = vmul.f32 %v2745_v40, %v401_v8  ;;  %v525_v13 = vmul.f32 %v2743_v39, %v512_v9 }
 0x114   : > { %v526_v18 = vmul.f32 %v2753_v49, %v513_v10 }
 0x115   : > { %v415_v19 = vadd.f32 %v413_v11, %v392_v1  ;;  %v416_v20 = vadd.f32 %v414_v12, %v391_v63  ;;  %v527_v21 = vadd.f32 %v525_v13, %v398_v3 }
 0x116   : > { %v528_v22 = vadd.f32 %v526_v18, %v399_v4  ;;  %v576_v32 = vld [vmem:[#allocation2 + $0x38] sm:$0x7]  ;;  %v575_v37 = vld [vmem:[#allocation2 + $0x30] sm:$0x7] }
 0x117   : > { %417 = vst [vmem:[#allocation2] sm:$0x7] %v415_v19  ;;  %418 = vst [vmem:[#allocation2 + $0x8] sm:$0x7] %v416_v20  ;;  %v531_v23 = vrot.slane %v527_v21, 6 }
 0x118   : > { %v532_v24 = vrot.slane %v528_v22, 6  ;;  %v572_v25 = vld [vmem:[#allocation2 + $0x18] sm:$0xff]  ;;  %v571_v28 = vld [vmem:[#allocation2 + $0x10] sm:$0xff] }
 0x119   : > { %535 = vst [vmem:[#allocation2 + $0x20] sm:$0x1c] %v531_v23 }
 0x11a   : > { %536 = vst [vmem:[#allocation2 + $0x28] sm:$0x1c] %v532_v24 }
 0x11e   : > { %v570_v26 = vld [vmem:[#allocation2 + $0x8] sm:$0xff]  ;;  %v569_v27 = vld [vmem:[#allocation2] sm:$0xff] }
 0x11f   : > { %v2508_v29 = vpack.c.bf16 %v572_v25, %v570_v26  ;;  %v2510_v30 = vpack.c.bf16 %v571_v28, %v569_v27 }
 0x120   : > { %v573_v36 = vld [vmem:[#allocation2 + $0x20] sm:$0xff]  ;;  %v590_v54 = vpop.permute.xlu0 %589  ;;  %v595_v55 = vpop.permute.xlu1 %594 }
 0x121   : > { %v574_v31 = vld [vmem:[#allocation2 + $0x28] sm:$0xff]  ;;  %2509 = vmatprep.subr.bf16.mxu0 %v2508_v29  ;;  %v2515_v38 = vpack.c.bf16 %v575_v37, %v573_v36 }
 0x122   : > { %v2512_v35 = vpack.c.bf16 %v576_v32, %v574_v31  ;;  %2511 = vmatpush1.bf16.msra.mxu0 %v2510_v30 }
 0x124   : > { %2514 = vmatprep.subr.msk.bf16.mxu0 %vm2856_vm6, %v2512_v35  ;;  %v600_v9 = vpop.permute.xlu1 %599  ;;  %v605_v11 = vpop.permute.xlu0 %604 }
 0x126   : > { %2517 = vmatpush1.bf16.msk.msra.mxu0 %vm2856_vm6, %v2515_v38 }
 0x128   : > { %v610_v29 = vpop.permute.xlu1 %609  ;;  %v615_v31 = vpop.permute.xlu0 %614 }
 0x129   : > { %2465 = vmatmul.mubr.msk.f32.vlgmr.msra.gmra.mrb[0].mxu0 %vm637_vm7, %v559_v41 }
 0x12a   : > { %745 = vmatprep.mubr.f32.mxu0 %v3759_v7 }
 0x12d   : > { %2466 = vmatmul.mubr.msk.f32.gmra.mrb[2].mxu0 %vm637_vm7, %v560_v42 }
 0x12e   : > { %751 = vmatprep.mubr.f32.mxu0 %v3759_v7 }
 0x131   : > { %2467 = vmatmul.mubr.msk.f32.gmra.mrb[4].mxu0 %vm637_vm7, %v561_v43 }
 0x132   : > { %757 = vmatprep.mubr.f32.mxu0 %v3759_v7 }
 0x135   : > { %2468 = vmatmul.mubr.msk.f32.gmra.mrb[6].mxu0 %vm637_vm7, %v562_v44 }
 0x136   : > { %763 = vmatprep.mubr.f32.mxu0 %v3759_v7 }
 0x139   : > { %2469 = vmatmul.mubr.msk.f32.gmra.mrb[8].mxu0 %vm637_vm7, %v563_v45 }
 0x13a   : > { %769 = vmatprep.mubr.f32.mxu0 %v3759_v7 }
 0x13d   : > { %2470 = vmatmul.mubr.msk.f32.gmra.mrb[10].mxu0 %vm637_vm7, %v564_v46 }
 0x13e   : > { %775 = vmatprep.mubr.f32.mxu0 %v3759_v7 }
 0x141   : > { %2471 = vmatmul.mubr.msk.f32.gmra.mrb[12].mxu0 %vm637_vm7, %v565_v47 }
 0x142   : > { %781 = vmatprep.mubr.f32.mxu0 %v3759_v7 }
 0x145   : > { %2472 = vmatmul.mubr.msk.f32.gmra.mrb[14].mxu0 %vm637_vm7, %v566_v48 }
 0x146   : > { %787 = vmatprep.mubr.f32.mxu0 %v3759_v7 }
 0x149   : > { %2473 = vmatmul.mubr.msk.f32.gmra.mrb[16].mxu0 %vm637_vm7, %v567_v50  ;;  %v620_v50 = vpop.permute.xlu1 %619 }
 0x14a   : > { %793 = vmatprep.mubr.f32.mxu0 %v3759_v7 }
 0x14d   : > { %2474 = vmatmul.mubr.msk.f32.gmra.mrb[18].mxu0 %vm637_vm7, %v568_v51 }
 0x14e   : > { %1158 = vmatprep.mubr.f32.mxu0 %v3759_v7 }
 0x1fc   : > { %v741_v52 = vpop.f32.mrb[0].mxu0 }
 0x1fd   : > { %v743_v53 = vpop.f32.mrb[1].mxu0  ;;  %v2916_v58 = vadd.f32 %v741_v52, %v590_v54  ;;  %v625_v52 = vpop.permute.xlu0 %624 }
 0x1fe   : > { %v2914_v56 = vadd.f32 %v743_v53, %v590_v54 }
 0x1ff   : > { %v3758_v4 = vmax.f32 %v2916_v58, 0.0 }
 0x200   : > { %v747_v57 = vpop.f32.mrb[2].mxu0  ;;  %v3757_v63 = vmax.f32 %v2914_v56, 0.0 }
 0x201   : > { %v2918_v59 = vadd.f32 %v747_v57, %v595_v55  ;;  %v749_v60 = vpop.f32.mrb[3].mxu0 }
 0x202   : > { %v2920_v61 = vadd.f32 %v749_v60, %v595_v55 }
 0x203   : > { %v3756_v62 = vmax.f32 %v2918_v59, 0.0 }
 0x204   : > { %v3755_v1 = vmax.f32 %v2920_v61, 0.0  ;;  %v753_v3 = vpop.f32.mrb[4].mxu0 }
 0x205   : > { %v755_v6 = vpop.f32.mrb[5].mxu0  ;;  %v2520_v10 = vpack.c.bf16 %v3756_v62, %v3758_v4  ;;  %v2936_v18 = vadd.f32 %v753_v3, %v600_v9 }
 0x206   : > { %v2518_v8 = vpack.c.bf16 %v3755_v1, %v3757_v63  ;;  %v2934_v12 = vadd.f32 %v755_v6, %v600_v9 }
 0x207   : > { %v3754_v26 = vmax.f32 %v2936_v18, 0.0 }
 0x208   : > { %v759_v13 = vpop.f32.mrb[6].mxu0  ;;  %2519 = vmatprep.subr.bf16.mxu1 %v2518_v8  ;;  %v3753_v23 = vmax.f32 %v2934_v12, 0.0 }
 0x209   : > { %v2938_v19 = vadd.f32 %v759_v13, %v605_v11  ;;  %v761_v20 = vpop.f32.mrb[7].mxu0  ;;  %2521 = vmatpush1.bf16.msra.mxu1 %v2520_v10 }
 0x20a   : > { %v2940_v21 = vadd.f32 %v761_v20, %v605_v11  ;;  %v630_v20 = vpop.permute.xlu1 %629 }
 0x20b   : > { %v3752_v22 = vmax.f32 %v2938_v19, 0.0 }
 0x20c   : > { %v3751_v24 = vmax.f32 %v2940_v21, 0.0  ;;  %v765_v25 = vpop.f32.mrb[8].mxu0 }
 0x20d   : > { %v767_v27 = vpop.f32.mrb[9].mxu0  ;;  %v2524_v30 = vpack.c.bf16 %v3752_v22, %v3754_v26  ;;  %v2956_v36 = vadd.f32 %v765_v25, %v610_v29 }
 0x20e   : > { %v2522_v28 = vpack.c.bf16 %v3751_v24, %v3753_v23  ;;  %v2954_v32 = vadd.f32 %v767_v27, %v610_v29  ;;  %v635_v29 = vpop.permute.xlu0 %634 }
 0x20f   : > { %v3750_v46 = vmax.f32 %v2956_v36, 0.0 }
 0x210   : > { %v771_v35 = vpop.f32.mrb[10].mxu0  ;;  %2523 = vmatprep.subr.bf16.mxu1 %v2522_v28  ;;  %v3749_v43 = vmax.f32 %v2954_v32, 0.0 }
 0x211   : > { %v2958_v37 = vadd.f32 %v771_v35, %v615_v31  ;;  %v773_v38 = vpop.f32.mrb[11].mxu0  ;;  %2525 = vmatpush1.bf16.msra.mxu1 %v2524_v30 }
 0x212   : > { %v2960_v41 = vadd.f32 %v773_v38, %v615_v31 }
 0x213   : > { %3771 = vst [vmem:[#allocation4_spill] sm:$0xff] %v2958_v37  ;;  %v3748_v42 = vmax.f32 %v2958_v37, 0.0 }
 0x214   : > { %3772 = vst [vmem:[#allocation5_spill] sm:$0xff] %v2960_v41  ;;  %v3747_v44 = vmax.f32 %v2960_v41, 0.0  ;;  %v777_v45 = vpop.f32.mrb[12].mxu0 }
 0x215   : > { %v779_v47 = vpop.f32.mrb[13].mxu0  ;;  %v2528_v51 = vpack.c.bf16 %v3748_v42, %v3750_v46  ;;  %v2976_v55 = vadd.f32 %v777_v45, %v620_v50 }
 0x216   : > { %v2526_v48 = vpack.c.bf16 %v3747_v44, %v3749_v43  ;;  %v2974_v53 = vadd.f32 %v779_v47, %v620_v50 }
 0x217   : > { %3774 = vst [vmem:[#allocation7_spill] sm:$0xff] %v2976_v55  ;;  %v3746_v11 = vmax.f32 %v2976_v55, 0.0 }
 0x218   : > { %3773 = vst [vmem:[#allocation6_spill] sm:$0xff] %v2974_v53  ;;  %v783_v54 = vpop.f32.mrb[14].mxu0  ;;  %2527 = vmatprep.subr.bf16.mxu1 %v2526_v48  ;;  %v3745_v8 = vmax.f32 %v2974_v53, 0.0 }
 0x219   : > { %v2978_v57 = vadd.f32 %v783_v54, %v625_v52  ;;  %v785_v60 = vpop.f32.mrb[15].mxu0  ;;  %2529 = vmatpush1.bf16.msra.mxu1 %v2528_v51 }
 0x21a   : > { %v2980_v3 = vadd.f32 %v785_v60, %v625_v52  ;;  %v820_v60 = vld [vmem:[%s3737_s4] sm:$0xff] }
 0x21b   : > { %3775 = vst [vmem:[#allocation8_spill] sm:$0xff] %v2978_v57  ;;  %v3744_v6 = vmax.f32 %v2978_v57, 0.0 }
 0x21c   : > { %3776 = vst [vmem:[#allocation9_spill] sm:$0xff] %v2980_v3  ;;  %v3743_v9 = vmax.f32 %v2980_v3, 0.0  ;;  %v789_v10 = vpop.f32.mrb[16].mxu0 }
 0x21d   : > { %v791_v13 = vpop.f32.mrb[17].mxu0  ;;  %v2532_v27 = vpack.c.bf16 %v3744_v6, %v3746_v11  ;;  %v790_v28 = vadd.f32 %v789_v10, %v630_v20  ;;  %v821_v10 = vld [vmem:[%s3737_s4 + $0x8] sm:$0xff] }
 0x21e   : > { %v2530_v25 = vpack.c.bf16 %v3743_v9, %v3745_v8  ;;  %v792_v30 = vadd.f32 %v791_v13, %v630_v20  ;;  %v822_v13 = vld [vmem:[%s3737_s4 + $0x10] sm:$0xff]  ;;  %v823_v20 = vld [vmem:[%s3737_s4 + $0x18] sm:$0xff] }
 0x21f   : > { %v816_v47 = vmax.f32 %v790_v28, 0.0  ;;  %v826_v28 = vld [vmem:[%s3737_s4 + $0x30] sm:$0xff] }
 0x220   : > { %v795_v31 = vpop.f32.mrb[18].mxu0  ;;  %2531 = vmatprep.subr.bf16.mxu1 %v2530_v25  ;;  %v817_v50 = vmax.f32 %v792_v30, 0.0  ;;  %v824_v25 = vld [vmem:[%s3737_s4 + $0x20] sm:$0xff] }
 0x221   : > { %v796_v35 = vadd.f32 %v795_v31, %v635_v29  ;;  %v797_v38 = vpop.f32.mrb[19].mxu0  ;;  %2533 = vmatpush1.bf16.msra.mxu1 %v2532_v27  ;;  %v825_v27 = vld [vmem:[%s3737_s4 + $0x28] sm:$0xff]  ;;  %v828_v30 = vld [vmem:[%s3737_s4 + $0x40] sm:$0xff] }
 0x222   : > { %v798_v45 = vadd.f32 %v797_v38, %v635_v29  ;;  %v827_v29 = vld [vmem:[%s3737_s4 + $0x38] sm:$0xff]  ;;  %v829_v31 = vld [vmem:[%s3737_s4 + $0x48] sm:$0xff] }
 0x223   : > { %v818_v48 = vmax.f32 %v796_v35, 0.0 }
 0x224   : > { %v819_v51 = vmax.f32 %v798_v45, 0.0  ;;  %v843_v45 = vpop.permute.xlu1 %842 }
 0x225   : > { %v2536_v52 = vpack.c.bf16 %v818_v48, %v816_v47  ;;  %v848_v48 = vpop.permute.xlu0 %847 }
 0x226   : > { %v2534_v54 = vpack.c.bf16 %v819_v51, %v817_v50 }
 0x228   : > { %2535 = vmatprep.subr.bf16.mxu1 %v2534_v54 }
 0x229   : > { %2537 = vmatpush1.bf16.msra.mxu1 %v2536_v52  ;;  %v858_v6 = vpop.permute.xlu0 %857 }
 0x22c   : > { %2475 = vmatmul.mubr.msk.f32.vlgmr.msra.gmra.mrb[0].mxu1 %vm890_vm8, %v820_v60 }
 0x22d   : > { %991 = vmatprep.mubr.f32.mxu1 %v3759_v7 }
 0x230   : > { %2476 = vmatmul.mubr.msk.f32.gmra.mrb[2].mxu1 %vm890_vm8, %v821_v10 }
 0x231   : > { %997 = vmatprep.mubr.f32.mxu1 %v3759_v7 }
 0x234   : > { %2477 = vmatmul.mubr.msk.f32.gmra.mrb[4].mxu1 %vm890_vm8, %v822_v13 }
 0x235   : > { %1003 = vmatprep.mubr.f32.mxu1 %v3759_v7 }
 0x238   : > { %2478 = vmatmul.mubr.msk.f32.gmra.mrb[6].mxu1 %vm890_vm8, %v823_v20 }
 0x239   : > { %1009 = vmatprep.mubr.f32.mxu1 %v3759_v7 }
 0x23c   : > { %2479 = vmatmul.mubr.msk.f32.gmra.mrb[8].mxu1 %vm890_vm8, %v824_v25 }
 0x23d   : > { %1015 = vmatprep.mubr.f32.mxu1 %v3759_v7 }
 0x240   : > { %2480 = vmatmul.mubr.msk.f32.gmra.mrb[10].mxu1 %vm890_vm8, %v825_v27 }
 0x241   : > { %1021 = vmatprep.mubr.f32.mxu1 %v3759_v7 }
 0x244   : > { %2481 = vmatmul.mubr.msk.f32.gmra.mrb[12].mxu1 %vm890_vm8, %v826_v28 }
 0x245   : > { %1027 = vmatprep.mubr.f32.mxu1 %v3759_v7 }
 0x248   : > { %2482 = vmatmul.mubr.msk.f32.gmra.mrb[14].mxu1 %vm890_vm8, %v827_v29 }
 0x249   : > { %1033 = vmatprep.mubr.f32.mxu1 %v3759_v7 }
 0x24c   : > { %2483 = vmatmul.mubr.msk.f32.gmra.mrb[16].mxu1 %vm890_vm8, %v828_v30  ;;  %v853_v30 = vpop.permute.xlu1 %852 }
 0x24d   : > { %1039 = vmatprep.mubr.f32.mxu1 %v3759_v7 }
 0x250   : > { %2484 = vmatmul.mubr.msk.f32.gmra.mrb[18].mxu1 %vm890_vm8, %v829_v31 }
 0x251   : > { %2216 = vmatprep.mubr.f32.mxu1 %v3759_v7 }
 0x2ff   : > { %v987_v35 = vpop.f32.mrb[0].mxu1 }
 0x300   : > { %v989_v38 = vpop.f32.mrb[1].mxu1  ;;  %v988_v47 = vadd.f32 %v987_v35, %v843_v45 }
 0x301   : > { %v990_v50 = vadd.f32 %v989_v38, %v843_v45 }
 0x302   : > { %v1046_v10 = vmax.f32 %v988_v47, 0.0 }
 0x303   : > { %v993_v51 = vpop.f32.mrb[2].mxu1  ;;  %v1047_v20 = vmax.f32 %v990_v50, 0.0 }
 0x304   : > { %v994_v52 = vadd.f32 %v993_v51, %v848_v48  ;;  %v995_v54 = vpop.f32.mrb[3].mxu1 }
 0x305   : > { %v996_v60 = vadd.f32 %v995_v54, %v848_v48 }
 0x306   : > { %v1048_v13 = vmax.f32 %v994_v52, 0.0 }
 0x307   : > { %v1049_v25 = vmax.f32 %v996_v60, 0.0  ;;  %v999_v27 = vpop.f32.mrb[4].mxu1 }
 0x308   : > { %v2540_v28 = vpack.c.bf16 %v1048_v13, %v1046_v10  ;;  %v1001_v29 = vpop.f32.mrb[5].mxu1  ;;  %v1000_v9 = vadd.f32 %v999_v27, %v853_v30  ;;  %v863_v10 = vpop.permute.xlu1 %862 }
 0x309   : > { %v2538_v31 = vpack.c.bf16 %v1049_v25, %v1047_v20  ;;  %v1002_v8 = vadd.f32 %v1001_v29, %v853_v30  ;;  %v868_v20 = vpop.permute.xlu0 %867 }
 0x30a   : > { %v1050_v51 = vmax.f32 %v1000_v9, 0.0 }
 0x30b   : > { %v1005_v11 = vpop.f32.mrb[6].mxu1  ;;  %2539 = vmatprep.subr.bf16.mxu0 %v2538_v31  ;;  %v1051_v47 = vmax.f32 %v1002_v8, 0.0 }
 0x30c   : > { %v1006_v35 = vadd.f32 %v1005_v11, %v858_v6  ;;  %v1007_v38 = vpop.f32.mrb[7].mxu1  ;;  %2541 = vmatpush1.bf16.msra.mxu0 %v2540_v28 }
 0x30d   : > { %v1008_v45 = vadd.f32 %v1007_v38, %v858_v6 }
 0x30e   : > { %v1052_v48 = vmax.f32 %v1006_v35, 0.0 }
 0x30f   : > { %v1053_v52 = vmax.f32 %v1008_v45, 0.0  ;;  %v1011_v50 = vpop.f32.mrb[8].mxu1  ;;  %v873_v45 = vpop.permute.xlu1 %872 }
 0x310   : > { %v2544_v54 = vpack.c.bf16 %v1052_v48, %v1050_v51  ;;  %v1013_v60 = vpop.f32.mrb[9].mxu1  ;;  %v1012_v44 = vadd.f32 %v1011_v50, %v863_v10 }
 0x311   : > { %v2542_v13 = vpack.c.bf16 %v1053_v52, %v1051_v47  ;;  %v1014_v25 = vadd.f32 %v1013_v60, %v863_v10  ;;  %v878_v47 = vpop.permute.xlu0 %877 }
 0x312   : > { %v1054_v28 = vmax.f32 %v1012_v44, 0.0 }
 0x313   : > { %v1017_v27 = vpop.f32.mrb[10].mxu1  ;;  %2543 = vmatprep.subr.bf16.mxu0 %v2542_v13  ;;  %v1055_v9 = vmax.f32 %v1014_v25, 0.0 }
 0x314   : > { %v1018_v29 = vadd.f32 %v1017_v27, %v868_v20  ;;  %v1019_v30 = vpop.f32.mrb[11].mxu1  ;;  %2545 = vmatpush1.bf16.msra.mxu0 %v2544_v54 }
 0x315   : > { %v1020_v11 = vadd.f32 %v1019_v30, %v868_v20 }
 0x316   : > { %v1056_v6 = vmax.f32 %v1018_v29, 0.0 }
 0x317   : > { %v1057_v31 = vmax.f32 %v1020_v11, 0.0  ;;  %v1023_v8 = vpop.f32.mrb[12].mxu1  ;;  %v883_v11 = vpop.permute.xlu1 %882 }
 0x318   : > { %v2548_v35 = vpack.c.bf16 %v1056_v6, %v1054_v28  ;;  %v1025_v38 = vpop.f32.mrb[13].mxu1  ;;  %v1024_v48 = vadd.f32 %v1023_v8, %v873_v45 }
 0x319   : > { %v2546_v51 = vpack.c.bf16 %v1057_v31, %v1055_v9  ;;  %v1026_v52 = vadd.f32 %v1025_v38, %v873_v45  ;;  %v888_v9 = vpop.permute.xlu0 %887 }
 0x31a   : > { %v1058_v54 = vmax.f32 %v1024_v48, 0.0 }
 0x31b   : > { %v1029_v50 = vpop.f32.mrb[14].mxu1  ;;  %2547 = vmatprep.subr.bf16.mxu0 %v2546_v51  ;;  %v1059_v44 = vmax.f32 %v1026_v52, 0.0 }
 0x31c   : > { %v1030_v60 = vadd.f32 %v1029_v50, %v878_v47  ;;  %v1031_v10 = vpop.f32.mrb[15].mxu1  ;;  %2549 = vmatpush1.bf16.msra.mxu0 %v2548_v35 }
 0x31d   : > { %v1032_v13 = vadd.f32 %v1031_v10, %v878_v47  ;;  %v1066_v10 = vld [vmem:[%s3739_s6] sm:$0xff] }
 0x31e   : > { %v1060_v20 = vmax.f32 %v1030_v60, 0.0 }
 0x31f   : > { %v1061_v27 = vmax.f32 %v1032_v13, 0.0  ;;  %v1035_v25 = vpop.f32.mrb[16].mxu1  ;;  %v1067_v13 = vld [vmem:[%s3739_s6 + $0x8] sm:$0xff] }
 0x320   : > { %v2552_v29 = vpack.c.bf16 %v1060_v20, %v1058_v54  ;;  %v1037_v30 = vpop.f32.mrb[17].mxu1  ;;  %v1036_v6 = vadd.f32 %v1035_v25, %v883_v11  ;;  %v1068_v54 = vld [vmem:[%s3739_s6 + $0x10] sm:$0xff]  ;;  %v1069_v20 = vld [vmem:[%s3739_s6 + $0x18] sm:$0xff] }
 0x321   : > { %v2550_v28 = vpack.c.bf16 %v1061_v27, %v1059_v44  ;;  %v1038_v31 = vadd.f32 %v1037_v30, %v883_v11  ;;  %v1070_v44 = vld [vmem:[%s3739_s6 + $0x20] sm:$0xff]  ;;  %v1071_v27 = vld [vmem:[%s3739_s6 + $0x28] sm:$0xff]  ;;  %v1072_v25 = vld [vmem:[%s3739_s6 + $0x30] sm:$0x3f] }
 0x322   : > { %v1062_v35 = vmax.f32 %v1036_v6, 0.0 }
 0x323   : > { %v1041_v8 = vpop.f32.mrb[18].mxu1  ;;  %2551 = vmatprep.subr.bf16.mxu0 %v2550_v28  ;;  %v1063_v48 = vmax.f32 %v1038_v31, 0.0 }
 0x324   : > { %v1042_v38 = vadd.f32 %v1041_v8, %v888_v9  ;;  %v1043_v45 = vpop.f32.mrb[19].mxu1  ;;  %2553 = vmatpush1.bf16.msra.mxu0 %v2552_v29 }
 0x325   : > { %v1044_v51 = vadd.f32 %v1043_v45, %v888_v9 }
 0x326   : > { %v1064_v47 = vmax.f32 %v1042_v38, 0.0 }
 0x327   : > { %v1065_v50 = vmax.f32 %v1044_v51, 0.0 }
 0x328   : > { %v2556_v52 = vpack.c.bf16 %v1064_v47, %v1062_v35 }
 0x329   : > { %v2554_v60 = vpack.c.bf16 %v1065_v50, %v1063_v48 }
 0x32b   : > { %2555 = vmatprep.subr.bf16.mxu0 %v2554_v60 }
 0x32c   : > { %2557 = vmatpush1.bf16.msra.mxu0 %v2556_v52 }
 0x32f   : > { %2485 = vmatmul.mubr.msk.f32.vlgmr.msra.gmra.mrb[20].mxu0 %vm890_vm8, %v1066_v10 }
 0x330   : > { %1164 = vmatprep.mubr.f32.mxu0 %v3759_v7 }
 0x333   : > { %2486 = vmatmul.mubr.msk.f32.gmra.mrb[22].mxu0 %vm890_vm8, %v1067_v13 }
 0x334   : > { %1170 = vmatprep.mubr.f32.mxu0 %v3759_v7 }
 0x337   : > { %2487 = vmatmul.mubr.msk.f32.gmra.mrb[24].mxu0 %vm890_vm8, %v1068_v54 }
 0x338   : > { %1176 = vmatprep.mubr.f32.mxu0 %v3759_v7 }
 0x33b   : > { %2488 = vmatmul.mubr.msk.f32.gmra.mrb[26].mxu0 %vm890_vm8, %v1069_v20 }
 0x33c   : > { %1182 = vmatprep.mubr.f32.mxu0 %v3759_v7 }
 0x33f   : > { %2489 = vmatmul.mubr.msk.f32.gmra.mrb[28].mxu0 %vm890_vm8, %v1070_v44 }
 0x340   : > { %1188 = vmatprep.mubr.f32.mxu0 %v3759_v7 }
 0x343   : > { %2490 = vmatmul.mubr.msk.f32.gmra.mrb[30].mxu0 %vm890_vm8, %v1071_v27 }
 0x344   : > { %1194 = vmatprep.mubr.f32.mxu0 %v3759_v7 }
 0x347   : > { %2491 = vmatmul.mubr.msk.f32.gmra.mrb[32].mxu0 %vm890_vm8, %v1072_v25 }
 0x348   : > { %2198 = vmatprep.mubr.f32.mxu0 %v3759_v7 }
 0x402   : > { %v1160_v29 = vpop.f32.mrb[20].mxu0 }
 0x403   : > { %1201 = vst [vmem:[#allocation3] sm:$0xff] %v1160_v29  ;;  %v1162_v30 = vpop.f32.mrb[21].mxu0 }
 0x404   : > { %1202 = vst [vmem:[#allocation3 + $0x8] sm:$0xff] %v1162_v30 }
 0x406   : > { %v1166_v11 = vpop.f32.mrb[22].mxu0 }
 0x407   : > { %1203 = vst [vmem:[#allocation3 + $0x10] sm:$0xff] %v1166_v11  ;;  %v1168_v28 = vpop.f32.mrb[23].mxu0 }
 0x408   : > { %1204 = vst [vmem:[#allocation3 + $0x18] sm:$0xff] %v1168_v28 }
 0x40a   : > { %v1172_v6 = vpop.f32.mrb[24].mxu0 }
 0x40b   : > { %1205 = vst [vmem:[#allocation3 + $0x20] sm:$0xff] %v1172_v6  ;;  %v1174_v9 = vpop.f32.mrb[25].mxu0 }
 0x40c   : > { %1206 = vst [vmem:[#allocation3 + $0x28] sm:$0xff] %v1174_v9 }
 0x40e   : > { %v1178_v31 = vpop.f32.mrb[26].mxu0 }
 0x40f   : > { %1207 = vst [vmem:[#allocation3 + $0x30] sm:$0xff] %v1178_v31  ;;  %v1180_v8 = vpop.f32.mrb[27].mxu0 }
 0x410   : > { %1208 = vst [vmem:[#allocation3 + $0x38] sm:$0xff] %v1180_v8 }
 0x412   : > { %v1184_v38 = vpop.f32.mrb[28].mxu0 }
 0x413   : > { %1209 = vst [vmem:[#allocation3 + $0x40] sm:$0xff] %v1184_v38  ;;  %v1186_v45 = vpop.f32.mrb[29].mxu0 }
 0x414   : > { %1210 = vst [vmem:[#allocation3 + $0x48] sm:$0xff] %v1186_v45 }
 0x416   : > { %v1190_v51 = vpop.f32.mrb[30].mxu0  ;;  %v1255_v35 = vld [vmem:[#allocation3 + $0x30] sm:$0x38]  ;;  %v1329_v38 = vld [vmem:[#allocation3 + $0x30] sm:$0xc0] }
 0x417   : > { %1211 = vst [vmem:[#allocation3 + $0x50] sm:$0xff] %v1190_v51  ;;  %v1192_v47 = vpop.f32.mrb[31].mxu0  ;;  %v1259_v48 = vrot.slane %v1255_v35, 3  ;;  %v1256_v50 = vld [vmem:[#allocation3 + $0x38] sm:$0x38] }
 0x418   : > { %1212 = vst [vmem:[#allocation3 + $0x58] sm:$0xff] %v1192_v47  ;;  %v1260_v52 = vrot.slane %v1256_v50, 3  ;;  %v1330_v51 = vld [vmem:[#allocation3 + $0x38] sm:$0xc0]  ;;  %v1338_v47 = vrot.slane %v1329_v38, 6 }
 0x419   : > { %1263 = vrot.lane.b32.xlu1 %v1259_v48, %s2606_s16 }
 0x41a   : > { %1265 = vrot.lane.b32.xlu0 %v1260_v52, %s2606_s16  ;;  %v1420_v60 = vld [vmem:[#allocation3 + $0x40] sm:$0xe]  ;;  %v1196_v10 = vpop.f32.mrb[32].mxu0  ;;  %v1331_v31 = vld [vmem:[#allocation3 + $0x40] sm:$0x1] }
 0x41b   : > { %v1421_v13 = vld [vmem:[#allocation3 + $0x48] sm:$0xe]  ;;  %1213 = vst [vmem:[#allocation3 + $0x60] sm:$0x3f] %v1196_v10  ;;  %v1198_v54 = vpop.f32.mrb[33].mxu0  ;;  %v1424_v20 = vrot.slane %v1420_v60, 1 }
 0x41c   : > { %1214 = vst [vmem:[#allocation3 + $0x68] sm:$0x3f] %v1198_v54  ;;  %v1425_v44 = vrot.slane %v1421_v13, 1  ;;  %v1332_v8 = vld [vmem:[#allocation3 + $0x48] sm:$0x1]  ;;  %v1339_v45 = vrot.slane %v1331_v31, 6 }
 0x41d   : > { %1269 = vrot.lane.b32.xlu1 %v1259_v48, %s2605_s15  ;;  %v1342_v35 = vrot.slane %v1332_v8, 6  ;;  %v1341_v48 = vrot.slane %v1330_v51, 6  ;;  %v1494_v60 = vld [vmem:[#allocation3 + $0x40] sm:$0x70]  ;;  %v1495_v10 = vld [vmem:[#allocation3 + $0x48] sm:$0x70] }
 0x41e   : > { %1271 = vrot.lane.b32.xlu0 %v1260_v52, %s2605_s15  ;;  %v1661_v27 = vld [vmem:[#allocation3 + $0x50] sm:$0xe0]  ;;  %v1340_v50 = vsel %vm1337_vm9, %v1338_v47, %v1339_v45  ;;  %v1498_v13 = vrot.slane %v1494_v60, 4  ;;  %v1499_v54 = vrot.slane %v1495_v10, 4  ;;  %v1532_v41 = vld [vmem:[#allocation3 + $0x40] sm:$0x80] }
 0x41f   : > { %v1662_v25 = vld [vmem:[#allocation3 + $0x58] sm:$0xe0]  ;;  %v1665_v29 = vrot.slane %v1661_v27, 5  ;;  %v1343_v52 = vsel %vm1337_vm9, %v1341_v48, %v1342_v35  ;;  %v1534_v37 = vld [vmem:[#allocation3 + $0x50] sm:$0x3] }
 0x420   : > { %v1666_v30 = vrot.slane %v1662_v25, 5 }
 0x421   : > { %1428 = vrot.lane.b32.xlu1 %v1424_v20, %s2605_s15 }
 0x422   : > { %1430 = vrot.lane.b32.xlu0 %v1425_v44, %s2605_s15  ;;  %v1797_v11 = vld [vmem:[#allocation3 + $0x60] sm:$0x38] }
 0x423   : > { %v1798_v28 = vld [vmem:[#allocation3 + $0x68] sm:$0x38]  ;;  %v1801_v6 = vrot.slane %v1797_v11, 3 }
 0x424   : > { %v1802_v9 = vrot.slane %v1798_v28, 3 }
 0x425   : > { %1434 = vrot.lane.b32.xlu1 %v1424_v20, %s2606_s16  ;;  %v1587_v20 = vld [vmem:[#allocation3 + $0x50] sm:$0x1c] }
 0x426   : > { %1436 = vrot.lane.b32.xlu0 %v1425_v44, %s2606_s16  ;;  %v1588_v44 = vld [vmem:[#allocation3 + $0x58] sm:$0x1c]  ;;  %v1591_v27 = vrot.slane %v1587_v20, 2 }
 0x427   : > { %v1592_v25 = vrot.slane %v1588_v44, 2 }
 0x429   : > { %1669 = vrot.lane.b32.xlu1 %v1665_v29, %s2606_s16 }
 0x42a   : > { %1671 = vrot.lane.b32.xlu0 %v1666_v30, %s2606_s16 }
 0x42d   : > { %1675 = vrot.lane.b32.xlu1 %v1665_v29, %s2605_s15  ;;  %v1735_v29 = vld [vmem:[#allocation3 + $0x60] sm:$0x7] }
 0x42e   : > { %1677 = vrot.lane.b32.xlu0 %v1666_v30, %s2605_s15  ;;  %v1736_v30 = vld [vmem:[#allocation3 + $0x68] sm:$0x7] }
 0x431   : > { %1805 = vrot.lane.b32.xlu1 %v1801_v6, %s2605_s15 }
 0x432   : > { %1807 = vrot.lane.b32.xlu0 %v1802_v9, %s2605_s15 }
 0x435   : > { %1811 = vrot.lane.b32.xlu1 %v1801_v6, %s2606_s16 }
 0x436   : > { %1813 = vrot.lane.b32.xlu0 %v1802_v9, %s2606_s16 }
 0x439   : > { %1346 = vrot.lane.b32.xlu1 %v1340_v50, %s2607_s17 }
 0x43a   : > { %1348 = vrot.lane.b32.xlu0 %v1343_v52, %s2607_s17 }
 0x43d   : > { %1352 = vrot.lane.b32.xlu1 %v1340_v50, %s2608_s18 }
 0x43e   : > { %1354 = vrot.lane.b32.xlu0 %v1343_v52, %s2608_s18 }
 0x441   : > { %1502 = vrot.lane.b32.xlu1 %v1498_v13, %s2606_s16 }
 0x442   : > { %1504 = vrot.lane.b32.xlu0 %v1499_v54, %s2606_s16 }
 0x445   : > { %1508 = vrot.lane.b32.xlu1 %v1498_v13, %s2605_s15 }
 0x446   : > { %1510 = vrot.lane.b32.xlu0 %v1499_v54, %s2605_s15 }
 0x449   : > { %1595 = vrot.lane.b32.xlu1 %v1591_v27, %s2605_s15 }
 0x44a   : > { %1597 = vrot.lane.b32.xlu0 %v1592_v25, %s2605_s15 }
 0x44d   : > { %1601 = vrot.lane.b32.xlu1 %v1591_v27, %s2606_s16 }
 0x44e   : > { %1603 = vrot.lane.b32.xlu0 %v1592_v25, %s2606_s16 }
 0x451   : > { %1737 = vrot.lane.b32.xlu1 %v1735_v29, %s2608_s18 }
 0x452   : > { %1739 = vrot.lane.b32.xlu0 %v1736_v30, %s2608_s18 }
 0x455   : > { %1743 = vrot.lane.b32.xlu1 %v1735_v29, %s2607_s17 }
 0x456   : > { %1745 = vrot.lane.b32.xlu0 %v1736_v30, %s2607_s17 }
 0x48b   : > { %v1264_v11 = vpop.permute.xlu1 %1263 }
 0x48c   : > { %v1266_v28 = vpop.permute.xlu0 %1265 }
 0x48d   : > { %v1267_v31 = vsel %vm359_vm1, %v1264_v11, %v1266_v28  ;;  %v1268_v8 = vsel %vm359_vm1, %v1266_v28, %v1264_v11 }
 0x48f   : > { %v1270_v6 = vpop.permute.xlu1 %1269 }
 0x490   : > { %v1272_v9 = vpop.permute.xlu0 %1271 }
 0x491   : > { %v1273_v38 = vsel %vm366_vm0, %v1270_v6, %v1272_v9  ;;  %v1274_v45 = vsel %vm366_vm0, %v1272_v9, %v1270_v6 }
 0x492   : > { %v1275_v51 = vsub.f32 %v1273_v38, %v1268_v8  ;;  %v1276_v35 = vsub.f32 %v1274_v45, %v1267_v31 }
 0x493   : > { %v1429_v47 = vpop.permute.xlu1 %1428 }
 0x494   : > { %v1431_v48 = vpop.permute.xlu0 %1430  ;;  %v1277_v50 = vmul.f32 %v1275_v51, %v2717_v16  ;;  %v1278_v52 = vmul.f32 %v1276_v35, %v2719_v17 }
 0x495   : > { %v1432_v20 = vsel %vm366_vm0, %v1429_v47, %v1431_v48  ;;  %v1433_v44 = vsel %vm366_vm0, %v1431_v48, %v1429_v47 }
 0x496   : > { %v1279_v60 = vadd.f32 %v1277_v50, %v1268_v8  ;;  %v1280_v10 = vadd.f32 %v1278_v52, %v1267_v31 }
 0x497   : > { %v1435_v13 = vpop.permute.xlu1 %1434 }
 0x498   : > { %v1437_v54 = vpop.permute.xlu0 %1436  ;;  %1281 = vrot.lane.b32.xlu1 %v1279_v60, %s2607_s17  ;;  %1283 = vrot.lane.b32.xlu0 %v1280_v10, %s2607_s17 }
 0x499   : > { %v1438_v27 = vsel %vm359_vm1, %v1435_v13, %v1437_v54  ;;  %v1439_v25 = vsel %vm359_vm1, %v1437_v54, %v1435_v13 }
 0x49a   : > { %v1440_v29 = vsub.f32 %v1439_v25, %v1432_v20  ;;  %v1441_v30 = vsub.f32 %v1438_v27, %v1433_v44 }
 0x49b   : > { %v1670_v11 = vpop.permute.xlu1 %1669 }
 0x49c   : > { %v1672_v28 = vpop.permute.xlu0 %1671  ;;  %1287 = vrot.lane.b32.xlu1 %v1279_v60, %s2608_s18  ;;  %1289 = vrot.lane.b32.xlu0 %v1280_v10, %s2608_s18  ;;  %v1442_v6 = vmul.f32 %v1440_v29, %v2713_v14  ;;  %v1443_v9 = vmul.f32 %v1441_v30, %v2715_v15 }
 0x49d   : > { %v1673_v51 = vsel %vm359_vm1, %v1670_v11, %v1672_v28  ;;  %v1674_v35 = vsel %vm359_vm1, %v1672_v28, %v1670_v11 }
 0x49e   : > { %v1444_v31 = vadd.f32 %v1442_v6, %v1432_v20  ;;  %v1445_v8 = vadd.f32 %v1443_v9, %v1433_v44 }
 0x49f   : > { %v1676_v38 = vpop.permute.xlu1 %1675 }
 0x4a0   : > { %v1678_v45 = vpop.permute.xlu0 %1677  ;;  %1446 = vrot.lane.b32.xlu1 %v1444_v31, %s2607_s17  ;;  %1448 = vrot.lane.b32.xlu0 %v1445_v8, %s2607_s17 }
 0x4a1   : > { %v1679_v47 = vsel %vm366_vm0, %v1676_v38, %v1678_v45  ;;  %v1680_v48 = vsel %vm366_vm0, %v1678_v45, %v1676_v38 }
 0x4a2   : > { %v1681_v50 = vsub.f32 %v1679_v47, %v1674_v35  ;;  %v1682_v52 = vsub.f32 %v1680_v48, %v1673_v51 }
 0x4a3   : > { %v1806_v60 = vpop.permute.xlu1 %1805 }
 0x4a4   : > { %1452 = vrot.lane.b32.xlu1 %v1444_v31, %s2608_s18  ;;  %v1808_v10 = vpop.permute.xlu0 %1807  ;;  %1454 = vrot.lane.b32.xlu0 %v1445_v8, %s2608_s18  ;;  %v1683_v13 = vmul.f32 %v1681_v50, %v2717_v16  ;;  %v1684_v54 = vmul.f32 %v1682_v52, %v2719_v17 }
 0x4a5   : > { %v1809_v29 = vsel %vm366_vm0, %v1806_v60, %v1808_v10  ;;  %v1810_v30 = vsel %vm366_vm0, %v1808_v10, %v1806_v60 }
 0x4a6   : > { %v1685_v20 = vadd.f32 %v1683_v13, %v1674_v35  ;;  %v1686_v44 = vadd.f32 %v1684_v54, %v1673_v51  ;;  %v1851_v51 = vld [vmem:[%s3740_s7 + $0x3] sm:$0x7] }
 0x4a7   : > { %v1812_v27 = vpop.permute.xlu1 %1811 }
 0x4a8   : > { %1687 = vrot.lane.b32.xlu1 %v1685_v20, %s2608_s18  ;;  %v1814_v25 = vpop.permute.xlu0 %1813  ;;  %1689 = vrot.lane.b32.xlu0 %v1686_v44, %s2608_s18 }
 0x4a9   : > { %v1815_v11 = vsel %vm359_vm1, %v1812_v27, %v1814_v25  ;;  %v1816_v28 = vsel %vm359_vm1, %v1814_v25, %v1812_v27 }
 0x4aa   : > { %v1817_v6 = vsub.f32 %v1816_v28, %v1809_v29  ;;  %v1818_v9 = vsub.f32 %v1815_v11, %v1810_v30 }
 0x4ab   : > { %v1347_v35 = vpop.permute.xlu1 %1346 }
 0x4ac   : > { %1693 = vrot.lane.b32.xlu1 %v1685_v20, %s2607_s17  ;;  %1695 = vrot.lane.b32.xlu0 %v1686_v44, %s2607_s17  ;;  %v1819_v31 = vmul.f32 %v1817_v6, %v2713_v14  ;;  %v1820_v8 = vmul.f32 %v1818_v9, %v2715_v15  ;;  %v1349_v47 = vpop.permute.xlu0 %1348 }
 0x4ad   : > { %v1350_v42 = vsel %vm390_vm2, %v1347_v35, %v1349_v47  ;;  %v1351_v43 = vsel %vm390_vm2, %v1349_v47, %v1347_v35 }
 0x4ae   : > { %v1821_v38 = vadd.f32 %v1819_v31, %v1809_v29  ;;  %v1822_v45 = vadd.f32 %v1820_v8, %v1810_v30 }
 0x4af   : > { %v1353_v48 = vpop.permute.xlu1 %1352 }
 0x4b0   : > { %1823 = vrot.lane.b32.xlu1 %v1821_v38, %s2608_s18  ;;  %1825 = vrot.lane.b32.xlu0 %v1822_v45, %s2608_s18  ;;  %v1355_v50 = vpop.permute.xlu0 %1354 }
 0x4b1   : > { %v1356_v9 = vsel %vm397_vm3, %v1353_v48, %v1355_v50  ;;  %v1357_v31 = vsel %vm397_vm3, %v1355_v50, %v1353_v48 }
 0x4b2   : > { %v1358_v46 = vsub.f32 %v1356_v9, %v1351_v43  ;;  %v1359_v24 = vsub.f32 %v1357_v31, %v1350_v42 }
 0x4b3   : > { %v1503_v52 = vpop.permute.xlu1 %1502 }
 0x4b4   : > { %1829 = vrot.lane.b32.xlu1 %v1821_v38, %s2607_s17  ;;  %1831 = vrot.lane.b32.xlu0 %v1822_v45, %s2607_s17  ;;  %v1505_v60 = vpop.permute.xlu0 %1504 }
 0x4b7   : > { %v1509_v10 = vpop.permute.xlu1 %1508 }
 0x4b8   : > { %1854 = vperm.xlu1 %2594, %v1851_v51   ;;  %v1511_v13 = vpop.permute.xlu0 %1510 }
 0x4b9   : > { %v1512_v62 = vsel %vm366_vm0, %v1509_v10, %v1511_v13  ;;  %v1513_v35 = vsel %vm366_vm0, %v1511_v13, %v1509_v10  ;;  %v1506_v10 = vsel %vm359_vm1, %v1503_v52, %v1505_v60 }
 0x4ba   : > { %v1515_v63 = vsub.f32 %v1513_v35, %v1506_v10 }
 0x4bb   : > { %v3172_v54 = vpop.permute.xlu1 %1595 }
 0x4bc   : > { %v3174_v20 = vpop.permute.xlu0 %1597 }
 0x4bf   : > { %v1602_v44 = vpop.permute.xlu1 %1601 }
 0x4c0   : > { %v1604_v27 = vpop.permute.xlu0 %1603 }
 0x4c3   : > { %v3176_v25 = vpop.permute.xlu1 %1737 }
 0x4c4   : > { %v3178_v29 = vpop.permute.xlu0 %1739 }
 0x4c7   : > { %v3180_v30 = vpop.permute.xlu1 %1743 }
 0x4c8   : > { %v3182_v11 = vpop.permute.xlu0 %1745 }
 0x50a   : > { %v1282_v28 = vpop.permute.xlu1 %1281  ;;  %v1284_v6 = vpop.permute.xlu0 %1283 }
 0x50b   : > { %v1285_v22 = vsel %vm390_vm2, %v1282_v28, %v1284_v6  ;;  %v1286_v48 = vsel %vm390_vm2, %v1284_v6, %v1282_v28 }
 0x50e   : > { %v1288_v8 = vpop.permute.xlu1 %1287  ;;  %v1290_v38 = vpop.permute.xlu0 %1289 }
 0x50f   : > { %v1291_v45 = vsel %vm397_vm3, %v1288_v8, %v1290_v38  ;;  %v1292_v51 = vsel %vm397_vm3, %v1290_v38, %v1288_v8  ;;  %v1360_v8 = vmul.f32 %v1358_v46, %v2741_v34  ;;  %v1361_v38 = vmul.f32 %v1359_v24, %v2745_v40 }
 0x510   : > { %v1293_v50 = vsub.f32 %v1291_v45, %v1286_v48  ;;  %v1294_v23 = vsub.f32 %v1292_v51, %v1285_v22 }
 0x511   : > { %v1362_v53 = vadd.f32 %v1360_v8, %v1351_v43  ;;  %v1533_v43 = vld [vmem:[#allocation3 + $0x48] sm:$0x80]  ;;  %v1541_v8 = vrot.slane %v1532_v41, 7 }
 0x512   : > { %v1447_v26 = vpop.permute.xlu1 %1446  ;;  %v1449_v1 = vpop.permute.xlu0 %1448  ;;  %v1295_v47 = vmul.f32 %v1293_v50, %v2741_v34  ;;  %v1296_v9 = vmul.f32 %v1294_v23, %v2745_v40  ;;  %v1507_v23 = vsel %vm359_vm1, %v1505_v60, %v1503_v52  ;;  %v1517_v60 = vmul.f32 %v1515_v63, %v2719_v17 }
 0x513   : > { %v1450_v6 = vsel %vm390_vm2, %v1447_v26, %v1449_v1  ;;  %v1451_v46 = vsel %vm390_vm2, %v1449_v1, %v1447_v26  ;;  %v1514_v50 = vsub.f32 %v1512_v62, %v1507_v23  ;;  %v1605_v62 = vsel %vm359_vm1, %v1602_v44, %v1604_v27 }
 0x514   : > { %v1297_v4 = vadd.f32 %v1295_v47, %v1286_v48  ;;  %v1298_v7 = vadd.f32 %v1296_v9, %v1285_v22  ;;  %v1606_v22 = vsel %vm359_vm1, %v1604_v27, %v1602_v44  ;;  %v1600_v63 = vsel %vm366_vm0, %v3174_v20, %v3172_v54 }
 0x515   : > { %v1516_v52 = vmul.f32 %v1514_v50, %v2717_v16  ;;  %v1519_v27 = vadd.f32 %v1517_v60, %v1506_v10  ;;  %v1741_v10 = vsel %vm397_vm3, %v3176_v25, %v3178_v29 }
 0x516   : > { %v1453_v31 = vpop.permute.xlu1 %1452  ;;  %v1455_v28 = vpop.permute.xlu0 %1454  ;;  %v1364_v48 = vadd.f32 %v1362_v53, %v1297_v4 }
 0x517   : > { %v1456_v24 = vsel %vm397_vm3, %v1453_v31, %v1455_v28  ;;  %v1457_v45 = vsel %vm397_vm3, %v1455_v28, %v1453_v31  ;;  %v1363_v31 = vadd.f32 %v1361_v38, %v1350_v42  ;;  %v1535_v42 = vld [vmem:[#allocation3 + $0x58] sm:$0x3]  ;;  %v1542_v38 = vrot.slane %v1534_v37, 7 }
 0x518   : > { %v1458_v13 = vsub.f32 %v1456_v24, %v1451_v46  ;;  %v1459_v51 = vsub.f32 %v1457_v45, %v1450_v6  ;;  %v1518_v41 = vadd.f32 %v1516_v52, %v1507_v23  ;;  %v1742_v23 = vsel %vm397_vm3, %v3178_v29, %v3176_v25 }
 0x519   : > { %v1365_v35 = vadd.f32 %v1363_v31, %v1298_v7  ;;  %v1608_v7 = vsub.f32 %v1605_v62, %v1600_v63  ;;  %v1543_v52 = vsel %vm1540_vm10, %v1541_v8, %v1542_v38  ;;  %v1747_v62 = vsel %vm390_vm2, %v3180_v30, %v3182_v11 }
 0x51a   : > { %v1460_v1 = vmul.f32 %v1458_v13, %v2741_v34  ;;  %v1461_v26 = vmul.f32 %v1459_v51, %v2745_v40  ;;  %v1688_v3 = vpop.permute.xlu1 %1687  ;;  %v1690_v57 = vpop.permute.xlu0 %1689  ;;  %v1544_v13 = vrot.slane %v1533_v43, 7  ;;  %v1545_v51 = vrot.slane %v1535_v42, 7 }
 0x51b   : > { %v1691_v50 = vsel %vm397_vm3, %v1688_v3, %v1690_v57  ;;  %v1750_v38 = vsub.f32 %v1747_v62, %v1742_v23 }
 0x51c   : > { %v1462_v28 = vadd.f32 %v1460_v1, %v1451_v46  ;;  %v1463_v55 = vadd.f32 %v1461_v26, %v1450_v6  ;;  %v1599_v6 = vsel %vm366_vm0, %v3172_v54, %v3174_v20  ;;  %v1546_v60 = vsel %vm1540_vm10, %v1544_v13, %v1545_v51 }
 0x51d   : > { %v1607_v4 = vsub.f32 %v1606_v22, %v1599_v6  ;;  %v1748_v22 = vsel %vm390_vm2, %v3182_v11, %v3180_v30 }
 0x51e   : > { %v1694_v47 = vpop.permute.xlu1 %1693  ;;  %v1696_v9 = vpop.permute.xlu0 %1695  ;;  %v1464_v46 = vadd.f32 %v1462_v28, %v1364_v48  ;;  %v1465_v44 = vadd.f32 %v1463_v55, %v1365_v35  ;;  %v1692_v55 = vsel %vm397_vm3, %v1690_v57, %v1688_v3  ;;  %v1610_v28 = vmul.f32 %v1608_v7, %v2715_v15 }
 0x51f   : > { %v1697_v53 = vsel %vm390_vm2, %v1694_v47, %v1696_v9  ;;  %v1698_v37 = vsel %vm390_vm2, %v1696_v9, %v1694_v47  ;;  %v1609_v31 = vmul.f32 %v1607_v4, %v2713_v14  ;;  %v1749_v11 = vsub.f32 %v1748_v22, %v1741_v10 }
 0x520   : > { %v1520_v54 = vadd.f32 %v1518_v41, %v1464_v46  ;;  %v1521_v20 = vadd.f32 %v1519_v27, %v1465_v44  ;;  %v1699_v1 = vsub.f32 %v1698_v37, %v1691_v50  ;;  %v1700_v26 = vsub.f32 %v1697_v53, %v1692_v55 }
 0x521   : > { %v1611_v43 = vadd.f32 %v1609_v31, %v1599_v6  ;;  %v1612_v42 = vadd.f32 %v1610_v28, %v1600_v63  ;;  %v1751_v41 = vmul.f32 %v1749_v11, %v2743_v39  ;;  %v1752_v27 = vmul.f32 %v1750_v38, %v2753_v49 }
 0x522   : > { %v1824_v24 = vpop.permute.xlu1 %1823  ;;  %v1826_v45 = vpop.permute.xlu0 %1825  ;;  %v1701_v29 = vmul.f32 %v1699_v1, %v2743_v39  ;;  %v1702_v35 = vmul.f32 %v1700_v26, %v2753_v49  ;;  %v1549_v47 = vadd.f32 %v1543_v52, %v1520_v54  ;;  %v1550_v9 = vadd.f32 %v1546_v60, %v1521_v20 }
 0x523   : > { %v1827_v8 = vsel %vm397_vm3, %v1824_v24, %v1826_v45  ;;  %v1828_v30 = vsel %vm397_vm3, %v1826_v45, %v1824_v24  ;;  %v1753_v24 = vadd.f32 %v1751_v41, %v1741_v10  ;;  %v1754_v45 = vadd.f32 %v1752_v27, %v1742_v23 }
 0x524   : > { %v1703_v4 = vadd.f32 %v1701_v29, %v1691_v50  ;;  %v1704_v7 = vadd.f32 %v1702_v35, %v1692_v55  ;;  %v1613_v53 = vadd.f32 %v1611_v43, %v1549_v47  ;;  %v1614_v37 = vadd.f32 %v1612_v42, %v1550_v9 }
 0x526   : > { %v1830_v57 = vpop.permute.xlu1 %1829  ;;  %v1832_v3 = vpop.permute.xlu0 %1831  ;;  %v1705_v13 = vadd.f32 %v1703_v4, %v1613_v53  ;;  %v1706_v51 = vadd.f32 %v1704_v7, %v1614_v37 }
 0x527   : > { %v1833_v48 = vsel %vm390_vm2, %v1830_v57, %v1832_v3  ;;  %v1834_v25 = vsel %vm390_vm2, %v1832_v3, %v1830_v57 }
 0x528   : > { %v1835_v46 = vsub.f32 %v1834_v25, %v1827_v8  ;;  %v1836_v44 = vsub.f32 %v1833_v48, %v1828_v30  ;;  %v1755_v1 = vadd.f32 %v1753_v24, %v1705_v13  ;;  %v1756_v50 = vadd.f32 %v1754_v45, %v1706_v51 }
 0x52a   : > { %v1837_v6 = vmul.f32 %v1835_v46, %v2743_v39  ;;  %v1838_v63 = vmul.f32 %v1836_v44, %v2753_v49 }
 0x52c   : > { %v1839_v54 = vadd.f32 %v1837_v6, %v1827_v8  ;;  %v1840_v20 = vadd.f32 %v1838_v63, %v1828_v30 }
 0x52e   : > { %v1841_v55 = vadd.f32 %v1839_v54, %v1755_v1  ;;  %v1842_v26 = vadd.f32 %v1840_v20, %v1756_v50 }
 0x537   : > { %v1855_v31 = vpop.permute.xlu1 %1854 }
 0x538   : > { %v3278_v28 = vadd.f32 %v1855_v31, %v1841_v55  ;;  %v3280_v57 = vadd.f32 %v1855_v31, %v1842_v26 }
 0x53a   : > { %3777 = vst [vmem:[#allocation10_spill] sm:$0xff] %v3278_v28  ;;  %3778 = vst [vmem:[#allocation11_spill] sm:$0xff] %v3280_v57  ;;  %v1861_v10 = vcombine.low %v3278_v28, %v3280_v57  ;;  %v1970_v23 = vrot.slane %v3278_v28, 4  ;;  %v1971_v3 = vrot.slane %v3280_v57, 4  ;;  %1864 = vrot.lane.b32.xlu0 %v3278_v28, %s2606_s16  ;;  %1866 = vrot.lane.b32.xlu1 %v3280_v57, %s2606_s16 }
 0x53c   : > { %1863 = vst [vmem:[%s338_s27] sm:$0x77] %v1861_v10  ;;  %1974 = vst [vmem:[#allocation2 + $0x10] sm:$0x70] %v1970_v23 }
 0x53d   : > { %1975 = vst [vmem:[#allocation2 + $0x18] sm:$0x70] %v1971_v3 }
 0x53e   : > { %1870 = vrot.lane.b32.xlu0 %v3278_v28, %s2605_s15  ;;  %1872 = vrot.lane.b32.xlu1 %v3280_v57, %s2605_s15 }
 0x542   : > { %1902 = vrot.lane.b32.xlu0 %v3278_v28, %s2607_s17  ;;  %1904 = vrot.lane.b32.xlu1 %v3280_v57, %s2607_s17 }
 0x546   : > { %1908 = vrot.lane.b32.xlu0 %v3278_v28, %s2608_s18  ;;  %1910 = vrot.lane.b32.xlu1 %v3280_v57, %s2608_s18 }
 0x5ac   : > { %v1865_v52 = vpop.permute.xlu0 %1864  ;;  %v1867_v60 = vpop.permute.xlu1 %1866 }
 0x5ad   : > { %v1868_v48 = vsel %vm359_vm1, %v1865_v52, %v1867_v60  ;;  %v1869_v25 = vsel %vm359_vm1, %v1867_v60, %v1865_v52 }
 0x5b0   : > { %v1871_v62 = vpop.permute.xlu0 %1870  ;;  %v1873_v22 = vpop.permute.xlu1 %1872 }
 0x5b1   : > { %v1874_v29 = vsel %vm366_vm0, %v1871_v62, %v1873_v22  ;;  %v1875_v35 = vsel %vm366_vm0, %v1873_v22, %v1871_v62 }
 0x5b2   : > { %v1876_v47 = vsub.f32 %v1874_v29, %v1869_v25  ;;  %v1877_v9 = vsub.f32 %v1875_v35, %v1868_v48  ;;  %v1928_v43 = vsub.f32 %v1869_v25, %v1874_v29  ;;  %v1929_v42 = vsub.f32 %v1868_v48, %v1875_v35 }
 0x5b4   : > { %v1879_v8 = vmul.f32 %v1877_v9, %v2719_v17  ;;  %v1903_v30 = vpop.permute.xlu0 %1902  ;;  %v1905_v11 = vpop.permute.xlu1 %1904  ;;  %v1931_v38 = vmul.f32 %v1929_v42, %v2715_v15  ;;  %v1930_v46 = vmul.f32 %v1928_v43, %v2713_v14  ;;  %v1878_v44 = vmul.f32 %v1876_v47, %v2717_v16  ;;  %v1216_v47 = vld [vmem:[#allocation3 + $0x8] sm:$0x7]  ;;  %v1215_v9 = vld [vmem:[#allocation3] sm:$0x7]  ;;  %v1369_v43 = vld [vmem:[#allocation3 + $0x18] sm:$0x1] }
 0x5b5   : > { %v1906_v24 = vsel %vm390_vm2, %v1903_v30, %v1905_v11  ;;  %v1907_v45 = vsel %vm390_vm2, %v1905_v11, %v1903_v30  ;;  %v1368_v42 = vld [vmem:[#allocation3 + $0x10] sm:$0x1]  ;;  %v1378_v30 = vrot.slane %v1369_v43, 6  ;;  %v1366_v11 = vld [vmem:[#allocation3] sm:$0xc0] }
 0x5b6   : > { %v1933_v4 = vadd.f32 %v1931_v38, %v1875_v35  ;;  %v1932_v7 = vadd.f32 %v1930_v46, %v1874_v29  ;;  %v1881_v53 = vadd.f32 %v1879_v8, %v1868_v48  ;;  %v1880_v37 = vadd.f32 %v1878_v44, %v1869_v25  ;;  %v1367_v8 = vld [vmem:[#allocation3 + $0x8] sm:$0xc0] }
 0x5b7   : > { %v1375_v38 = vrot.slane %v1368_v42, 6  ;;  %v1377_v46 = vrot.slane %v1367_v8, 6  ;;  %v1374_v44 = vrot.slane %v1366_v11, 6 }
 0x5b8   : > { %v1909_v41 = vpop.permute.xlu0 %1908  ;;  %1936 = vrot.lane.b32.xlu1 %v1933_v4, %s2607_s17  ;;  %v1979_v27 = vrot.slane %v1933_v4, 1  ;;  %1934 = vrot.lane.b32.xlu0 %v1932_v7, %s2607_s17  ;;  %v1978_v6 = vrot.slane %v1932_v7, 1  ;;  %v1911_v63 = vpop.permute.xlu1 %1910  ;;  %v1965_v13 = vrot.slane %v1881_v53, 7  ;;  %v1964_v51 = vrot.slane %v1880_v37, 7 }
 0x5b9   : > { %v1912_v54 = vsel %vm397_vm3, %v1909_v41, %v1911_v63  ;;  %v1913_v20 = vsel %vm397_vm3, %v1911_v63, %v1909_v41  ;;  %v1757_v63 = vld [vmem:[#allocation3 + $0x30] sm:$0x7] }
 0x5ba   : > { %1983 = vst [vmem:[#allocation2 + $0x28] ss:$-12 sps:$4 sm:$0x83] %v1979_v27   ;;  %1982 = vst [vmem:[#allocation2 + $0x20] ss:$-12 sps:$4 sm:$0x83] %v1978_v6   ;;  %v1914_v1 = vsub.f32 %v1912_v54, %v1907_v45  ;;  %v1915_v50 = vsub.f32 %v1913_v20, %v1906_v24  ;;  %v2000_v55 = vsub.f32 %v1907_v45, %v1912_v54 }
 0x5bb   : > { %v2001_v26 = vsub.f32 %v1906_v24, %v1913_v20  ;;  %1969 = vst [vmem:[#allocation2 + $0x18] sm:$0xe] %v1965_v13  ;;  %1968 = vst [vmem:[#allocation2 + $0x10] sm:$0xe] %v1964_v51  ;;  %v1758_v6 = vld [vmem:[#allocation3 + $0x38] sm:$0x7] }
 0x5bc   : > { %v1916_v31 = vmul.f32 %v1914_v1, %v2741_v34  ;;  %v1917_v10 = vmul.f32 %v1915_v50, %v2745_v40  ;;  %v2002_v23 = vmul.f32 %v2000_v55, %v2743_v39  ;;  %1942 = vrot.lane.b32.xlu1 %v1933_v4, %s2608_s18  ;;  %1940 = vrot.lane.b32.xlu0 %v1932_v7, %s2608_s18  ;;  %v2041_v13 = vld [vmem:[%s3736_s3 + $0x8] sm:$0xff]  ;;  %v2040_v51 = vld [vmem:[%s3736_s3] sm:$0xff] }
 0x5bd   : > { %v2003_v3 = vmul.f32 %v2001_v26, %v2753_v49  ;;  %v1379_v4 = vsel %vm1337_vm9, %v1377_v46, %v1378_v30  ;;  %v1376_v7 = vsel %vm1337_vm9, %v1374_v44, %v1375_v38 }
 0x5be   : > { %v1918_v52 = vadd.f32 %v1916_v31, %v1907_v45  ;;  %v1919_v60 = vadd.f32 %v1917_v10, %v1906_v24  ;;  %v2004_v62 = vadd.f32 %v2002_v23, %v1912_v54  ;;  %v2043_v24 = vld [vmem:[%s3736_s3 + $0x18] sm:$0xff]  ;;  %v2042_v45 = vld [vmem:[%s3736_s3 + $0x10] sm:$0xff]  ;;  %v2044_v54 = vld [vmem:[%s3736_s3 + $0x20] sm:$0xff] }
 0x5bf   : > { %v2005_v22 = vadd.f32 %v2003_v3, %v1913_v20 }
 0x5c0   : > { %v1922_v48 = vrot.slane %v1918_v52, 5  ;;  %v1923_v25 = vrot.slane %v1919_v60, 5  ;;  %v2008_v29 = vrot.slane %v2004_v62, 3  ;;  %1884 = vrot.lane.b32.xlu1 %v1881_v53, %s2607_s17  ;;  %1882 = vrot.lane.b32.xlu0 %v1880_v37, %s2607_s17 }
 0x5c1   : > { %v2009_v35 = vrot.slane %v2005_v22, 3 }
 0x5c2   : > { %1926 = vst [vmem:[#allocation2] sm:$0x38] %v1922_v48  ;;  %1927 = vst [vmem:[#allocation2 + $0x8] sm:$0x38] %v1923_v25 }
 0x5c3   : > { %2012 = vst [vmem:[#allocation2 + $0x20] sm:$0xe0] %v2008_v29  ;;  %2013 = vst [vmem:[#allocation2 + $0x28] sm:$0xe0] %v2009_v35 }
 0x5c4   : > { %1890 = vrot.lane.b32.xlu1 %v1881_v53, %s2608_s18  ;;  %1888 = vrot.lane.b32.xlu0 %v1880_v37, %s2608_s18  ;;  %v1616_v53 = vld [vmem:[#allocation3 + $0x28] sm:$0x1c]  ;;  %v1615_v37 = vld [vmem:[#allocation3 + $0x20] sm:$0x1c] }
 0x5c5   : > { %v1620_v41 = vrot.slane %v1616_v53, 2  ;;  %v1619_v27 = vrot.slane %v1615_v37, 2 }
 0x5c8   : > { %1219 = vrot.lane.b32.xlu1 %v1216_v47, %s2606_s16  ;;  %1217 = vrot.lane.b32.xlu0 %v1215_v9, %s2606_s16 }
 0x5cc   : > { %1225 = vrot.lane.b32.xlu1 %v1216_v47, %s2605_s15  ;;  %1223 = vrot.lane.b32.xlu0 %v1215_v9, %s2605_s15 }
 0x5d0   : > { %1384 = vrot.lane.b32.xlu1 %v1379_v4, %s2605_s15  ;;  %1382 = vrot.lane.b32.xlu0 %v1376_v7, %s2605_s15 }
 0x5d4   : > { %1390 = vrot.lane.b32.xlu1 %v1379_v4, %s2606_s16  ;;  %1388 = vrot.lane.b32.xlu0 %v1376_v7, %s2606_s16 }
 0x5d8   : > { %1625 = vrot.lane.b32.xlu1 %v1620_v41, %s2606_s16  ;;  %1623 = vrot.lane.b32.xlu0 %v1619_v27, %s2606_s16 }
 0x5dc   : > { %1631 = vrot.lane.b32.xlu1 %v1620_v41, %s2605_s15  ;;  %1629 = vrot.lane.b32.xlu0 %v1619_v27, %s2605_s15 }
 0x5e0   : > { %1761 = vrot.lane.b32.xlu1 %v1758_v6, %s2605_s15  ;;  %1759 = vrot.lane.b32.xlu0 %v1757_v63, %s2605_s15 }
 0x5e4   : > { %1767 = vrot.lane.b32.xlu1 %v1758_v6, %s2606_s16  ;;  %1765 = vrot.lane.b32.xlu0 %v1757_v63, %s2606_s16 }
 0x5e8   : > { %2057 = vperm.xlu1 %2594, %v2041_v13   ;;  %2052 = vperm.xlu0 %2593, %v2040_v51  }
 0x5ec   : > { %2067 = vperm.xlu1 %2594, %v2043_v24   ;;  %2062 = vperm.xlu0 %2593, %v2042_v45  }
 0x5f0   : > { %2072 = vperm.xlu0 %2593, %v2044_v54  }
 0x62a   : > { %v1935_v20 = vpop.permute.xlu0 %1934  ;;  %v1937_v1 = vpop.permute.xlu1 %1936 }
 0x62b   : > { %v1938_v26 = vsel %vm390_vm2, %v1935_v20, %v1937_v1  ;;  %v1939_v31 = vsel %vm390_vm2, %v1937_v1, %v1935_v20 }
 0x62e   : > { %v1943_v50 = vpop.permute.xlu1 %1942  ;;  %v1941_v55 = vpop.permute.xlu0 %1940 }
 0x62f   : > { %v1944_v10 = vsel %vm397_vm3, %v1941_v55, %v1943_v50  ;;  %v1945_v23 = vsel %vm397_vm3, %v1943_v50, %v1941_v55 }
 0x630   : > { %v1946_v3 = vsub.f32 %v1944_v10, %v1939_v31  ;;  %v1947_v52 = vsub.f32 %v1945_v23, %v1938_v26  ;;  %v2014_v60 = vsub.f32 %v1939_v31, %v1944_v10  ;;  %v2015_v62 = vsub.f32 %v1938_v26, %v1945_v23 }
 0x632   : > { %v1885_v22 = vpop.permute.xlu1 %1884  ;;  %v1948_v48 = vmul.f32 %v1946_v3, %v2741_v34  ;;  %v1949_v25 = vmul.f32 %v1947_v52, %v2745_v40  ;;  %v2016_v29 = vmul.f32 %v2014_v60, %v2743_v39  ;;  %v2017_v35 = vmul.f32 %v2015_v62, %v2753_v49  ;;  %v1883_v47 = vpop.permute.xlu0 %1882 }
 0x633   : > { %v1886_v44 = vsel %vm390_vm2, %v1883_v47, %v1885_v22  ;;  %v1887_v4 = vsel %vm390_vm2, %v1885_v22, %v1883_v47 }
 0x634   : > { %v1950_v9 = vadd.f32 %v1948_v48, %v1939_v31  ;;  %v1951_v43 = vadd.f32 %v1949_v25, %v1938_v26  ;;  %v2018_v42 = vadd.f32 %v2016_v29, %v1944_v10  ;;  %v2019_v8 = vadd.f32 %v2017_v35, %v1945_v23 }
 0x636   : > { %v1891_v30 = vpop.permute.xlu1 %1890  ;;  %v1954_v11 = vrot.slane %v1950_v9, 2  ;;  %v1955_v38 = vrot.slane %v1951_v43, 2  ;;  %2020 = vst [vmem:[#allocation2 + $0x30] sm:$0x7] %v2018_v42  ;;  %2021 = vst [vmem:[#allocation2 + $0x38] sm:$0x7] %v2019_v8  ;;  %v1889_v46 = vpop.permute.xlu0 %1888 }
 0x637   : > { %v1892_v7 = vsel %vm397_vm3, %v1889_v46, %v1891_v30  ;;  %v1893_v53 = vsel %vm397_vm3, %v1891_v30, %v1889_v46 }
 0x638   : > { %1958 = vst [vmem:[#allocation2 + $0x10] ss:$-12 sps:$4 sm:$0xc1] %v1954_v11   ;;  %1959 = vst [vmem:[#allocation2 + $0x18] ss:$-12 sps:$4 sm:$0xc1] %v1955_v38   ;;  %v1894_v37 = vsub.f32 %v1892_v7, %v1887_v4  ;;  %v1895_v41 = vsub.f32 %v1893_v53, %v1886_v44  ;;  %v1986_v27 = vsub.f32 %v1887_v4, %v1892_v7 }
 0x639   : > { %v1987_v6 = vsub.f32 %v1886_v44, %v1893_v53 }
 0x63a   : > { %v1220_v63 = vpop.permute.xlu1 %1219  ;;  %v1896_v13 = vmul.f32 %v1894_v37, %v2741_v34  ;;  %v1897_v51 = vmul.f32 %v1895_v41, %v2745_v40  ;;  %v1988_v24 = vmul.f32 %v1986_v27, %v2743_v39  ;;  %v1218_v54 = vpop.permute.xlu0 %1217 }
 0x63b   : > { %v1989_v45 = vmul.f32 %v1987_v6, %v2753_v49  ;;  %v1221_v3 = vsel %vm359_vm1, %v1218_v54, %v1220_v63  ;;  %v1222_v52 = vsel %vm359_vm1, %v1220_v63, %v1218_v54  ;;  %v1302_v63 = vld [vmem:[#allocation3 + $0x8] sm:$0x38] }
 0x63c   : > { %v1898_v20 = vadd.f32 %v1896_v13, %v1887_v4  ;;  %v1899_v1 = vadd.f32 %v1897_v51, %v1886_v44  ;;  %v1990_v50 = vadd.f32 %v1988_v24, %v1892_v7  ;;  %v1301_v13 = vld [vmem:[#allocation3] sm:$0x38] }
 0x63d   : > { %v1991_v55 = vadd.f32 %v1989_v45, %v1893_v53  ;;  %v2039_v53 = vld [vmem:[#allocation2 + $0x38] sm:$0x7]  ;;  %v2038_v51 = vld [vmem:[#allocation2 + $0x30] sm:$0x7] }
 0x63e   : > { %v1226_v26 = vpop.permute.xlu1 %1225  ;;  %1900 = vst [vmem:[#allocation2] sm:$0x7] %v1898_v20  ;;  %1901 = vst [vmem:[#allocation2 + $0x8] sm:$0x7] %v1899_v1  ;;  %v1994_v31 = vrot.slane %v1990_v50, 6  ;;  %v1224_v23 = vpop.permute.xlu0 %1223  ;;  %v1306_v50 = vrot.slane %v1302_v63, 3 }
 0x63f   : > { %v1995_v10 = vrot.slane %v1991_v55, 6  ;;  %v1227_v60 = vsel %vm366_vm0, %v1224_v23, %v1226_v26  ;;  %v1228_v62 = vsel %vm366_vm0, %v1226_v26, %v1224_v23  ;;  %v2035_v42 = vld [vmem:[#allocation2 + $0x18] sm:$0xff]  ;;  %v2034_v11 = vld [vmem:[#allocation2 + $0x10] sm:$0xff]  ;;  %v1305_v55 = vrot.slane %v1301_v13, 3  ;;  %v2022_v26 = vld [vmem:[%s3735_s2] sm:$0xff] }
 0x640   : > { %1998 = vst [vmem:[#allocation2 + $0x20] sm:$0x1c] %v1994_v31  ;;  %v1229_v22 = vsub.f32 %v1227_v60, %v1222_v52  ;;  %v1230_v48 = vsub.f32 %v1228_v62, %v1221_v3  ;;  %v2025_v31 = vld [vmem:[%s3735_s2 + $0x18] sm:$0xff] }
 0x641   : > { %1999 = vst [vmem:[#allocation2 + $0x28] sm:$0x1c] %v1995_v10 }
 0x642   : > { %v1385_v25 = vpop.permute.xlu1 %1384  ;;  %v1231_v29 = vmul.f32 %v1229_v22, %v2717_v16  ;;  %v1232_v35 = vmul.f32 %v1230_v48, %v2719_v17  ;;  %v1383_v47 = vpop.permute.xlu0 %1382  ;;  %v2024_v22 = vld [vmem:[%s3735_s2 + $0x10] sm:$0xff]  ;;  %v2027_v48 = vld [vmem:[%s3735_s2 + $0x28] sm:$0xff] }
 0x643   : > { %v1386_v24 = vsel %vm366_vm0, %v1383_v47, %v1385_v25  ;;  %v1387_v45 = vsel %vm366_vm0, %v1385_v25, %v1383_v47  ;;  %v2028_v25 = vld [vmem:[%s3735_s2 + $0x30] sm:$0xff] }
 0x644   : > { %v1233_v9 = vadd.f32 %v1231_v29, %v1222_v52  ;;  %v1234_v43 = vadd.f32 %v1232_v35, %v1221_v3  ;;  %v2023_v3 = vld [vmem:[%s3735_s2 + $0x8] sm:$0xff]  ;;  %v2026_v52 = vld [vmem:[%s3735_s2 + $0x20] sm:$0xff]  ;;  %v1466_v29 = vld [vmem:[#allocation3 + $0x10] sm:$0xe] }
 0x645   : > { %v2033_v8 = vld [vmem:[#allocation2 + $0x8] sm:$0xff]  ;;  %v2032_v30 = vld [vmem:[#allocation2] sm:$0xff] }
 0x646   : > { %v1389_v38 = vpop.permute.xlu0 %1388  ;;  %1237 = vrot.lane.b32.xlu0 %v1234_v43, %s2607_s17  ;;  %1235 = vrot.lane.b32.xlu1 %v1233_v9, %s2607_s17  ;;  %v1391_v46 = vpop.permute.xlu1 %1390  ;;  %v2558_v44 = vpack.c.bf16 %v2035_v42, %v2033_v8  ;;  %v2560_v4 = vpack.c.bf16 %v2034_v11, %v2032_v30  ;;  %v2045_v35 = vld [vmem:[%s3736_s3 + $0x28] sm:$0xff]  ;;  %v2029_v42 = vld [vmem:[%s3735_s2 + $0x38] sm:$0xff] }
 0x647   : > { %v2036_v41 = vld [vmem:[#allocation2 + $0x20] sm:$0xff]  ;;  %v1392_v27 = vsel %vm359_vm1, %v1389_v38, %v1391_v46  ;;  %v1393_v6 = vsel %vm359_vm1, %v1391_v46, %v1389_v38  ;;  %v1467_v8 = vld [vmem:[#allocation3 + $0x18] sm:$0xe] }
 0x648   : > { %v2037_v7 = vld [vmem:[#allocation2 + $0x28] sm:$0xff]  ;;  %2559 = vmatprep.subr.bf16.mxu0 %v2558_v44  ;;  %2568 = vmatprep.subr.bf16.mxu1 %v2558_v44  ;;  %v2565_v54 = vpack.c.bf16 %v2038_v51, %v2036_v41  ;;  %v1394_v20 = vsub.f32 %v1393_v6, %v1386_v24  ;;  %v1395_v1 = vsub.f32 %v1392_v27, %v1387_v45  ;;  %v1471_v30 = vrot.slane %v1467_v8, 1  ;;  %v1553_v46 = vld [vmem:[#allocation3 + $0x20] sm:$0x3] }
 0x649   : > { %v2562_v37 = vpack.c.bf16 %v2039_v53, %v2037_v7  ;;  %2561 = vmatpush1.bf16.msra.mxu0 %v2560_v4  ;;  %2570 = vmatpush1.bf16.msra.mxu1 %v2560_v4  ;;  %v1554_v44 = vld [vmem:[#allocation3 + $0x28] sm:$0x3]  ;;  %v2046_v4 = vld [vmem:[%s3736_s3 + $0x30] sm:$0xff]  ;;  %v1552_v53 = vld [vmem:[#allocation3 + $0x18] sm:$0x80]  ;;  %v1560_v27 = vrot.slane %v1553_v46, 7 }
 0x64a   : > { %1243 = vrot.lane.b32.xlu0 %v1234_v43, %s2608_s18  ;;  %1241 = vrot.lane.b32.xlu1 %v1233_v9, %s2608_s18  ;;  %v1396_v10 = vmul.f32 %v1394_v20, %v2713_v14  ;;  %v1397_v23 = vmul.f32 %v1395_v1, %v2715_v15  ;;  %v1624_v47 = vpop.permute.xlu0 %1623  ;;  %v1626_v9 = vpop.permute.xlu1 %1625  ;;  %v1470_v43 = vrot.slane %v1466_v29, 1  ;;  %v1551_v7 = vld [vmem:[#allocation3 + $0x10] sm:$0x80]  ;;  %v1563_v6 = vrot.slane %v1554_v44, 7  ;;  %v1843_v46 = vld [vmem:[%s3740_s7] sm:$0x7] }
 0x64b   : > { %2564 = vmatprep.subr.msk.bf16.mxu0 %vm2856_vm6, %v2562_v37  ;;  %2569 = vmatprep.subr.msk.bf16.mxu1 %vm2856_vm6, %v2562_v37  ;;  %v1627_v63 = vsel %vm359_vm1, %v1624_v47, %v1626_v9  ;;  %v1628_v13 = vsel %vm359_vm1, %v1626_v9, %v1624_v47  ;;  %v1559_v51 = vrot.slane %v1551_v7, 7  ;;  %v1708_v47 = vld [vmem:[#allocation3 + $0x28] sm:$0xe0]  ;;  %v2271_v44 = vsub.f32 %v3278_v28, %v2678_v0 }
 0x64c   : > { %v1398_v60 = vadd.f32 %v1396_v10, %v1386_v24  ;;  %v1399_v62 = vadd.f32 %v1397_v23, %v1387_v45  ;;  %v1562_v24 = vrot.slane %v1552_v53, 7  ;;  %v1712_v8 = vrot.slane %v1708_v47, 5 }
 0x64d   : > { %2567 = vmatpush1.bf16.msk.msra.mxu0 %vm2856_vm6, %v2565_v54  ;;  %2571 = vmatpush1.bf16.msk.msra.mxu1 %vm2856_vm6, %v2565_v54  ;;  %v1561_v20 = vsel %vm1540_vm10, %v1559_v51, %v1560_v27  ;;  %v2291_v7 = vmul.f32 %v2271_v44, %v2271_v44 }
 0x64e   : > { %1311 = vrot.lane.b32.xlu0 %v1306_v50, %s2607_s17  ;;  %1309 = vrot.lane.b32.xlu1 %v1305_v55, %s2607_s17  ;;  %v1630_v11 = vpop.permute.xlu0 %1629  ;;  %v1632_v38 = vpop.permute.xlu1 %1631  ;;  %v1564_v1 = vsel %vm1540_vm10, %v1562_v24, %v1563_v6 }
 0x64f   : > { %v1633_v37 = vsel %vm366_vm0, %v1630_v11, %v1632_v38  ;;  %v1634_v41 = vsel %vm366_vm0, %v1632_v38, %v1630_v11 }
 0x650   : > { %2494 = vmatmul.mubr.msk.f32.vlgmr.msra.gmra.mrb[34].mxu0 %vm637_vm7, %v2022_v26  ;;  %2497 = vmatmul.mubr.msk.f32.vlgmr.msra.gmra.mrb[20].mxu1 %vm637_vm7, %v2025_v31  ;;  %v1635_v45 = vsub.f32 %v1633_v37, %v1628_v13  ;;  %v1636_v54 = vsub.f32 %v1634_v41, %v1627_v63  ;;  %v2293_v37 = vsel %vm668_vm4, %v2291_v7, 0.0 }
 0x651   : > { %2204 = vmatprep.mubr.f32.mxu0 %v3779_v33  ;;  %2222 = vmatprep.mubr.f32.mxu1 %v3779_v33 }
 0x652   : > { %1317 = vrot.lane.b32.xlu0 %v1306_v50, %s2608_s18  ;;  %1315 = vrot.lane.b32.xlu1 %v1305_v55, %s2608_s18  ;;  %v1637_v50 = vmul.f32 %v1635_v45, %v2717_v16  ;;  %v1638_v55 = vmul.f32 %v1636_v54, %v2719_v17  ;;  %v1760_v26 = vpop.permute.xlu0 %1759  ;;  %v1762_v31 = vpop.permute.xlu1 %1761  ;;  %v2030_v54 = vld [vmem:[%s3735_s2 + $0x40] sm:$0xff] }
 0x653   : > { %v1764_v9 = vsel %vm366_vm0, %v1762_v31, %v1760_v26 }
 0x654   : > { %2495 = vmatmul.mubr.msk.f32.gmra.mrb[36].mxu0 %vm637_vm7, %v2023_v3  ;;  %2498 = vmatmul.mubr.msk.f32.gmra.mrb[22].mxu1 %vm637_vm7, %v2026_v52  ;;  %v1639_v10 = vadd.f32 %v1637_v50, %v1628_v13  ;;  %v1640_v23 = vadd.f32 %v1638_v55, %v1627_v63  ;;  %v2031_v50 = vld [vmem:[%s3735_s2 + $0x48] sm:$0xff] }
 0x655   : > { %2210 = vmatprep.mubr.f32.mxu0 %v3779_v33  ;;  %2228 = vmatprep.mubr.f32.mxu1 %v3779_v33 }
 0x656   : > { %1400 = vrot.lane.b32.xlu1 %v1398_v60, %s2607_s17  ;;  %1402 = vrot.lane.b32.xlu0 %v1399_v62, %s2607_s17  ;;  %v1766_v3 = vpop.permute.xlu0 %1765  ;;  %v1768_v52 = vpop.permute.xlu1 %1767 }
 0x658   : > { %2496 = vmatmul.mubr.msk.f32.gmra.mrb[38].mxu0 %vm637_vm7, %v2024_v22  ;;  %2499 = vmatmul.mubr.msk.f32.gmra.mrb[24].mxu1 %vm637_vm7, %v2027_v48  ;;  %v1763_v22 = vsel %vm366_vm0, %v1760_v26, %v1762_v31  ;;  %v2047_v48 = vld [vmem:[%s3736_s3 + $0x38] sm:$0xff] }
 0x659   : > { %2234 = vmatprep.mubr.f32.mxu1 %v3779_v33 }
 0x65a   : > { %1406 = vrot.lane.b32.xlu1 %v1398_v60, %s2608_s18  ;;  %1408 = vrot.lane.b32.xlu0 %v1399_v62, %s2608_s18  ;;  %v1770_v60 = vsel %vm359_vm1, %v1768_v52, %v1766_v3  ;;  %v1707_v62 = vld [vmem:[#allocation3 + $0x20] sm:$0xe0] }
 0x65b   : > { %v1711_v29 = vrot.slane %v1707_v62, 5 }
 0x65c   : > { %2500 = vmatmul.mubr.msk.f32.gmra.mrb[26].mxu1 %vm637_vm7, %v2028_v25  ;;  %v1771_v25 = vsub.f32 %v1770_v60, %v1763_v22 }
 0x65d   : > { %2240 = vmatprep.mubr.f32.mxu1 %v3779_v33 }
 0x65e   : > { %2077 = vperm.xlu1 %2594, %v2045_v35   ;;  %1474 = vrot.lane.b32.xlu0 %v1470_v43, %s2606_s16  ;;  %v1769_v35 = vsel %vm359_vm1, %v1766_v3, %v1768_v52 }
 0x660   : > { %2501 = vmatmul.mubr.msk.f32.gmra.mrb[28].mxu1 %vm637_vm7, %v2029_v42  ;;  %v1773_v42 = vmul.f32 %v1771_v25, %v2713_v14 }
 0x661   : > { %2246 = vmatprep.mubr.f32.mxu1 %v3779_v33 }
 0x662   : > { %1476 = vrot.lane.b32.xlu1 %v1471_v30, %s2606_s16  ;;  %1480 = vrot.lane.b32.xlu0 %v1470_v43, %s2605_s15  ;;  %v1772_v43 = vsub.f32 %v1769_v35, %v1764_v9  ;;  %v1775_v11 = vadd.f32 %v1773_v42, %v1763_v22 }
 0x664   : > { %2502 = vmatmul.mubr.msk.f32.gmra.mrb[30].mxu1 %vm637_vm7, %v2030_v54 }
 0x665   : > { %2250 = vmatprep.mubr.f32.mxu1 %v3779_v33 }
 0x666   : > { %1482 = vrot.lane.b32.xlu1 %v1471_v30, %s2605_s15  ;;  %2082 = vperm.xlu0 %2593, %v2046_v4   ;;  %v1774_v30 = vmul.f32 %v1772_v43, %v2715_v15  ;;  %v2272_v4 = vsub.f32 %v3280_v57, %v2689_v2 }
 0x667   : > { %v3535_v6 = vpop.permute.xlu1 %2057  ;;  %v3537_v63 = vpop.permute.xlu0 %2052 }
 0x668   : > { %v1776_v38 = vadd.f32 %v1774_v30, %v1764_v9  ;;  %v2292_v53 = vmul.f32 %v2272_v4, %v2272_v4  ;;  %2503 = vmatmul.mubr.msk.f32.gmra.mrb[32].mxu1 %vm637_vm7, %v2031_v50 }
 0x66a   : > { %1567 = vrot.lane.b32.xlu1 %v1561_v20, %s2605_s15  ;;  %1569 = vrot.lane.b32.xlu0 %v1564_v1, %s2605_s15  ;;  %v2294_v41 = vsel %vm668_vm4, %v2292_v53, 0.0 }
 0x66b   : > { %v2295_v27 = vadd.f32 %v2294_v41, %v2293_v37  ;;  %v3539_v13 = vpop.permute.xlu1 %2067  ;;  %v3541_v51 = vpop.permute.xlu0 %2062 }
 0x66e   : > { %1573 = vrot.lane.b32.xlu1 %v1561_v20, %s2606_s16  ;;  %1575 = vrot.lane.b32.xlu0 %v1564_v1, %s2606_s16 }
 0x66f   : > { %v3543_v24 = vpop.permute.xlu0 %2072 }
 0x672   : > { %1643 = vrot.lane.b32.xlu0 %v1640_v23, %s2608_s18  ;;  %1641 = vrot.lane.b32.xlu1 %v1639_v10, %s2608_s18 }
 0x676   : > { %1649 = vrot.lane.b32.xlu0 %v1640_v23, %s2607_s17  ;;  %1647 = vrot.lane.b32.xlu1 %v1639_v10, %s2607_s17 }
 0x67a   : > { %1715 = vrot.lane.b32.xlu0 %v1711_v29, %s2608_s18  ;;  %2087 = vperm.xlu1 %2594, %v2047_v48  }
 0x67e   : > { %1721 = vrot.lane.b32.xlu0 %v1711_v29, %s2607_s17  ;;  %1717 = vrot.lane.b32.xlu1 %v1712_v8, %s2608_s18 }
 0x682   : > { %1723 = vrot.lane.b32.xlu1 %v1712_v8, %s2607_s17  ;;  %1777 = vrot.lane.b32.xlu0 %v1775_v11, %s2608_s18 }
 0x686   : > { %1783 = vrot.lane.b32.xlu0 %v1775_v11, %s2607_s17  ;;  %1779 = vrot.lane.b32.xlu1 %v1776_v38, %s2608_s18 }
 0x68a   : > { %1846 = vperm.xlu0 %2593, %v1843_v46   ;;  %1785 = vrot.lane.b32.xlu1 %v1776_v38, %s2607_s17 }
 0x6ae   : > { %2296 = vadd.xlane.f32.xlu1 %v2295_v27 }
 0x6b8   : > { %v1236_v0 = vpop.permute.xlu1 %1235  ;;  %v1238_v45 = vpop.permute.xlu0 %1237 }
 0x6b9   : > { %v1239_v46 = vsel %vm390_vm2, %v1236_v0, %v1238_v45  ;;  %v1240_v50 = vsel %vm390_vm2, %v1238_v45, %v1236_v0 }
 0x6bc   : > { %v1242_v2 = vpop.permute.xlu1 %1241  ;;  %v1244_v1 = vpop.permute.xlu0 %1243 }
 0x6bd   : > { %v1245_v44 = vsel %vm397_vm3, %v1242_v2, %v1244_v1  ;;  %v1246_v53 = vsel %vm397_vm3, %v1244_v1, %v1242_v2 }
 0x6be   : > { %v1247_v28 = vsub.f32 %v1245_v44, %v1240_v50 }
 0x6c0   : > { %v1310_v20 = vpop.permute.xlu1 %1309  ;;  %v1312_v26 = vpop.permute.xlu0 %1311 }
 0x6c1   : > { %v1314_v4 = vsel %vm390_vm2, %v1312_v26, %v1310_v20  ;;  %v1313_v37 = vsel %vm390_vm2, %v1310_v20, %v1312_v26  ;;  %v1248_v26 = vsub.f32 %v1246_v53, %v1239_v46 }
 0x6c4   : > { %v1316_v55 = vpop.permute.xlu1 %1315  ;;  %v1318_v10 = vpop.permute.xlu0 %1317 }
 0x6c5   : > { %v1319_v30 = vsel %vm397_vm3, %v1316_v55, %v1318_v10  ;;  %v1320_v11 = vsel %vm397_vm3, %v1318_v10, %v1316_v55 }
 0x6c6   : > { %v1321_v41 = vsub.f32 %v1319_v30, %v1314_v4  ;;  %v1322_v55 = vsub.f32 %v1320_v11, %v1313_v37 }
 0x6c8   : > { %v1401_v31 = vpop.permute.xlu1 %1400  ;;  %v1403_v3 = vpop.permute.xlu0 %1402  ;;  %v1323_v45 = vmul.f32 %v1321_v41, %v2741_v34  ;;  %v1324_v44 = vmul.f32 %v1322_v55, %v2745_v40 }
 0x6c9   : > { %v1405_v10 = vsel %vm390_vm2, %v1403_v3, %v1401_v31  ;;  %v1404_v2 = vsel %vm390_vm2, %v1401_v31, %v1403_v3  ;;  %v1249_v3 = vmul.f32 %v1247_v28, %v2741_v34 }
 0x6cb   : > { %v1251_v55 = vadd.f32 %v1249_v3, %v1240_v50 }
 0x6cc   : > { %v1407_v23 = vpop.permute.xlu1 %1406  ;;  %v1409_v60 = vpop.permute.xlu0 %1408 }
 0x6cd   : > { %v1410_v7 = vsel %vm397_vm3, %v1407_v23, %v1409_v60  ;;  %v1411_v27 = vsel %vm397_vm3, %v1409_v60, %v1407_v23 }
 0x6ce   : > { %v1412_v20 = vsub.f32 %v1410_v7, %v1405_v10  ;;  %v1413_v23 = vsub.f32 %v1411_v27, %v1404_v2  ;;  %v1250_v7 = vmul.f32 %v1248_v26, %v2745_v40  ;;  %v1326_v27 = vadd.f32 %v1324_v44, %v1313_v37 }
 0x6d0   : > { %v1475_v22 = vpop.permute.xlu0 %1474  ;;  %v1415_v53 = vmul.f32 %v1413_v23, %v2745_v40  ;;  %v1252_v23 = vadd.f32 %v1250_v7, %v1239_v46  ;;  %v1522_v46 = vld [vmem:[#allocation3 + $0x10] sm:$0x70] }
 0x6d4   : > { %v1481_v33 = vpop.permute.xlu0 %1480 }
 0x6dd   : > { %v3554_v52 = vpop.permute.xlu1 %2077 }
 0x6e1   : > { %v1477_v62 = vpop.permute.xlu1 %1476 }
 0x6e2   : > { %v1479_v0 = vsel %vm359_vm1, %v1477_v62, %v1475_v22  ;;  %v1478_v60 = vsel %vm359_vm1, %v1475_v22, %v1477_v62  ;;  %v1325_v62 = vadd.f32 %v1323_v45, %v1314_v4  ;;  %v1417_v4 = vadd.f32 %v1415_v53, %v1404_v2 }
 0x6e5   : > { %v1483_v48 = vpop.permute.xlu1 %1482  ;;  %v3556_v29 = vpop.permute.xlu0 %2082 }
 0x6e6   : > { %v1484_v57 = vsel %vm366_vm0, %v1481_v33, %v1483_v48  ;;  %v1485_v1 = vsel %vm366_vm0, %v1483_v48, %v1481_v33  ;;  %v1414_v48 = vmul.f32 %v1412_v20, %v2741_v34 }
 0x6e7   : > { %v1486_v30 = vsub.f32 %v1484_v57, %v1479_v0  ;;  %v1487_v31 = vsub.f32 %v1485_v1, %v1478_v60 }
 0x6e8   : > { %v1416_v20 = vadd.f32 %v1414_v48, %v1405_v10  ;;  %v1526_v48 = vrot.slane %v1522_v46, 4 }
 0x6e9   : > { %v1568_v25 = vpop.permute.xlu1 %1567  ;;  %v1570_v47 = vpop.permute.xlu0 %1569  ;;  %v1488_v57 = vmul.f32 %v1486_v30, %v2717_v16  ;;  %v1489_v28 = vmul.f32 %v1487_v31, %v2719_v17  ;;  %v1327_v16 = vadd.f32 %v1325_v62, %v1251_v55  ;;  %v1328_v17 = vadd.f32 %v1326_v27, %v1252_v23 }
 0x6ea   : > { %v1571_v34 = vsel %vm366_vm0, %v1568_v25, %v1570_v47  ;;  %v1572_v40 = vsel %vm366_vm0, %v1570_v47, %v1568_v25 }
 0x6eb   : > { %v1490_v30 = vadd.f32 %v1488_v57, %v1479_v0  ;;  %v1491_v37 = vadd.f32 %v1489_v28, %v1478_v60  ;;  %v1418_v10 = vadd.f32 %v1416_v20, %v1327_v16  ;;  %v1419_v47 = vadd.f32 %v1417_v4, %v1328_v17 }
 0x6ed   : > { %v1574_v35 = vpop.permute.xlu1 %1573  ;;  %v1576_v43 = vpop.permute.xlu0 %1575  ;;  %v1492_v31 = vadd.f32 %v1490_v30, %v1418_v10 }
 0x6ee   : > { %v1578_v41 = vsel %vm359_vm1, %v1576_v43, %v1574_v35  ;;  %v1577_v22 = vsel %vm359_vm1, %v1574_v35, %v1576_v43 }
 0x6ef   : > { %v1579_v1 = vsub.f32 %v1578_v41, %v1571_v34  ;;  %v1580_v45 = vsub.f32 %v1577_v22, %v1572_v40  ;;  %v1530_v27 = vadd.f32 %v1526_v48, %v1492_v31 }
 0x6f1   : > { %v3558_v9 = vpop.permute.xlu1 %1641  ;;  %v3560_v8 = vpop.permute.xlu0 %1643  ;;  %v1581_v44 = vmul.f32 %v1579_v1, %v2713_v14  ;;  %v1582_v2 = vmul.f32 %v1580_v45, %v2715_v15  ;;  %v1493_v14 = vadd.f32 %v1491_v37, %v1419_v47 }
 0x6f2   : > { %v1645_v25 = vsel %vm397_vm3, %v3558_v9, %v3560_v8  ;;  %v1646_v0 = vsel %vm397_vm3, %v3560_v8, %v3558_v9 }
 0x6f3   : > { %v1583_v7 = vadd.f32 %v1581_v44, %v1571_v34  ;;  %v1584_v62 = vadd.f32 %v1582_v2, %v1572_v40 }
 0x6f5   : > { %v1648_v42 = vpop.permute.xlu1 %1647  ;;  %v1650_v54 = vpop.permute.xlu0 %1649  ;;  %v3640_v40 = vadd.f32 %v1583_v7, %v1530_v27 }
 0x6f6   : > { %v1652_v35 = vsel %vm390_vm2, %v1650_v54, %v1648_v42  ;;  %v1651_v50 = vsel %vm390_vm2, %v1648_v42, %v1650_v54  ;;  %v1523_v42 = vld [vmem:[#allocation3 + $0x18] sm:$0x70] }
 0x6f7   : > { %v1653_v60 = vsub.f32 %v1652_v35, %v1645_v25  ;;  %v1654_v54 = vsub.f32 %v1651_v50, %v1646_v0  ;;  %v1527_v41 = vrot.slane %v1523_v42, 4 }
 0x6f9   : > { %v3566_v38 = vpop.permute.xlu1 %2087  ;;  %v3602_v33 = vpop.permute.xlu0 %1715  ;;  %v1655_v57 = vmul.f32 %v1653_v60, %v2743_v39  ;;  %v1656_v28 = vmul.f32 %v1654_v54, %v2753_v49  ;;  %v1531_v1 = vadd.f32 %v1527_v41, %v1493_v14 }
 0x6fb   : > { %v3642_v16 = vadd.f32 %v1584_v62, %v1531_v1  ;;  %v3644_v30 = vadd.f32 %v1655_v57, %v1645_v25  ;;  %v1658_v10 = vadd.f32 %v1656_v28, %v1646_v0 }
 0x6fd   : > { %v3597_v11 = vpop.permute.xlu1 %1717  ;;  %v1722_v43 = vpop.permute.xlu0 %1721 }
 0x6fe   : > { %v1719_v25 = vsel %vm397_vm3, %v3602_v33, %v3597_v11  ;;  %v1720_v0 = vsel %vm397_vm3, %v3597_v11, %v3602_v33  ;;  %v3782_v33 = vmax.f32 %v2918_v59, 0.0 }
 0x701   : > { %v1724_v26 = vpop.permute.xlu1 %1723  ;;  %v1778_v53 = vpop.permute.xlu0 %1777 }
 0x702   : > { %v1726_v35 = vsel %vm390_vm2, %v1724_v26, %v1722_v43 }
 0x703   : > { %v1727_v31 = vsub.f32 %v1726_v35, %v1719_v25 }
 0x705   : > { %v1780_v3 = vpop.permute.xlu1 %1779  ;;  %v1784_v60 = vpop.permute.xlu0 %1783 }
 0x706   : > { %v1781_v7 = vsel %vm397_vm3, %v1778_v53, %v1780_v3 }
 0x709   : > { %v1786_v4 = vpop.permute.xlu1 %1785 }
 0x70a   : > { %v1788_v42 = vsel %vm390_vm2, %v1786_v4, %v1784_v60 }
 0x723   : > { %v2200_v22 = vpop.f32.mrb[34].mxu0  ;;  %v2218_v15 = vpop.f32.mrb[20].mxu1 }
 0x724   : > { %v2201_v9 = vadd.f32 %v2200_v22, %v3537_v63  ;;  %v3634_v8 = vadd.f32 %v2218_v15, %v3539_v13  ;;  %v2202_v55 = vpop.f32.mrb[35].mxu0  ;;  %v2220_v20 = vpop.f32.mrb[21].mxu1 }
 0x725   : > { %v2203_v34 = vadd.f32 %v2202_v55, %v3537_v63  ;;  %v3638_v23 = vadd.f32 %v2220_v20, %v3539_v13  ;;  %v1725_v63 = vsel %vm390_vm2, %v1722_v43, %v1724_v26  ;;  %v3780_v13 = vmax.f32 %v2916_v58, 0.0 }
 0x726   : > { %v2255_v45 = vmax.f32 %v2201_v9, 0.0  ;;  %v3781_v26 = vmax.f32 %v2914_v56, 0.0  ;;  %v1728_v48 = vsub.f32 %v1725_v63, %v1720_v0  ;;  %v1782_v56 = vsel %vm397_vm3, %v1780_v3, %v1778_v53 }
 0x727   : > { %v2256_v17 = vmax.f32 %v2203_v34, 0.0  ;;  %v2206_v37 = vpop.f32.mrb[36].mxu0  ;;  %v2224_v50 = vpop.f32.mrb[22].mxu1  ;;  %v1789_v9 = vsub.f32 %v1788_v42, %v1781_v7  ;;  %v3783_v20 = vmax.f32 %v2920_v61, 0.0 }
 0x728   : > { %v2273_v44 = vsub.f32 %v2255_v45, %v3780_v13  ;;  %v2207_v47 = vadd.f32 %v2206_v37, %v3535_v6  ;;  %v2208_v46 = vpop.f32.mrb[37].mxu0  ;;  %v2226_v2 = vpop.f32.mrb[23].mxu1  ;;  %v2261_v45 = vmax.f32 %v3634_v8, 0.0  ;;  %v2225_v53 = vadd.f32 %v2224_v50, %v3543_v24 }
 0x729   : > { %v2274_v43 = vsub.f32 %v2256_v17, %v3781_v26  ;;  %v2209_v58 = vadd.f32 %v2208_v46, %v3535_v6  ;;  %v1787_v6 = vsel %vm390_vm2, %v1784_v60, %v1786_v4  ;;  %v2227_v17 = vadd.f32 %v2226_v2, %v3543_v24 }
 0x72a   : > { %v2305_v54 = vmul.f32 %v2273_v44, %v2273_v44  ;;  %v2257_v14 = vmax.f32 %v2207_v47, 0.0  ;;  %v1790_v35 = vsub.f32 %v1787_v6, %v1782_v56  ;;  %v1729_v13 = vmul.f32 %v1727_v31, %v2743_v39 }
 0x72b   : > { %v2306_v41 = vmul.f32 %v2274_v43, %v2274_v43  ;;  %v2258_v62 = vmax.f32 %v2209_v58, 0.0  ;;  %v2212_v57 = vpop.f32.mrb[38].mxu0  ;;  %v2230_v11 = vpop.f32.mrb[24].mxu1  ;;  %v2262_v44 = vmax.f32 %v3638_v23, 0.0  ;;  %v3784_v47 = vmax.f32 %v2936_v18, 0.0 }
 0x72c   : > { %v2275_v22 = vsub.f32 %v2257_v14, %v3782_v33  ;;  %v2213_v15 = vadd.f32 %v2212_v57, %v3541_v51  ;;  %v2214_v27 = vpop.f32.mrb[39].mxu0  ;;  %v2232_v28 = vpop.f32.mrb[25].mxu1  ;;  %v1730_v8 = vmul.f32 %v1728_v48, %v2753_v49  ;;  %v1791_v50 = vmul.f32 %v1789_v9, %v2743_v39 }
 0x72d   : > { %v2321_v55 = vadd.f32 %v2306_v41, %v2305_v54  ;;  %v2276_v1 = vsub.f32 %v2258_v62, %v3783_v20  ;;  %v2215_v34 = vadd.f32 %v2214_v27, %v3541_v51  ;;  %v2231_v60 = vadd.f32 %v2230_v11, %v3554_v52 }
 0x72e   : > { %v2307_v3 = vmul.f32 %v2275_v22, %v2275_v22  ;;  %v2259_v4 = vmax.f32 %v2213_v15, 0.0  ;;  %v3785_v26 = vmax.f32 %v2934_v12, 0.0  ;;  %v3786_v2 = vmax.f32 %v2938_v19, 0.0 }
 0x72f   : > { %v2308_v59 = vmul.f32 %v2276_v1, %v2276_v1  ;;  %v2260_v37 = vmax.f32 %v2215_v34, 0.0  ;;  %v2236_v63 = vpop.f32.mrb[26].mxu1  ;;  %v2263_v58 = vmax.f32 %v2225_v53, 0.0  ;;  %v1792_v42 = vmul.f32 %v1790_v35, %v2753_v49 }
 0x730   : > { %v2322_v61 = vadd.f32 %v2321_v55, %v2307_v3  ;;  %v2277_v51 = vsub.f32 %v2259_v4, %v3784_v47  ;;  %v2238_v46 = vpop.f32.mrb[27].mxu1  ;;  %v2279_v43 = vsub.f32 %v2261_v45, %v3786_v2  ;;  %v2264_v18 = vmax.f32 %v2227_v17, 0.0 }
 0x731   : > { %v2278_v24 = vsub.f32 %v2260_v37, %v3785_v26  ;;  %v2233_v14 = vadd.f32 %v2232_v28, %v3554_v52  ;;  %v1659_v39 = vadd.f32 %v3644_v30, %v3640_v40  ;;  %v3787_v41 = vmax.f32 %v2940_v21, 0.0 }
 0x732   : > { %v2323_v31 = vadd.f32 %v2322_v61, %v2308_v59  ;;  %v2309_v23 = vmul.f32 %v2277_v51, %v2277_v51  ;;  %v1660_v19 = vadd.f32 %v1658_v10, %v3642_v16  ;;  %v1731_v11 = vadd.f32 %v1729_v13, %v1719_v25  ;;  %v1847_v61 = vpop.permute.xlu0 %1846  ;;  %v3794_v51 = vld [vmem:[#allocation7_spill] sm:$0xff] }
 0x733   : > { %v2310_v54 = vmul.f32 %v2278_v24, %v2278_v24  ;;  %v2242_v48 = vpop.f32.mrb[28].mxu1  ;;  %v2280_v12 = vsub.f32 %v2262_v44, %v3787_v41  ;;  %v1732_v6 = vadd.f32 %v1730_v8, %v1720_v0  ;;  %v2265_v33 = vmax.f32 %v2231_v60, 0.0  ;;  %v3790_v0 = vld [vmem:[#allocation4_spill] sm:$0xff] }
 0x734   : > { %v2324_v62 = vadd.f32 %v2323_v31, %v2309_v23  ;;  %v2244_v57 = vpop.f32.mrb[29].mxu1  ;;  %v2311_v22 = vmul.f32 %v2279_v43, %v2279_v43  ;;  %v3788_v49 = vmax.f32 %v2956_v36, 0.0  ;;  %v2237_v52 = vadd.f32 %v2236_v63, %v3556_v29 }
 0x735   : > { %v1793_v28 = vadd.f32 %v1791_v50, %v1781_v7  ;;  %v1794_v9 = vadd.f32 %v1792_v42, %v1782_v56  ;;  %v3789_v40 = vmax.f32 %v2954_v32, 0.0  ;;  %v2266_v30 = vmax.f32 %v2233_v14, 0.0  ;;  %v3792_v32 = vld [vmem:[#allocation5_spill] sm:$0xff]  ;;  %v3798_v14 = vld [vmem:[#allocation8_spill] sm:$0xff] }
 0x736   : > { %v2281_v15 = vsub.f32 %v2263_v58, %v3788_v49  ;;  %v2325_v27 = vadd.f32 %v2324_v62, %v2310_v54  ;;  %v2312_v55 = vmul.f32 %v2280_v12, %v2280_v12  ;;  %v2239_v16 = vadd.f32 %v2238_v46, %v3556_v29  ;;  %v3796_v58 = vld [vmem:[#allocation6_spill] sm:$0xff] }
 0x737   : > { %v2282_v21 = vsub.f32 %v2264_v18, %v3789_v40  ;;  %v1733_v10 = vadd.f32 %v1731_v11, %v1659_v39  ;;  %v1734_v25 = vadd.f32 %v1732_v6, %v1660_v19  ;;  %v3791_v1 = vmax.f32 %v3790_v0, 0.0  ;;  %v3800_v12 = vld [vmem:[#allocation10_spill] sm:$0xff] }
 0x738   : > { %v2326_v20 = vadd.f32 %v2325_v27, %v2311_v22  ;;  %v2313_v36 = vmul.f32 %v2281_v15, %v2281_v15  ;;  %v2267_v3 = vmax.f32 %v2237_v52, 0.0  ;;  %v2243_v53 = vadd.f32 %v2242_v48, %v3566_v38 }
 0x739   : > { %v2283_v34 = vsub.f32 %v2265_v33, %v3791_v1  ;;  %v1795_v7 = vadd.f32 %v1793_v28, %v1733_v10  ;;  %v1796_v56 = vadd.f32 %v1794_v9, %v1734_v25  ;;  %v2314_v4 = vmul.f32 %v2282_v21, %v2282_v21  ;;  %v3802_v33 = vld [vmem:[#allocation9_spill] sm:$0xff]  ;;  %v2248_v25 = vpop.f32.mrb[30].mxu1 }
 0x73a   : > { %v2327_v45 = vadd.f32 %v2326_v20, %v2312_v55  ;;  %v3793_v35 = vmax.f32 %v3792_v32, 0.0  ;;  %v2268_v63 = vmax.f32 %v2239_v16, 0.0  ;;  %v2245_v29 = vadd.f32 %v2244_v57, %v3566_v38  ;;  %v3801_v57 = vld [vmem:[#allocation11_spill] sm:$0xff]  ;;  %v2249_v0 = vpop.f32.mrb[31].mxu1 }
 0x73b   : > { %v2297_v17 = vpop.xlane.xlu1 %2296  ;;  %v2315_v44 = vmul.f32 %v2283_v34, %v2283_v34  ;;  %v3795_v46 = vmax.f32 %v3794_v51, 0.0  ;;  %v2269_v50 = vmax.f32 %v2243_v53, 0.0  ;;  %v1849_v24 = vadd.f32 %v1847_v61, %v1795_v7  ;;  %v2252_v1 = vpop.f32.mrb[32].mxu1 }
 0x73c   : > { %v2284_v59 = vsub.f32 %v2266_v30, %v3793_v35  ;;  %v2328_v37 = vadd.f32 %v2327_v45, %v2313_v36  ;;  %v2298_v13 = vrot.slane %v2297_v17, 4  ;;  %v1850_v2 = vadd.f32 %v1847_v61, %v1796_v56  ;;  %v2253_v34 = vpop.f32.mrb[33].mxu1 }
 0x73d   : > { %v2285_v8 = vsub.f32 %v2267_v3, %v3795_v46  ;;  %v3797_v31 = vmax.f32 %v3796_v58, 0.0  ;;  %v2270_v42 = vmax.f32 %v2245_v29, 0.0  ;;  %v3799_v48 = vmax.f32 %v3798_v14, 0.0 }
 0x73e   : > { %v2329_v47 = vadd.f32 %v2328_v37, %v2314_v4  ;;  %v2299_v60 = vadd.f32 %v2298_v13, %v2297_v17  ;;  %v2316_v26 = vmul.f32 %v2284_v59, %v2284_v59  ;;  %v2289_v62 = vsub.f32 %v3800_v12, %v1849_v24 }
 0x73f   : > { %v2286_v23 = vsub.f32 %v2268_v63, %v3797_v31  ;;  %v2317_v38 = vmul.f32 %v2285_v8, %v2285_v8  ;;  %v2287_v39 = vsub.f32 %v2269_v50, %v3799_v48  ;;  %v2290_v19 = vsub.f32 %v3801_v57, %v1850_v2 }
 0x740   : > { %v2330_v43 = vadd.f32 %v2329_v47, %v2315_v44  ;;  %v2300_v18 = vrot.slane %v2299_v60, 2  ;;  %v3803_v22 = vmax.f32 %v3802_v33, 0.0  ;;  %v2345_v9 = vmul.f32 %v2289_v62, %v2289_v62 }
 0x741   : > { %v2318_v6 = vmul.f32 %v2286_v23, %v2286_v23  ;;  %v2319_v52 = vmul.f32 %v2287_v39, %v2287_v39  ;;  %v2346_v40 = vmul.f32 %v2290_v19, %v2290_v19 }
 0x742   : > { %v2331_v54 = vadd.f32 %v2330_v43, %v2316_v26  ;;  %v2301_v41 = vadd.f32 %v2300_v18, %v2299_v60  ;;  %v2288_v49 = vsub.f32 %v2270_v42, %v3803_v22  ;;  %v2347_v20 = vsel %vm668_vm4, %v2345_v9, 0.0 }
 0x743   : > { %v2348_v16 = vsel %vm668_vm4, %v2346_v40, 0.0 }
 0x744   : > { %v2332_v11 = vadd.f32 %v2331_v54, %v2317_v38  ;;  %v2302_v15 = vrot.slane %v2301_v41, 1  ;;  %v2320_v30 = vmul.f32 %v2288_v49, %v2288_v49  ;;  %v2349_v10 = vadd.f32 %v2348_v16, %v2347_v20 }
 0x746   : > { %v2333_v27 = vadd.f32 %v2332_v11, %v2318_v6  ;;  %v2303_v28 = vadd.f32 %v2302_v15, %v2301_v41 }
 0x748   : > { %v2334_v21 = vadd.f32 %v2333_v27, %v2319_v52  ;;  %2572 = vpush %v2303_v28 }
 0x74a   : > { %v2335_v55 = vadd.f32 %v2334_v21, %v2320_v30 }
 0x74c   : > { %2336 = vadd.xlane.f32.xlu0 %v2335_v55 }
 0x750   : > { %2350 = vadd.xlane.f32.xlu0 %v2349_v10 }
 0x779   : > { %s2573_s13 = spop %2572 }
 0x77a   : > { %v2360_v13 = vstv %s2573_s13 }
 0x77b   : > { %v2361_v47 = vsel %vm2359_vm12, %v2360_v13, 0.0 }
 0x7d9   : > { %v2337_v36 = vpop.xlane.xlu0 %2336 }
 0x7da   : > { %v2338_v45 = vrot.slane %v2337_v36, 4 }
 0x7dc   : > { %v2339_v3 = vadd.f32 %v2338_v45, %v2337_v36 }
 0x7dd   : > { %v2351_v53 = vpop.xlane.xlu0 %2350 }
 0x7de   : > { %v2340_v7 = vrot.slane %v2339_v3, 2  ;;  %v2352_v56 = vrot.slane %v2351_v53, 4 }
 0x7e0   : > { %v2353_v4 = vadd.f32 %v2352_v56, %v2351_v53  ;;  %v2341_v32 = vadd.f32 %v2340_v7, %v2339_v3 }
 0x7e2   : > { %v2354_v35 = vrot.slane %v2353_v4, 2  ;;  %v2342_v59 = vrot.slane %v2341_v32, 1 }
 0x7e4   : > { %v2355_v17 = vadd.f32 %v2354_v35, %v2353_v4  ;;  %v2343_v37 = vadd.f32 %v2342_v59, %v2341_v32 }
 0x7e6   : > { %2574 = vpush %v2343_v37  ;;  %v2356_v63 = vrot.slane %v2355_v17, 1 }
 0x7e8   : > { %v2357_v29 = vadd.f32 %v2356_v63, %v2355_v17 }
 0x7ea   : > { %2576 = vpush %v2357_v29 }
 0x817   : > { %s2575_s14 = spop %2574 }
 0x818   : > { %v2363_v44 = vstv %s2575_s14 }
 0x819   : > { %v2364_v61 = vsel %vm2362_vm11, %v2363_v44, 0.0 }
 0x81a   : > { %v2365_v51 = vadd.f32 %v2364_v61, %v2361_v47 }
 0x81b   : > { %s2577_s19 = spop %2576 }
 0x81c   : > { %v2367_v46 = vstv %s2577_s19 }
 0x81d   : > { %v2368_v8 = vsel %vm2366_vm13, %v2367_v46, 0.0 }
 0x81e   : > { %v2369_v50 = vadd.f32 %v2368_v8, %v2365_v51 }
 0x820   : > { %2370 = vst [vmem:[%s341_s22] sm:$0x1] %v2369_v50 }
 0x821 PF: > { %s20_s30 = sadd.s32 1, %s2603_s30  }
 0x822   : > { %p17_p4 = scmp.ge.s32.totalorder %s20_s30, 4  }
 0x824   :  { %19 = sbr.rel (!%p17_p4) target bundleno = 1 (0x1), region = 97 }

</bundles_post_ra>
